<compile_context>
chip_gen: v5e
topology: v5e:2x2
jax: 0.10.0
libtpu: 0.0.40
codegen_flags: <defaults>
</compile_context>

<pallas_src>
import functools

import jax
import jax.numpy as jnp
from jax.experimental import pallas as pl
from jax.experimental.pallas import tpu as pltpu


def _round_up(x, m):
    return ((x + m - 1) // m) * m


def _pad_axis(a, axis, new_size):
    pads = [(0, 0)] * a.ndim
    pads[axis] = (0, new_size - a.shape[axis])
    return jnp.pad(a, pads)


def _images_per_step(N, H, W, cmid_p):
    """Largest divisor of N whose fused intermediate stays within a small
    VMEM / register-pressure budget (keeps spills and scratch bounded)."""
    best = 1
    for bn in range(1, N + 1):
        if N % bn:
            continue
        rows = bn * H * W
        scratch_bytes = bn * (H + 8) * _round_up(W + 16, 8) * cmid_p * 4
        if rows <= 1024 and scratch_bytes <= (2 << 20):
            best = bn
    return best


# ---------------------------------------------------------------------------
# Fused kernel: 1x1 conv+BN+ReLU6 -> 3x3 depthwise+BN+ReLU6 -> 1x1 conv+BN
# One grid step processes `bn` images; the Cmid intermediate lives in a
# zero-padded VMEM scratch (halo rows/cols stay zero -> "same" padding).
# ---------------------------------------------------------------------------
def _qmbconv_fused_kernel(x_ref, w1_ref, b1_ref, w2_ref, b2_ref,
                          w3_ref, b3_ref, o_ref, ypad_ref, *, H, W, K, w_lo):
    pad = (K - 1) // 2
    bn = x_ref.shape[0]            # images per grid step
    cin = x_ref.shape[-1]
    cm = w1_ref.shape[1]           # lane-padded mid channels

    # Zero the padded scratch: the interior is fully overwritten below, but the
    # halo must be zero every step.  Full-vreg stores over the small scratch
    # are cheaper & simpler than masked halo-only stores and keep every grid
    # step self-contained (megacore-safe).
    ypad_ref[...] = jnp.zeros(ypad_ref.shape, ypad_ref.dtype)

    # ---- stage 1: inverted 1x1 conv (Cin -> Cmid) + bias + ReLU6 ------------
    # x_ref: (bn, H*W, Cin); w1_ref: (Cin, Cmid). BN scale already folded in.
    y = jnp.dot(x_ref[...].reshape(bn * H * W, cin), w1_ref[...],
                preferred_element_type=jnp.float32)
    y = jnp.clip(y + b1_ref[...], 0.0, 6.0)                  # ReLU6
    # Interior starts at sublane-aligned W offset `w_lo` -> unmasked store.
    ypad_ref[:, pad:pad + H, w_lo:w_lo + W, :] = y.reshape(bn, H, W, cm)

    # ---- stage 2+3 per image (bounds live vreg pressure) --------------------
    for b in range(bn):
        # KxK depthwise conv + bias + ReLU6
        acc = jnp.zeros((H, W, cm), jnp.float32)
        for dy in range(K):
            for dx in range(K):
                tap = w2_ref[dy * K + dx, :]                  # (Cmid,)
                col = w_lo - pad + dx
                acc = acc + ypad_ref[b, dy:dy + H, col:col + W, :] * tap
        z = jnp.clip(acc + b2_ref[0, :], 0.0, 6.0)            # ReLU6

        # pointwise 1x1 conv (Cmid -> Cout) + bias (no act)
        out = jnp.dot(z.reshape(H * W, cm), w3_ref[...],
                      preferred_element_type=jnp.float32) + b3_ref[...]
        o_ref[b] = out.astype(o_ref.dtype)


def qmbconv_forward(x_nchw, params, *, K=3):
    N, cin, H, W = x_nchw.shape
    cmid_p = params["w1"].shape[1]
    cout_p = params["w3"].shape[1]
    cout = params["cout"]
    pad = (K - 1) // 2

    bn = _images_per_step(N, H, W, cmid_p)
    # Interior W offset aligned to a sublane tile; scratch W extent multiple of 8.
    w_lo = _round_up(pad, 8) if pad > 0 else 0
    wp = _round_up(w_lo + W + pad, 8)

    # NCHW -> NHWC -> (N, H*W, Cin): channels on the lane axis for the matmuls.
    x = jnp.transpose(x_nchw, (0, 2, 3, 1)).astype(jnp.float32)
    x = x.reshape(N, H * W, cin)

    out = pl.pallas_call(
        functools.partial(_qmbconv_fused_kernel, H=H, W=W, K=K, w_lo=w_lo),
        out_shape=jax.ShapeDtypeStruct((N, H * W, cout_p), jnp.float32),
        grid=(N // bn,),
        in_specs=[
            pl.BlockSpec((bn, H * W, cin), lambda g: (g, 0, 0)),
            pl.BlockSpec((cin, cmid_p), lambda g: (0, 0)),
            pl.BlockSpec((1, cmid_p), lambda g: (0, 0)),
            pl.BlockSpec((K * K, cmid_p), lambda g: (0, 0)),
            pl.BlockSpec((1, cmid_p), lambda g: (0, 0)),
            pl.BlockSpec((cmid_p, cout_p), lambda g: (0, 0)),
            pl.BlockSpec((1, cout_p), lambda g: (0, 0)),
        ],
        out_specs=pl.BlockSpec((bn, H * W, cout_p), lambda g: (g, 0, 0)),
        scratch_shapes=[
            pltpu.VMEM((bn, H + 2 * pad, wp, cmid_p), jnp.float32),
        ],
        compiler_params=pltpu.CompilerParams(
            dimension_semantics=("parallel",)),
    )(x, params["w1"], params["b1"], params["w2"], params["b2"],
      params["w3"], params["b3"])

    # (N, H*W, Cout_p) -> NHWC -> slice real channels -> NCHW (PyTorch layout).
    out = out.reshape(N, H, W, cout_p)[..., :cout]
    return jnp.transpose(out, (0, 3, 1, 2))


# ---------------------------------------------------------------------------
# Parameter construction (deterministic, synthetic). BN (inference mode) is
# folded: scale into the conv weights, bias kept separately. Channel dims are
# zero-padded to multiples of 128 for lane-dense kernels (exactness preserved).
# ---------------------------------------------------------------------------
def make_params(key, cin, cmid, cout, K):
    ks = jax.random.split(key, 15)

    def bn(kg, kb, km, kv, c, eps=1e-5):
        gamma = 1.0 + 0.1 * jax.random.normal(kg, (c,), jnp.float32)
        beta = 0.1 * jax.random.normal(kb, (c,), jnp.float32)
        mean = 0.05 * jax.random.normal(km, (c,), jnp.float32)
        var = jnp.abs(jax.random.normal(kv, (c,), jnp.float32)) * 0.2 + 0.5
        scale = gamma / jnp.sqrt(var + eps)
        bias = beta - mean * scale
        return scale, bias

    cmid_p = _round_up(cmid, 128)
    cout_p = _round_up(cout, 128)

    # inverted 1x1 conv: torch weight (cmid, cin, 1, 1) -> (cin, cmid)
    w1 = 0.1 * jax.random.normal(ks[0], (cmid, cin, 1, 1), jnp.float32)
    w1 = jnp.transpose(w1[:, :, 0, 0], (1, 0))
    s1, b1 = bn(ks[1], ks[2], ks[3], ks[4], cmid)
    w1 = w1 * s1[None, :]                      # fold BN scale into weights

    # depthwise KxK conv: torch weight (cmid, 1, K, K) -> (K*K, cmid)
    w2 = 0.1 * jax.random.normal(ks[5], (cmid, 1, K, K), jnp.float32)
    w2 = jnp.transpose(w2[:, 0].reshape(cmid, K * K), (1, 0))
    s2, b2 = bn(ks[6], ks[7], ks[8], ks[9], cmid)
    w2 = w2 * s2[None, :]

    # pointwise 1x1 conv: torch weight (cout, cmid, 1, 1) -> (cmid, cout)
    w3 = 0.1 * jax.random.normal(ks[10], (cout, cmid, 1, 1), jnp.float32)
    w3 = jnp.transpose(w3[:, :, 0, 0], (1, 0))
    s3, b3 = bn(ks[11], ks[12], ks[13], ks[14], cout)
    w3 = w3 * s3[None, :]

    # Zero-pad channel dims so kernel matmul outputs / stores are lane-dense.
    return dict(
        w1=_pad_axis(w1, 1, cmid_p),
        b1=_pad_axis(b1[None, :], 1, cmid_p),
        w2=_pad_axis(w2, 1, cmid_p),
        b2=_pad_axis(b2[None, :], 1, cmid_p),
        w3=_pad_axis(_pad_axis(w3, 0, cmid_p), 1, cout_p),
        b3=_pad_axis(b3[None, :], 1, cout_p),
        cout=cout,
    )


# ---------------------------------------------------------------------------
# Pure-JAX reference (same folded/padded params) for a correctness self-check.
# ---------------------------------------------------------------------------
def qmbconv_reference(x_nchw, params, *, K=3):
    x = jnp.transpose(x_nchw, (0, 2, 3, 1)).astype(jnp.float32)   # NHWC
    H, W = x.shape[1], x.shape[2]
    pad = (K - 1) // 2
    y = jnp.clip(jnp.einsum("nhwc,cm->nhwm", x, params["w1"])
                 + params["b1"][0], 0.0, 6.0)
    yp = jnp.pad(y, ((0, 0), (pad, pad), (pad, pad), (0, 0)))
    acc = jnp.zeros_like(y)
    for dy in range(K):
        for dx in range(K):
            acc = acc + yp[:, dy:dy + H, dx:dx + W, :] * params["w2"][dy * K + dx]
    z = jnp.clip(acc + params["b2"][0], 0.0, 6.0)
    o = jnp.einsum("nhwm,mc->nhwc", z, params["w3"]) + params["b3"][0]
    o = o[..., :params["cout"]]
    return jnp.transpose(o, (0, 3, 1, 2))


if __name__ == "__main__":
    key = jax.random.PRNGKey(0)
    kx, kp = jax.random.split(key)

    # QMBConv(in_channels=4, out_channels=8, kernel_size=3, stride=1,
    #         expand_ratio=6) -> mid_channels = 24
    N, Cin, H, W = 2, 4, 16, 16
    Cout, K = 8, 3
    Cmid = round(Cin * 6)

    x = jax.random.normal(kx, (N, Cin, H, W), jnp.float32)
    params = make_params(kp, Cin, Cmid, Cout, K)

    out = qmbconv_forward(x, params, K=K)
    jax.block_until_ready(out)
    assert out.shape == (N, Cout, H, W), out.shape

    ref = qmbconv_reference(x, params, K=K)
    max_err = float(jnp.max(jnp.abs(out - ref)))
    assert max_err < 1e-3, f"mismatch vs reference: {max_err}"

    print("KERNEL_OK")
</pallas_src>

<mosaic_0001>
module attributes {stable_mosaic.version = 11 : i64} {
  func.func @_qmbconv_fused_kernel(%arg0: i32, %arg1: memref<2x256x4xf32, #tpu.memory_space<vmem>>, %arg2: memref<4x128xf32, #tpu.memory_space<vmem>>, %arg3: memref<1x128xf32, #tpu.memory_space<vmem>>, %arg4: memref<9x128xf32, #tpu.memory_space<vmem>>, %arg5: memref<1x128xf32, #tpu.memory_space<vmem>>, %arg6: memref<128x128xf32, #tpu.memory_space<vmem>>, %arg7: memref<1x128xf32, #tpu.memory_space<vmem>>, %arg8: memref<2x256x128xf32, #tpu.memory_space<vmem>>, %arg9: memref<2x18x32x128xf32, #tpu.memory_space<vmem>>) attributes {dimension_semantics = [#tpu.dimension_semantics<parallel>], iteration_bounds = array<i64: 1>, scalar_prefetch = 0 : i64, scratch_operands = 1 : i64, tpu.core_type = #tpu.core_type<tc>, window_params = [{transform_indices = @transform_0, window_bounds = array<i64: 2, 256, 4>}, {pipeline_mode = #tpu.pipeline_mode<synchronous>, transform_indices = @transform_1, window_bounds = array<i64: 4, 128>}, {pipeline_mode = #tpu.pipeline_mode<synchronous>, transform_indices = @transform_2, window_bounds = array<i64: 1, 128>}, {pipeline_mode = #tpu.pipeline_mode<synchronous>, transform_indices = @transform_3, window_bounds = array<i64: 9, 128>}, {pipeline_mode = #tpu.pipeline_mode<synchronous>, transform_indices = @transform_4, window_bounds = array<i64: 1, 128>}, {pipeline_mode = #tpu.pipeline_mode<synchronous>, transform_indices = @transform_5, window_bounds = array<i64: 128, 128>}, {pipeline_mode = #tpu.pipeline_mode<synchronous>, transform_indices = @transform_6, window_bounds = array<i64: 1, 128>}, {transform_indices = @transform_7, window_bounds = array<i64: 2, 256, 128>}]} {
    %cst = arith.constant 0.000000e+00 : f32
    %0 = vector.broadcast %cst : f32 to vector<2x18x32x128xf32>
    %c0 = arith.constant 0 : index
    %c0_0 = arith.constant 0 : index
    %c0_1 = arith.constant 0 : index
    %c0_2 = arith.constant 0 : index
    %1 = vector.load %arg9[%c0, %c0_0, %c0_1, %c0_2] : memref<2x18x32x128xf32, #tpu.memory_space<vmem>>, vector<2x18x32x128xf32>
    tpu.vector_store %arg9[%c0, %c0_0, %c0_1, %c0_2], %0 {strides = array<i32>} : memref<2x18x32x128xf32, #tpu.memory_space<vmem>>, vector<2x18x32x128xf32>,
    %c0_3 = arith.constant 0 : index
    %c0_4 = arith.constant 0 : index
    %c0_5 = arith.constant 0 : index
    %2 = vector.load %arg1[%c0_3, %c0_4, %c0_5] : memref<2x256x4xf32, #tpu.memory_space<vmem>>, vector<2x256x4xf32>
    %3 = vector.shape_cast %2 : vector<2x256x4xf32> to vector<512x4xf32>
    %c0_6 = arith.constant 0 : index
    %c0_7 = arith.constant 0 : index
    %4 = vector.load %arg2[%c0_6, %c0_7] : memref<4x128xf32, #tpu.memory_space<vmem>>, vector<4x128xf32>
    %cst_8 = arith.constant dense<0.000000e+00> : vector<512x128xf32>
    %5 = tpu.matmul %3, %4, %cst_8 {dimension_numbers = #tpu.dot_dimension_numbers<[1], [0], [0], [1], [0, 0, 1, 1], [], []>} : vector<512x4xf32>, vector<4x128xf32>, vector<512x128xf32> -> vector<512x128xf32>
    %c0_9 = arith.constant 0 : index
    %c0_10 = arith.constant 0 : index
    %6 = vector.load %arg3[%c0_9, %c0_10] : memref<1x128xf32, #tpu.memory_space<vmem>>, vector<1x128xf32>
    %7 = vector.broadcast %6 : vector<1x128xf32> to vector<512x128xf32>
    %8 = arith.addf %5, %7 : vector<512x128xf32>
    %cst_11 = arith.constant 0.000000e+00 : f32
    %cst_12 = arith.constant 6.000000e+00 : f32
    %9 = vector.broadcast %cst_11 : f32 to vector<512x128xf32>
    %10 = arith.maximumf %9, %8 : vector<512x128xf32>
    %11 = vector.broadcast %cst_12 : f32 to vector<512x128xf32>
    %12 = arith.minimumf %11, %10 : vector<512x128xf32>
    %13 = vector.shape_cast %12 : vector<512x128xf32> to vector<2x16x16x128xf32>
    %c0_13 = arith.constant 0 : index
    %c1 = arith.constant 1 : index
    %c8 = arith.constant 8 : index
    %c0_14 = arith.constant 0 : index
    %14 = vector.load %arg9[%c0_13, %c1, %c8, %c0_14] : memref<2x18x32x128xf32, #tpu.memory_space<vmem>>, vector<2x16x16x128xf32>
    tpu.vector_store %arg9[%c0_13, %c1, %c8, %c0_14], %13 {strides = array<i32>} : memref<2x18x32x128xf32, #tpu.memory_space<vmem>>, vector<2x16x16x128xf32>,
    %cst_15 = arith.constant 0.000000e+00 : f32
    %15 = vector.broadcast %cst_15 : f32 to vector<16x16x128xf32>
    %c0_16 = arith.constant 0 : index
    %c0_17 = arith.constant 0 : index
    %16 = vector.load %arg4[%c0_16, %c0_17] : memref<9x128xf32, #tpu.memory_space<vmem>>, vector<1x128xf32>
    %17 = vector.shape_cast %16 : vector<1x128xf32> to vector<128xf32>
    %c0_18 = arith.constant 0 : index
    %c0_19 = arith.constant 0 : index
    %c7 = arith.constant 7 : index
    %c0_20 = arith.constant 0 : index
    %18 = vector.load %arg9[%c0_18, %c0_19, %c7, %c0_20] : memref<2x18x32x128xf32, #tpu.memory_space<vmem>>, vector<1x16x16x128xf32>
    %19 = vector.shape_cast %18 : vector<1x16x16x128xf32> to vector<16x16x128xf32>
    %20 = vector.shape_cast %17 : vector<128xf32> to vector<1x1x128xf32>
    %21 = vector.broadcast %20 : vector<1x1x128xf32> to vector<16x16x128xf32>
    %22 = arith.mulf %19, %21 : vector<16x16x128xf32>
    %23 = arith.addf %15, %22 : vector<16x16x128xf32>
    %c1_21 = arith.constant 1 : index
    %c0_22 = arith.constant 0 : index
    %24 = vector.load %arg4[%c1_21, %c0_22] : memref<9x128xf32, #tpu.memory_space<vmem>>, vector<1x128xf32>
    %25 = vector.shape_cast %24 : vector<1x128xf32> to vector<128xf32>
    %c0_23 = arith.constant 0 : index
    %c0_24 = arith.constant 0 : index
    %c8_25 = arith.constant 8 : index
    %c0_26 = arith.constant 0 : index
    %26 = vector.load %arg9[%c0_23, %c0_24, %c8_25, %c0_26] : memref<2x18x32x128xf32, #tpu.memory_space<vmem>>, vector<1x16x16x128xf32>
    %27 = vector.shape_cast %26 : vector<1x16x16x128xf32> to vector<16x16x128xf32>
    %28 = vector.shape_cast %25 : vector<128xf32> to vector<1x1x128xf32>
    %29 = vector.broadcast %28 : vector<1x1x128xf32> to vector<16x16x128xf32>
    %30 = arith.mulf %27, %29 : vector<16x16x128xf32>
    %31 = arith.addf %23, %30 : vector<16x16x128xf32>
    %c2 = arith.constant 2 : index
    %c0_27 = arith.constant 0 : index
    %32 = vector.load %arg4[%c2, %c0_27] : memref<9x128xf32, #tpu.memory_space<vmem>>, vector<1x128xf32>
    %33 = vector.shape_cast %32 : vector<1x128xf32> to vector<128xf32>
    %c0_28 = arith.constant 0 : index
    %c0_29 = arith.constant 0 : index
    %c9 = arith.constant 9 : index
    %c0_30 = arith.constant 0 : index
    %34 = vector.load %arg9[%c0_28, %c0_29, %c9, %c0_30] : memref<2x18x32x128xf32, #tpu.memory_space<vmem>>, vector<1x16x16x128xf32>
    %35 = vector.shape_cast %34 : vector<1x16x16x128xf32> to vector<16x16x128xf32>
    %36 = vector.shape_cast %33 : vector<128xf32> to vector<1x1x128xf32>
    %37 = vector.broadcast %36 : vector<1x1x128xf32> to vector<16x16x128xf32>
    %38 = arith.mulf %35, %37 : vector<16x16x128xf32>
    %39 = arith.addf %31, %38 : vector<16x16x128xf32>
    %c3 = arith.constant 3 : index
    %c0_31 = arith.constant 0 : index
    %40 = vector.load %arg4[%c3, %c0_31] : memref<9x128xf32, #tpu.memory_space<vmem>>, vector<1x128xf32>
    %41 = vector.shape_cast %40 : vector<1x128xf32> to vector<128xf32>
    %c0_32 = arith.constant 0 : index
    %c1_33 = arith.constant 1 : index
    %c7_34 = arith.constant 7 : index
    %c0_35 = arith.constant 0 : index
    %42 = vector.load %arg9[%c0_32, %c1_33, %c7_34, %c0_35] : memref<2x18x32x128xf32, #tpu.memory_space<vmem>>, vector<1x16x16x128xf32>
    %43 = vector.shape_cast %42 : vector<1x16x16x128xf32> to vector<16x16x128xf32>
    %44 = vector.shape_cast %41 : vector<128xf32> to vector<1x1x128xf32>
    %45 = vector.broadcast %44 : vector<1x1x128xf32> to vector<16x16x128xf32>
    %46 = arith.mulf %43, %45 : vector<16x16x128xf32>
    %47 = arith.addf %39, %46 : vector<16x16x128xf32>
    %c4 = arith.constant 4 : index
    %c0_36 = arith.constant 0 : index
    %48 = vector.load %arg4[%c4, %c0_36] : memref<9x128xf32, #tpu.memory_space<vmem>>, vector<1x128xf32>
    %49 = vector.shape_cast %48 : vector<1x128xf32> to vector<128xf32>
    %c0_37 = arith.constant 0 : index
    %c1_38 = arith.constant 1 : index
    %c8_39 = arith.constant 8 : index
    %c0_40 = arith.constant 0 : index
    %50 = vector.load %arg9[%c0_37, %c1_38, %c8_39, %c0_40] : memref<2x18x32x128xf32, #tpu.memory_space<vmem>>, vector<1x16x16x128xf32>
    %51 = vector.shape_cast %50 : vector<1x16x16x128xf32> to vector<16x16x128xf32>
    %52 = vector.shape_cast %49 : vector<128xf32> to vector<1x1x128xf32>
    %53 = vector.broadcast %52 : vector<1x1x128xf32> to vector<16x16x128xf32>
    %54 = arith.mulf %51, %53 : vector<16x16x128xf32>
    %55 = arith.addf %47, %54 : vector<16x16x128xf32>
    %c5 = arith.constant 5 : index
    %c0_41 = arith.constant 0 : index
    %56 = vector.load %arg4[%c5, %c0_41] : memref<9x128xf32, #tpu.memory_space<vmem>>, vector<1x128xf32>
    %57 = vector.shape_cast %56 : vector<1x128xf32> to vector<128xf32>
    %c0_42 = arith.constant 0 : index
    %c1_43 = arith.constant 1 : index
    %c9_44 = arith.constant 9 : index
    %c0_45 = arith.constant 0 : index
    %58 = vector.load %arg9[%c0_42, %c1_43, %c9_44, %c0_45] : memref<2x18x32x128xf32, #tpu.memory_space<vmem>>, vector<1x16x16x128xf32>
    %59 = vector.shape_cast %58 : vector<1x16x16x128xf32> to vector<16x16x128xf32>
    %60 = vector.shape_cast %57 : vector<128xf32> to vector<1x1x128xf32>
    %61 = vector.broadcast %60 : vector<1x1x128xf32> to vector<16x16x128xf32>
    %62 = arith.mulf %59, %61 : vector<16x16x128xf32>
    %63 = arith.addf %55, %62 : vector<16x16x128xf32>
    %c6 = arith.constant 6 : index
    %c0_46 = arith.constant 0 : index
    %64 = vector.load %arg4[%c6, %c0_46] : memref<9x128xf32, #tpu.memory_space<vmem>>, vector<1x128xf32>
    %65 = vector.shape_cast %64 : vector<1x128xf32> to vector<128xf32>
    %c0_47 = arith.constant 0 : index
    %c2_48 = arith.constant 2 : index
    %c7_49 = arith.constant 7 : index
    %c0_50 = arith.constant 0 : index
    %66 = vector.load %arg9[%c0_47, %c2_48, %c7_49, %c0_50] : memref<2x18x32x128xf32, #tpu.memory_space<vmem>>, vector<1x16x16x128xf32>
    %67 = vector.shape_cast %66 : vector<1x16x16x128xf32> to vector<16x16x128xf32>
    %68 = vector.shape_cast %65 : vector<128xf32> to vector<1x1x128xf32>
    %69 = vector.broadcast %68 : vector<1x1x128xf32> to vector<16x16x128xf32>
    %70 = arith.mulf %67, %69 : vector<16x16x128xf32>
    %71 = arith.addf %63, %70 : vector<16x16x128xf32>
    %c7_51 = arith.constant 7 : index
    %c0_52 = arith.constant 0 : index
    %72 = vector.load %arg4[%c7_51, %c0_52] : memref<9x128xf32, #tpu.memory_space<vmem>>, vector<1x128xf32>
    %73 = vector.shape_cast %72 : vector<1x128xf32> to vector<128xf32>
    %c0_53 = arith.constant 0 : index
    %c2_54 = arith.constant 2 : index
    %c8_55 = arith.constant 8 : index
    %c0_56 = arith.constant 0 : index
    %74 = vector.load %arg9[%c0_53, %c2_54, %c8_55, %c0_56] : memref<2x18x32x128xf32, #tpu.memory_space<vmem>>, vector<1x16x16x128xf32>
    %75 = vector.shape_cast %74 : vector<1x16x16x128xf32> to vector<16x16x128xf32>
    %76 = vector.shape_cast %73 : vector<128xf32> to vector<1x1x128xf32>
    %77 = vector.broadcast %76 : vector<1x1x128xf32> to vector<16x16x128xf32>
    %78 = arith.mulf %75, %77 : vector<16x16x128xf32>
    %79 = arith.addf %71, %78 : vector<16x16x128xf32>
    %c8_57 = arith.constant 8 : index
    %c0_58 = arith.constant 0 : index
    %80 = vector.load %arg4[%c8_57, %c0_58] : memref<9x128xf32, #tpu.memory_space<vmem>>, vector<1x128xf32>
    %81 = vector.shape_cast %80 : vector<1x128xf32> to vector<128xf32>
    %c0_59 = arith.constant 0 : index
    %c2_60 = arith.constant 2 : index
    %c9_61 = arith.constant 9 : index
    %c0_62 = arith.constant 0 : index
    %82 = vector.load %arg9[%c0_59, %c2_60, %c9_61, %c0_62] : memref<2x18x32x128xf32, #tpu.memory_space<vmem>>, vector<1x16x16x128xf32>
    %83 = vector.shape_cast %82 : vector<1x16x16x128xf32> to vector<16x16x128xf32>
    %84 = vector.shape_cast %81 : vector<128xf32> to vector<1x1x128xf32>
    %85 = vector.broadcast %84 : vector<1x1x128xf32> to vector<16x16x128xf32>
    %86 = arith.mulf %83, %85 : vector<16x16x128xf32>
    %87 = arith.addf %79, %86 : vector<16x16x128xf32>
    %c0_63 = arith.constant 0 : index
    %c0_64 = arith.constant 0 : index
    %88 = vector.load %arg5[%c0_63, %c0_64] : memref<1x128xf32, #tpu.memory_space<vmem>>, vector<1x128xf32>
    %89 = vector.shape_cast %88 : vector<1x128xf32> to vector<128xf32>
    %90 = vector.shape_cast %89 : vector<128xf32> to vector<1x1x128xf32>
    %91 = vector.broadcast %90 : vector<1x1x128xf32> to vector<16x16x128xf32>
    %92 = arith.addf %87, %91 : vector<16x16x128xf32>
    %cst_65 = arith.constant 0.000000e+00 : f32
    %cst_66 = arith.constant 6.000000e+00 : f32
    %93 = vector.broadcast %cst_65 : f32 to vector<16x16x128xf32>
    %94 = arith.maximumf %93, %92 : vector<16x16x128xf32>
    %95 = vector.broadcast %cst_66 : f32 to vector<16x16x128xf32>
    %96 = arith.minimumf %95, %94 : vector<16x16x128xf32>
    %97 = vector.shape_cast %96 : vector<16x16x128xf32> to vector<256x128xf32>
    %c0_67 = arith.constant 0 : index
    %c0_68 = arith.constant 0 : index
    %98 = vector.load %arg6[%c0_67, %c0_68] : memref<128x128xf32, #tpu.memory_space<vmem>>, vector<128x128xf32>
    %cst_69 = arith.constant dense<0.000000e+00> : vector<256x128xf32>
    %99 = tpu.matmul %97, %98, %cst_69 {dimension_numbers = #tpu.dot_dimension_numbers<[1], [0], [0], [1], [0, 0, 1, 1], [], []>} : vector<256x128xf32>, vector<128x128xf32>, vector<256x128xf32> -> vector<256x128xf32>
    %c0_70 = arith.constant 0 : index
    %c0_71 = arith.constant 0 : index
    %100 = vector.load %arg7[%c0_70, %c0_71] : memref<1x128xf32, #tpu.memory_space<vmem>>, vector<1x128xf32>
    %101 = vector.broadcast %100 : vector<1x128xf32> to vector<256x128xf32>
    %102 = arith.addf %99, %101 : vector<256x128xf32>
    %c0_72 = arith.constant 0 : index
    %c0_73 = arith.constant 0 : index
    %c0_74 = arith.constant 0 : index
    %103 = vector.load %arg8[%c0_72, %c0_73, %c0_74] : memref<2x256x128xf32, #tpu.memory_space<vmem>>, vector<1x256x128xf32>
    %104 = vector.shape_cast %103 : vector<1x256x128xf32> to vector<256x128xf32>
    %105 = vector.shape_cast %102 : vector<256x128xf32> to vector<1x256x128xf32>
    tpu.vector_store %arg8[%c0_72, %c0_73, %c0_74], %105 {strides = array<i32>} : memref<2x256x128xf32, #tpu.memory_space<vmem>>, vector<1x256x128xf32>,
    %cst_75 = arith.constant 0.000000e+00 : f32
    %106 = vector.broadcast %cst_75 : f32 to vector<16x16x128xf32>
    %c0_76 = arith.constant 0 : index
    %c0_77 = arith.constant 0 : index
    %107 = vector.load %arg4[%c0_76, %c0_77] : memref<9x128xf32, #tpu.memory_space<vmem>>, vector<1x128xf32>
    %108 = vector.shape_cast %107 : vector<1x128xf32> to vector<128xf32>
    %c1_78 = arith.constant 1 : index
    %c0_79 = arith.constant 0 : index
    %c7_80 = arith.constant 7 : index
    %c0_81 = arith.constant 0 : index
    %109 = vector.load %arg9[%c1_78, %c0_79, %c7_80, %c0_81] : memref<2x18x32x128xf32, #tpu.memory_space<vmem>>, vector<1x16x16x128xf32>
    %110 = vector.shape_cast %109 : vector<1x16x16x128xf32> to vector<16x16x128xf32>
    %111 = vector.shape_cast %108 : vector<128xf32> to vector<1x1x128xf32>
    %112 = vector.broadcast %111 : vector<1x1x128xf32> to vector<16x16x128xf32>
    %113 = arith.mulf %110, %112 : vector<16x16x128xf32>
    %114 = arith.addf %106, %113 : vector<16x16x128xf32>
    %c1_82 = arith.constant 1 : index
    %c0_83 = arith.constant 0 : index
    %115 = vector.load %arg4[%c1_82, %c0_83] : memref<9x128xf32, #tpu.memory_space<vmem>>, vector<1x128xf32>
    %116 = vector.shape_cast %115 : vector<1x128xf32> to vector<128xf32>
    %c1_84 = arith.constant 1 : index
    %c0_85 = arith.constant 0 : index
    %c8_86 = arith.constant 8 : index
    %c0_87 = arith.constant 0 : index
    %117 = vector.load %arg9[%c1_84, %c0_85, %c8_86, %c0_87] : memref<2x18x32x128xf32, #tpu.memory_space<vmem>>, vector<1x16x16x128xf32>
    %118 = vector.shape_cast %117 : vector<1x16x16x128xf32> to vector<16x16x128xf32>
    %119 = vector.shape_cast %116 : vector<128xf32> to vector<1x1x128xf32>
    %120 = vector.broadcast %119 : vector<1x1x128xf32> to vector<16x16x128xf32>
    %121 = arith.mulf %118, %120 : vector<16x16x128xf32>
    %122 = arith.addf %114, %121 : vector<16x16x128xf32>
    %c2_88 = arith.constant 2 : index
    %c0_89 = arith.constant 0 : index
    %123 = vector.load %arg4[%c2_88, %c0_89] : memref<9x128xf32, #tpu.memory_space<vmem>>, vector<1x128xf32>
    %124 = vector.shape_cast %123 : vector<1x128xf32> to vector<128xf32>
    %c1_90 = arith.constant 1 : index
    %c0_91 = arith.constant 0 : index
    %c9_92 = arith.constant 9 : index
    %c0_93 = arith.constant 0 : index
    %125 = vector.load %arg9[%c1_90, %c0_91, %c9_92, %c0_93] : memref<2x18x32x128xf32, #tpu.memory_space<vmem>>, vector<1x16x16x128xf32>
    %126 = vector.shape_cast %125 : vector<1x16x16x128xf32> to vector<16x16x128xf32>
    %127 = vector.shape_cast %124 : vector<128xf32> to vector<1x1x128xf32>
    %128 = vector.broadcast %127 : vector<1x1x128xf32> to vector<16x16x128xf32>
    %129 = arith.mulf %126, %128 : vector<16x16x128xf32>
    %130 = arith.addf %122, %129 : vector<16x16x128xf32>
    %c3_94 = arith.constant 3 : index
    %c0_95 = arith.constant 0 : index
    %131 = vector.load %arg4[%c3_94, %c0_95] : memref<9x128xf32, #tpu.memory_space<vmem>>, vector<1x128xf32>
    %132 = vector.shape_cast %131 : vector<1x128xf32> to vector<128xf32>
    %c1_96 = arith.constant 1 : index
    %c1_97 = arith.constant 1 : index
    %c7_98 = arith.constant 7 : index
    %c0_99 = arith.constant 0 : index
    %133 = vector.load %arg9[%c1_96, %c1_97, %c7_98, %c0_99] : memref<2x18x32x128xf32, #tpu.memory_space<vmem>>, vector<1x16x16x128xf32>
    %134 = vector.shape_cast %133 : vector<1x16x16x128xf32> to vector<16x16x128xf32>
    %135 = vector.shape_cast %132 : vector<128xf32> to vector<1x1x128xf32>
    %136 = vector.broadcast %135 : vector<1x1x128xf32> to vector<16x16x128xf32>
    %137 = arith.mulf %134, %136 : vector<16x16x128xf32>
    %138 = arith.addf %130, %137 : vector<16x16x128xf32>
    %c4_100 = arith.constant 4 : index
    %c0_101 = arith.constant 0 : index
    %139 = vector.load %arg4[%c4_100, %c0_101] : memref<9x128xf32, #tpu.memory_space<vmem>>, vector<1x128xf32>
    %140 = vector.shape_cast %139 : vector<1x128xf32> to vector<128xf32>
    %c1_102 = arith.constant 1 : index
    %c1_103 = arith.constant 1 : index
    %c8_104 = arith.constant 8 : index
    %c0_105 = arith.constant 0 : index
    %141 = vector.load %arg9[%c1_102, %c1_103, %c8_104, %c0_105] : memref<2x18x32x128xf32, #tpu.memory_space<vmem>>, vector<1x16x16x128xf32>
    %142 = vector.shape_cast %141 : vector<1x16x16x128xf32> to vector<16x16x128xf32>
    %143 = vector.shape_cast %140 : vector<128xf32> to vector<1x1x128xf32>
    %144 = vector.broadcast %143 : vector<1x1x128xf32> to vector<16x16x128xf32>
    %145 = arith.mulf %142, %144 : vector<16x16x128xf32>
    %146 = arith.addf %138, %145 : vector<16x16x128xf32>
    %c5_106 = arith.constant 5 : index
    %c0_107 = arith.constant 0 : index
    %147 = vector.load %arg4[%c5_106, %c0_107] : memref<9x128xf32, #tpu.memory_space<vmem>>, vector<1x128xf32>
    %148 = vector.shape_cast %147 : vector<1x128xf32> to vector<128xf32>
    %c1_108 = arith.constant 1 : index
    %c1_109 = arith.constant 1 : index
    %c9_110 = arith.constant 9 : index
    %c0_111 = arith.constant 0 : index
    %149 = vector.load %arg9[%c1_108, %c1_109, %c9_110, %c0_111] : memref<2x18x32x128xf32, #tpu.memory_space<vmem>>, vector<1x16x16x128xf32>
    %150 = vector.shape_cast %149 : vector<1x16x16x128xf32> to vector<16x16x128xf32>
    %151 = vector.shape_cast %148 : vector<128xf32> to vector<1x1x128xf32>
    %152 = vector.broadcast %151 : vector<1x1x128xf32> to vector<16x16x128xf32>
    %153 = arith.mulf %150, %152 : vector<16x16x128xf32>
    %154 = arith.addf %146, %153 : vector<16x16x128xf32>
    %c6_112 = arith.constant 6 : index
    %c0_113 = arith.constant 0 : index
    %155 = vector.load %arg4[%c6_112, %c0_113] : memref<9x128xf32, #tpu.memory_space<vmem>>, vector<1x128xf32>
    %156 = vector.shape_cast %155 : vector<1x128xf32> to vector<128xf32>
    %c1_114 = arith.constant 1 : index
    %c2_115 = arith.constant 2 : index
    %c7_116 = arith.constant 7 : index
    %c0_117 = arith.constant 0 : index
    %157 = vector.load %arg9[%c1_114, %c2_115, %c7_116, %c0_117] : memref<2x18x32x128xf32, #tpu.memory_space<vmem>>, vector<1x16x16x128xf32>
    %158 = vector.shape_cast %157 : vector<1x16x16x128xf32> to vector<16x16x128xf32>
    %159 = vector.shape_cast %156 : vector<128xf32> to vector<1x1x128xf32>
    %160 = vector.broadcast %159 : vector<1x1x128xf32> to vector<16x16x128xf32>
    %161 = arith.mulf %158, %160 : vector<16x16x128xf32>
    %162 = arith.addf %154, %161 : vector<16x16x128xf32>
    %c7_118 = arith.constant 7 : index
    %c0_119 = arith.constant 0 : index
    %163 = vector.load %arg4[%c7_118, %c0_119] : memref<9x128xf32, #tpu.memory_space<vmem>>, vector<1x128xf32>
    %164 = vector.shape_cast %163 : vector<1x128xf32> to vector<128xf32>
    %c1_120 = arith.constant 1 : index
    %c2_121 = arith.constant 2 : index
    %c8_122 = arith.constant 8 : index
    %c0_123 = arith.constant 0 : index
    %165 = vector.load %arg9[%c1_120, %c2_121, %c8_122, %c0_123] : memref<2x18x32x128xf32, #tpu.memory_space<vmem>>, vector<1x16x16x128xf32>
    %166 = vector.shape_cast %165 : vector<1x16x16x128xf32> to vector<16x16x128xf32>
    %167 = vector.shape_cast %164 : vector<128xf32> to vector<1x1x128xf32>
    %168 = vector.broadcast %167 : vector<1x1x128xf32> to vector<16x16x128xf32>
    %169 = arith.mulf %166, %168 : vector<16x16x128xf32>
    %170 = arith.addf %162, %169 : vector<16x16x128xf32>
    %c8_124 = arith.constant 8 : index
    %c0_125 = arith.constant 0 : index
    %171 = vector.load %arg4[%c8_124, %c0_125] : memref<9x128xf32, #tpu.memory_space<vmem>>, vector<1x128xf32>
    %172 = vector.shape_cast %171 : vector<1x128xf32> to vector<128xf32>
    %c1_126 = arith.constant 1 : index
    %c2_127 = arith.constant 2 : index
    %c9_128 = arith.constant 9 : index
    %c0_129 = arith.constant 0 : index
    %173 = vector.load %arg9[%c1_126, %c2_127, %c9_128, %c0_129] : memref<2x18x32x128xf32, #tpu.memory_space<vmem>>, vector<1x16x16x128xf32>
    %174 = vector.shape_cast %173 : vector<1x16x16x128xf32> to vector<16x16x128xf32>
    %175 = vector.shape_cast %172 : vector<128xf32> to vector<1x1x128xf32>
    %176 = vector.broadcast %175 : vector<1x1x128xf32> to vector<16x16x128xf32>
    %177 = arith.mulf %174, %176 : vector<16x16x128xf32>
    %178 = arith.addf %170, %177 : vector<16x16x128xf32>
    %c0_130 = arith.constant 0 : index
    %c0_131 = arith.constant 0 : index
    %179 = vector.load %arg5[%c0_130, %c0_131] : memref<1x128xf32, #tpu.memory_space<vmem>>, vector<1x128xf32>
    %180 = vector.shape_cast %179 : vector<1x128xf32> to vector<128xf32>
    %181 = vector.shape_cast %180 : vector<128xf32> to vector<1x1x128xf32>
    %182 = vector.broadcast %181 : vector<1x1x128xf32> to vector<16x16x128xf32>
    %183 = arith.addf %178, %182 : vector<16x16x128xf32>
    %cst_132 = arith.constant 0.000000e+00 : f32
    %cst_133 = arith.constant 6.000000e+00 : f32
    %184 = vector.broadcast %cst_132 : f32 to vector<16x16x128xf32>
    %185 = arith.maximumf %184, %183 : vector<16x16x128xf32>
    %186 = vector.broadcast %cst_133 : f32 to vector<16x16x128xf32>
    %187 = arith.minimumf %186, %185 : vector<16x16x128xf32>
    %188 = vector.shape_cast %187 : vector<16x16x128xf32> to vector<256x128xf32>
    %c0_134 = arith.constant 0 : index
    %c0_135 = arith.constant 0 : index
    %189 = vector.load %arg6[%c0_134, %c0_135] : memref<128x128xf32, #tpu.memory_space<vmem>>, vector<128x128xf32>
    %cst_136 = arith.constant dense<0.000000e+00> : vector<256x128xf32>
    %190 = tpu.matmul %188, %189, %cst_136 {dimension_numbers = #tpu.dot_dimension_numbers<[1], [0], [0], [1], [0, 0, 1, 1], [], []>} : vector<256x128xf32>, vector<128x128xf32>, vector<256x128xf32> -> vector<256x128xf32>
    %c0_137 = arith.constant 0 : index
    %c0_138 = arith.constant 0 : index
    %191 = vector.load %arg7[%c0_137, %c0_138] : memref<1x128xf32, #tpu.memory_space<vmem>>, vector<1x128xf32>
    %192 = vector.broadcast %191 : vector<1x128xf32> to vector<256x128xf32>
    %193 = arith.addf %190, %192 : vector<256x128xf32>
    %c1_139 = arith.constant 1 : index
    %c0_140 = arith.constant 0 : index
    %c0_141 = arith.constant 0 : index
    %194 = vector.load %arg8[%c1_139, %c0_140, %c0_141] : memref<2x256x128xf32, #tpu.memory_space<vmem>>, vector<1x256x128xf32>
    %195 = vector.shape_cast %194 : vector<1x256x128xf32> to vector<256x128xf32>
    %196 = vector.shape_cast %193 : vector<256x128xf32> to vector<1x256x128xf32>
    tpu.vector_store %arg8[%c1_139, %c0_140, %c0_141], %196 {strides = array<i32>} : memref<2x256x128xf32, #tpu.memory_space<vmem>>, vector<1x256x128xf32>,
    return
  }
  func.func @transform_0(%arg0: i32) -> (i32, i32, i32) {
    %c0_i32 = arith.constant 0 : i32
    %c0_i32_0 = arith.constant 0 : i32
    %c0_i32_1 = arith.constant 0 : i32
    return %arg0, %c0_i32, %c0_i32_0 : i32, i32, i32
  }
  func.func @transform_1(%arg0: i32) -> (i32, i32) {
    %c0_i32 = arith.constant 0 : i32
    %c0_i32_0 = arith.constant 0 : i32
    %c0_i32_1 = arith.constant 0 : i32
    return %c0_i32, %c0_i32_0 : i32, i32
  }
  func.func @transform_2(%arg0: i32) -> (i32, i32) {
    %c0_i32 = arith.constant 0 : i32
    %c0_i32_0 = arith.constant 0 : i32
    %c0_i32_1 = arith.constant 0 : i32
    return %c0_i32, %c0_i32_0 : i32, i32
  }
  func.func @transform_3(%arg0: i32) -> (i32, i32) {
    %c0_i32 = arith.constant 0 : i32
    %c0_i32_0 = arith.constant 0 : i32
    %c0_i32_1 = arith.constant 0 : i32
    return %c0_i32, %c0_i32_0 : i32, i32
  }
  func.func @transform_4(%arg0: i32) -> (i32, i32) {
    %c0_i32 = arith.constant 0 : i32
    %c0_i32_0 = arith.constant 0 : i32
    %c0_i32_1 = arith.constant 0 : i32
    return %c0_i32, %c0_i32_0 : i32, i32
  }
  func.func @transform_5(%arg0: i32) -> (i32, i32) {
    %c0_i32 = arith.constant 0 : i32
    %c0_i32_0 = arith.constant 0 : i32
    %c0_i32_1 = arith.constant 0 : i32
    return %c0_i32, %c0_i32_0 : i32, i32
  }
  func.func @transform_6(%arg0: i32) -> (i32, i32) {
    %c0_i32 = arith.constant 0 : i32
    %c0_i32_0 = arith.constant 0 : i32
    %c0_i32_1 = arith.constant 0 : i32
    return %c0_i32, %c0_i32_0 : i32, i32
  }
  func.func @transform_7(%arg0: i32) -> (i32, i32, i32) {
    %c0_i32 = arith.constant 0 : i32
    %c0_i32_0 = arith.constant 0 : i32
    %c0_i32_1 = arith.constant 0 : i32
    return %arg0, %c0_i32, %c0_i32_0 : i32, i32, i32
  }
}

</mosaic_0001>

<bundles_post_ra>
// kernel: tpu_custom_call.1
= control target key start
LH: loop header
LB: loop body
LE: loop exit
PB: predicated region body
PF: predicated region fallthrough
CT: control target
= control target key end

     0   :  { %vm433_vm0 = vcmask 1043456   ;;  %vm240_vm1 = vcmask 31744   ;;  %s5387_s0 = inlined_call_operand.vmem [shape: f32[2,256,4], index: 0, kind: input, shape index: {}]   ;;  %s5388_s1 = inlined_call_operand.vmem [shape: f32[4,128], index: 1, kind: input, shape index: {}]   ;;  %s5389_s2 = inlined_call_operand.vmem [shape: f32[1,128], index: 2, kind: input, shape index: {}]   ;;  %s5390_s3 = inlined_call_operand.vmem [shape: f32[9,128], index: 3, kind: input, shape index: {}]   ;;  %s5391_s4 = inlined_call_operand.vmem [shape: f32[1,128], index: 4, kind: input, shape index: {}]   ;;  %s5392_s5 = inlined_call_operand.vmem [shape: f32[128,128], index: 5, kind: input, shape index: {}]   ;;  %s5393_s6 = inlined_call_operand.vmem [shape: f32[1,128], index: 6, kind: input, shape index: {}]   ;;  %s5394_s7 = inlined_call_operand.hbm [shape: f32[2,256,128], index: 7, kind: output, shape index: {}]  }
   0x1   :  { %v235_v0 = vld [vmem:[%s5388_s1] sm:$0xf]  ;;  %v172_v2 = vld [vmem:[%s5387_s0 + $0x8] sm:$0xff] }
   0x2   :  { %v171_v1 = vld [vmem:[%s5387_s0] sm:$0xff]  ;;  %3156 = vmatpush.msk.msra.mxu0 %vm433_vm0, %v235_v0  ;;  %3221 = vmatpush.msk.msra.mxu3 %vm433_vm0, %v235_v0 }
   0x3   :  { %3157 = vmatmul.msk.f32.vlgmr.msra.gmra.mxu0 %vm240_vm1, %v171_v1 }
   0xb   :  { %3158 = vmatmul.msk.f32.gmra.mxu0 %vm240_vm1, %v172_v2 }
   0xc   :  { %12 = vsyncpa [#allocation4], 0  ;;  %v173_v3 = vld [vmem:[%s5387_s0 + $0x10] sm:$0xff]  ;;  %v174_v4 = vld [vmem:[%s5387_s0 + $0x18] sm:$0xff]  ;;  %v3338_v13 = vmov 0.0   ;;  %s3144_s29 = sshll.u32 %s5394_s7, 4  ;;  %s3145_s29 = int_to_ptr.hbm [resolvable:$true] %s3144_s29 }
   0xd   :  { %v175_v5 = vld [vmem:[%s5387_s0 + $0x20] sm:$0xff]  ;;  %v176_v6 = vld [vmem:[%s5387_s0 + $0x28] sm:$0xff]  ;;  %v177_v7 = vld [vmem:[%s5387_s0 + $0x30] sm:$0xff]  ;;  %27 = vst [vmem:[#allocation2] sm:$0xff] %v3338_v13  ;;  %s3340_s30 = smov 128  }
   0xe   :  { %v178_v8 = vld [vmem:[%s5387_s0 + $0x38] sm:$0xff]  ;;  %v179_v9 = vld [vmem:[%s5387_s0 + $0x40] sm:$0xff]  ;;  %v180_v10 = vld [vmem:[%s5387_s0 + $0x48] sm:$0xff]  ;;  %28 = vst [vmem:[#allocation2 + $0x8] sm:$0xff] %v3338_v13 }
   0xf   :  { %v181_v11 = vld [vmem:[%s5387_s0 + $0x50] sm:$0xff]  ;;  %v182_v12 = vld [vmem:[%s5387_s0 + $0x58] sm:$0xff]  ;;  %29 = vst [vmem:[#allocation2 + $0x10] sm:$0xff] %v3338_v13  ;;  %v183_v14 = vld [vmem:[%s5387_s0 + $0x60] sm:$0xff] }
  0x10   :  { %30 = vst [vmem:[#allocation2 + $0x18] sm:$0xff] %v3338_v13  ;;  %v184_v15 = vld [vmem:[%s5387_s0 + $0x68] sm:$0xff]  ;;  %v185_v16 = vld [vmem:[%s5387_s0 + $0x70] sm:$0xff]  ;;  %v186_v17 = vld [vmem:[%s5387_s0 + $0x78] sm:$0xff] }
  0x11   :  { %31 = vst [vmem:[#allocation2 + $0x20] sm:$0xff] %v3338_v13  ;;  %v3485_v18 = vld [vmem:[%s5389_s2] ss:$0 sm:$0xff]  ;;  %v188_v25 = vld [vmem:[%s5387_s0 + $0x88] sm:$0xff]  ;;  %v1837_v26 = vld [vmem:[%s5392_s5 + $0x78] sm:$0xff] }
  0x12   :  { %34 = vst [vmem:[#allocation2 + $0x38] sm:$0xff] %v3338_v13  ;;  %v187_v20 = vld [vmem:[%s5387_s0 + $0x80] sm:$0xff]  ;;  %v1836_v27 = vld [vmem:[%s5392_s5 + $0x70] sm:$0xff]  ;;  %1842 = vmatpush.msra.mxu1 %v1837_v26  ;;  %3222 = vmatpush.msrb.mxu3 %v1837_v26  ;;  %v1835_v30 = vld [vmem:[%s5392_s5 + $0x68] sm:$0xff] }
  0x13   :  { %3159 = vmatmul.msk.f32.gmra.mxu0 %vm240_vm1, %v173_v3  ;;  %35 = vst [vmem:[#allocation2 + $0x40] sm:$0xff] %v3338_v13  ;;  %v189_v29 = vld [vmem:[%s5387_s0 + $0x90] sm:$0xff]  ;;  %v1834_v31 = vld [vmem:[%s5392_s5 + $0x60] sm:$0xff]  ;;  %v1833_v33 = vld [vmem:[%s5392_s5 + $0x58] sm:$0xff] }
  0x14   :  { %38 = vst [vmem:[#allocation2 + $0x58] sm:$0xff] %v3338_v13  ;;  %1843 = vmatpush.msra.mxu1 %v1836_v27  ;;  %3223 = vmatpush.msrb.mxu3 %v1836_v27  ;;  %v205_v32 = vld [vmem:[%s5387_s0 + $0x110] sm:$0xff]  ;;  %v190_v36 = vld [vmem:[%s5387_s0 + $0x98] sm:$0xff]  ;;  %v1831_v37 = vld [vmem:[%s5392_s5 + $0x48] sm:$0xff] }
  0x15   :  { %39 = vst [vmem:[#allocation2 + $0x60] sm:$0xff] %v3338_v13  ;;  %3191 = vmatmul.msk.f32.vlgmr.msra.gmra.mxu3 %vm240_vm1, %v205_v32  ;;  %v1832_v34 = vld [vmem:[%s5392_s5 + $0x50] sm:$0xff]  ;;  %v1830_v38 = vld [vmem:[%s5392_s5 + $0x40] sm:$0xff]  ;;  %v1829_v39 = vld [vmem:[%s5392_s5 + $0x38] sm:$0xff] }
  0x16   :  { %42 = vst [vmem:[#allocation2 + $0x78] sm:$0xff] %v3338_v13  ;;  %1844 = vmatpush.msra.mxu1 %v1835_v30  ;;  %3224 = vmatpush.msrb.mxu3 %v1835_v30  ;;  %v1828_v40 = vld [vmem:[%s5392_s5 + $0x30] sm:$0xff]  ;;  %v191_v42 = vld [vmem:[%s5387_s0 + $0xa0] sm:$0xff]  ;;  %v1827_v43 = vld [vmem:[%s5392_s5 + $0x28] sm:$0xff] }
  0x17   :  { %43 = vst [vmem:[#allocation2 + $0x80] sm:$0xff] %v3338_v13  ;;  %v3587_v44 = vld [vmem:[%s5390_s3] ss:$0 sm:$0xff]  ;;  %v840_v46 = vld [vmem:[#allocation2 + $0x7] sm:$0xff]  ;;  %v3600_v49 = vld [vmem:[%s5390_s3 + $0x1] ss:$0 sm:$0xff] }
  0x18   :  { %46 = vst [vmem:[#allocation2 + $0x98] sm:$0xff] %v3338_v13  ;;  %1845 = vmatpush.msra.mxu1 %v1834_v31  ;;  %3225 = vmatpush.msrb.mxu3 %v1834_v31  ;;  %v1826_v48 = vld [vmem:[%s5392_s5 + $0x20] sm:$0xff]  ;;  %v1825_v52 = vld [vmem:[%s5392_s5 + $0x18] sm:$0xff]  ;;  %v873_v53 = vmul.f32 %v3587_v44, %v840_v46  ;;  %v971_v54 = vmul.f32 0.0, %v3600_v49  ;;  %v1824_v59 = vld [vmem:[%s5392_s5 + $0x10] sm:$0xff] }
  0x19   :  { %47 = vst [vmem:[#allocation2 + $0xa0] sm:$0xff] %v3338_v13  ;;  %v3616_v56 = vld [vmem:[%s5390_s3 + $0x2] ss:$0 sm:$0xff]  ;;  %v206_v57 = vld [vmem:[%s5387_s0 + $0x118] sm:$0xff]  ;;  %v1036_v60 = vld [vmem:[#allocation2 + $0x9] sm:$0xff] }
  0x1a   :  { %50 = vst [vmem:[#allocation2 + $0xb8] sm:$0xff] %v3338_v13  ;;  %1846 = vmatpush.msra.mxu1 %v1833_v33  ;;  %3226 = vmatpush.msrb.mxu3 %v1833_v33  ;;  %v192_v0 = vld [vmem:[%s5387_s0 + $0xa8] sm:$0xff]  ;;  %v1003_v2 = vadd.f32 %v971_v54, %v873_v53  ;;  %v193_v26 = vld [vmem:[%s5387_s0 + $0xb0] sm:$0xff]  ;;  %v3681_v30 = vld [vmem:[%s5390_s3 + $0x5] ss:$0 sm:$0xff] }
  0x1b   :  { %3160 = vmatmul.msk.f32.gmra.mxu0 %vm240_vm1, %v174_v4  ;;  %51 = vst [vmem:[#allocation2 + $0xc0] sm:$0xff] %v3338_v13  ;;  %v1823_v1 = vld [vmem:[%s5392_s5 + $0x8] sm:$0xff]  ;;  %v3686_v31 = vld [vmem:[%s5390_s3 + $0x6] ss:$0 sm:$0xff] }
  0x1c   :  { %54 = vst [vmem:[#allocation2 + $0xd8] sm:$0xff] %v3338_v13  ;;  %1847 = vmatpush.msra.mxu1 %v1832_v34  ;;  %3227 = vmatpush.msrb.mxu3 %v1832_v34  ;;  %v841_v3 = vld [vmem:[#allocation2 + $0xf] sm:$0xff] }
  0x1d   :  { %55 = vst [vmem:[#allocation2 + $0xe0] sm:$0xff] %v3338_v13  ;;  %3192 = vmatmul.msk.f32.gmra.mxu3 %vm240_vm1, %v206_v57 }
  0x1e   :  { %58 = vst [vmem:[#allocation2 + $0xf8] sm:$0xff] %v3338_v13  ;;  %1848 = vmatpush.msra.mxu1 %v1831_v37  ;;  %3228 = vmatpush.msrb.mxu3 %v1831_v37 }
  0x1f   :  { %59 = vst [vmem:[#allocation2 + $0x100] sm:$0xff] %v3338_v13 }
  0x20   :  { %62 = vst [vmem:[#allocation2 + $0x118] sm:$0xff] %v3338_v13  ;;  %1849 = vmatpush.msra.mxu1 %v1830_v38  ;;  %3229 = vmatpush.msrb.mxu3 %v1830_v38  ;;  %v3701_v38 = vld [vmem:[%s5390_s3 + $0x8] ss:$0 sm:$0xff] }
  0x21   :  { %63 = vst [vmem:[#allocation2 + $0x120] sm:$0xff] %v3338_v13 }
  0x22   :  { %66 = vst [vmem:[#allocation2 + $0x138] sm:$0xff] %v3338_v13  ;;  %1850 = vmatpush.msra.mxu1 %v1829_v39  ;;  %3230 = vmatpush.msrb.mxu3 %v1829_v39 }
  0x23   :  { %3161 = vmatmul.msk.f32.gmra.mxu0 %vm240_vm1, %v175_v5  ;;  %67 = vst [vmem:[#allocation2 + $0x140] sm:$0xff] %v3338_v13 }
  0x24   :  { %70 = vst [vmem:[#allocation2 + $0x158] sm:$0xff] %v3338_v13  ;;  %1851 = vmatpush.msra.mxu1 %v1828_v40  ;;  %3231 = vmatpush.msrb.mxu3 %v1828_v40 }
  0x25   :  { %71 = vst [vmem:[#allocation2 + $0x160] sm:$0xff] %v3338_v13 }
  0x26   :  { %74 = vst [vmem:[#allocation2 + $0x178] sm:$0xff] %v3338_v13  ;;  %1852 = vmatpush.msra.mxu1 %v1827_v43  ;;  %3232 = vmatpush.msrb.mxu3 %v1827_v43 }
  0x27   :  { %75 = vst [vmem:[#allocation2 + $0x180] sm:$0xff] %v3338_v13 }
  0x28   :  { %78 = vst [vmem:[#allocation2 + $0x198] sm:$0xff] %v3338_v13  ;;  %1853 = vmatpush.msra.mxu1 %v1826_v48  ;;  %3233 = vmatpush.msrb.mxu3 %v1826_v48 }
  0x29   :  { %79 = vst [vmem:[#allocation2 + $0x1a0] sm:$0xff] %v3338_v13 }
  0x2a   :  { %82 = vst [vmem:[#allocation2 + $0x1b8] sm:$0xff] %v3338_v13  ;;  %1854 = vmatpush.msra.mxu1 %v1825_v52  ;;  %3234 = vmatpush.msrb.mxu3 %v1825_v52 }
  0x2b   :  { %3162 = vmatmul.msk.f32.gmra.mxu0 %vm240_vm1, %v176_v6  ;;  %83 = vst [vmem:[#allocation2 + $0x1c0] sm:$0xff] %v3338_v13  ;;  %v1069_v6 = vmul.f32 %v3616_v56, %v1036_v60 }
  0x2c   :  { %86 = vst [vmem:[#allocation2 + $0x1d8] sm:$0xff] %v3338_v13  ;;  %1855 = vmatpush.msra.mxu1 %v1824_v59  ;;  %3235 = vmatpush.msrb.mxu3 %v1824_v59 }
  0x2d   :  { %87 = vst [vmem:[#allocation2 + $0x1e0] sm:$0xff] %v3338_v13 }
  0x2e   :  { %90 = vst [vmem:[#allocation2 + $0x1f8] sm:$0xff] %v3338_v13  ;;  %1856 = vmatpush.msra.mxu1 %v1823_v1  ;;  %3236 = vmatpush.msrb.mxu3 %v1823_v1 }
  0x2f   :  { %91 = vst [vmem:[#allocation2 + $0x200] sm:$0xff] %v3338_v13 }
  0x30   :  { %94 = vst [vmem:[#allocation2 + $0x218] sm:$0xff] %v3338_v13 }
  0x31   :  { %95 = vst [vmem:[#allocation2 + $0x220] sm:$0xff] %v3338_v13 }
  0x32   :  { %96 = vst [vmem:[#allocation2 + $0x228] sm:$0xff] %v3338_v13 }
  0x33   :  { %3163 = vmatmul.msk.f32.gmra.mxu0 %vm240_vm1, %v177_v7  ;;  %97 = vst [vmem:[#allocation2 + $0x230] sm:$0xff] %v3338_v13  ;;  %v3640_v7 = vld [vmem:[%s5390_s3 + $0x3] ss:$0 sm:$0xff] }
  0x34   :  { %98 = vst [vmem:[#allocation2 + $0x238] sm:$0xff] %v3338_v13 }
  0x35   :  { %99 = vst [vmem:[#allocation2 + $0x240] sm:$0xff] %v3338_v13 }
  0x36   :  { %100 = vst [vmem:[#allocation2 + $0x248] sm:$0xff] %v3338_v13 }
  0x37   :  { %101 = vst [vmem:[#allocation2 + $0x250] sm:$0xff] %v3338_v13 }
  0x38   :  { %102 = vst [vmem:[#allocation2 + $0x258] sm:$0xff] %v3338_v13 }
  0x39   :  { %103 = vst [vmem:[#allocation2 + $0x260] sm:$0xff] %v3338_v13 }
  0x3a   :  { %106 = vst [vmem:[#allocation2 + $0x278] sm:$0xff] %v3338_v13 }
  0x3b   :  { %3164 = vmatmul.msk.f32.gmra.mxu0 %vm240_vm1, %v178_v8  ;;  %107 = vst [vmem:[#allocation2 + $0x280] sm:$0xff] %v3338_v13 }
  0x3c   :  { %110 = vst [vmem:[#allocation2 + $0x298] sm:$0xff] %v3338_v13 }
  0x3d   :  { %111 = vst [vmem:[#allocation2 + $0x2a0] sm:$0xff] %v3338_v13 }
  0x3e   :  { %114 = vst [vmem:[#allocation2 + $0x2b8] sm:$0xff] %v3338_v13 }
  0x3f   :  { %115 = vst [vmem:[#allocation2 + $0x2c0] sm:$0xff] %v3338_v13 }
  0x40   :  { %118 = vst [vmem:[#allocation2 + $0x2d8] sm:$0xff] %v3338_v13 }
  0x41   :  { %119 = vst [vmem:[#allocation2 + $0x2e0] sm:$0xff] %v3338_v13 }
  0x42   :  { %122 = vst [vmem:[#allocation2 + $0x2f8] sm:$0xff] %v3338_v13 }
  0x43   :  { %3165 = vmatmul.msk.f32.gmra.mxu0 %vm240_vm1, %v179_v9  ;;  %123 = vst [vmem:[#allocation2 + $0x300] sm:$0xff] %v3338_v13  ;;  %v1822_v9 = vld [vmem:[%s5392_s5] sm:$0xff] }
  0x44   :  { %126 = vst [vmem:[#allocation2 + $0x318] sm:$0xff] %v3338_v13  ;;  %1857 = vmatpush.msra.mxu1 %v1822_v9  ;;  %3237 = vmatpush.msrb.mxu3 %v1822_v9 }
  0x45   :  { %127 = vst [vmem:[#allocation2 + $0x320] sm:$0xff] %v3338_v13 }
  0x46   :  { %130 = vst [vmem:[#allocation2 + $0x338] sm:$0xff] %v3338_v13 }
  0x47   :  { %131 = vst [vmem:[#allocation2 + $0x340] sm:$0xff] %v3338_v13 }
  0x48   :  { %134 = vst [vmem:[#allocation2 + $0x358] sm:$0xff] %v3338_v13 }
  0x49   :  { %135 = vst [vmem:[#allocation2 + $0x360] sm:$0xff] %v3338_v13 }
  0x4a   :  { %138 = vst [vmem:[#allocation2 + $0x378] sm:$0xff] %v3338_v13 }
  0x4b   :  { %3166 = vmatmul.msk.f32.gmra.mxu0 %vm240_vm1, %v180_v10  ;;  %139 = vst [vmem:[#allocation2 + $0x380] sm:$0xff] %v3338_v13 }
  0x4c   :  { %142 = vst [vmem:[#allocation2 + $0x398] sm:$0xff] %v3338_v13 }
  0x4d   :  { %143 = vst [vmem:[#allocation2 + $0x3a0] sm:$0xff] %v3338_v13 }
  0x4e   :  { %146 = vst [vmem:[#allocation2 + $0x3b8] sm:$0xff] %v3338_v13 }
  0x4f   :  { %147 = vst [vmem:[#allocation2 + $0x3c0] sm:$0xff] %v3338_v13 }
  0x50   :  { %150 = vst [vmem:[#allocation2 + $0x3d8] sm:$0xff] %v3338_v13 }
  0x51   :  { %151 = vst [vmem:[#allocation2 + $0x3e0] sm:$0xff] %v3338_v13 }
  0x52   :  { %154 = vst [vmem:[#allocation2 + $0x3f8] sm:$0xff] %v3338_v13 }
  0x53   :  { %3167 = vmatmul.msk.f32.gmra.mxu0 %vm240_vm1, %v181_v11  ;;  %155 = vst [vmem:[#allocation2 + $0x400] sm:$0xff] %v3338_v13 }
  0x54   :  { %158 = vst [vmem:[#allocation2 + $0x418] sm:$0xff] %v3338_v13 }
  0x55   :  { %159 = vst [vmem:[#allocation2 + $0x420] sm:$0xff] %v3338_v13 }
  0x56   :  { %162 = vst [vmem:[#allocation2 + $0x438] sm:$0xff] %v3338_v13 }
  0x57   :  { %163 = vst [vmem:[#allocation2 + $0x440] sm:$0xff] %v3338_v13 }
  0x58   :  { %166 = vst [vmem:[#allocation2 + $0x458] sm:$0xff] %v3338_v13 }
  0x59   :  { %167 = vst [vmem:[#allocation2 + $0x460] sm:$0xff] %v3338_v13 }
  0x5a   :  { %168 = vst [vmem:[#allocation2 + $0x468] sm:$0xff] %v3338_v13 }
  0x5b   :  { %3168 = vmatmul.msk.f32.gmra.mxu0 %vm240_vm1, %v182_v12  ;;  %169 = vst [vmem:[#allocation2 + $0x470] sm:$0xff] %v3338_v13 }
  0x5c   :  { %170 = vst [vmem:[#allocation2 + $0x478] sm:$0xff] %v3338_v13  ;;  %v3668_v13 = vld [vmem:[%s5390_s3 + $0x4] ss:$0 sm:$0xff] }
  0x63   :  { %3169 = vmatmul.msk.f32.gmra.mxu0 %vm240_vm1, %v183_v14  ;;  %v874_v14 = vmul.f32 %v3587_v44, %v841_v3 }
  0x6b   :  { %3170 = vmatmul.msk.f32.gmra.mxu0 %vm240_vm1, %v184_v15 }
  0x73   :  { %3171 = vmatmul.msk.f32.gmra.mxu0 %vm240_vm1, %v185_v16  ;;  %v1037_v16 = vld [vmem:[#allocation2 + $0x11] sm:$0xff] }
  0x7b   :  { %3172 = vmatmul.msk.f32.gmra.mxu0 %vm240_vm1, %v186_v17 }
  0x80   :  { %v454_v19 = vpop.f32.mrf.mxu0 }
  0x81   :  { %v455_v21 = vadd.f32 %v3485_v18, %v454_v19  ;;  %v1101_v19 = vadd.f32 %v1069_v6, %v1003_v2  ;;  %v194_v2 = vld [vmem:[%s5387_s0 + $0xb8] sm:$0xff] }
  0x83   :  { %v646_v22 = vmax.f32 %v455_v21, 0.0  ;;  %3173 = vmatmul.msk.f32.gmra.mxu0 %vm240_vm1, %v187_v20  ;;  %v207_v21 = vld [vmem:[%s5387_s0 + $0x120] sm:$0xff] }
  0x84   :  { %3193 = vmatmul.msk.f32.gmra.mxu3 %vm240_vm1, %v207_v21  ;;  %v3741_v21 = vld [vmem:[%s5391_s4] ss:$0 sm:$0xff] }
  0x85   :  { %v3500_v23 = vmin.f32 %v646_v22, 6.0  ;;  %v1004_v22 = vadd.f32 %v971_v54, %v874_v14 }
  0x87   :  { %775 = vst [vmem:[#allocation2 + $0x28] sm:$0xff] %v3500_v23  ;;  %v973_v32 = vmul.f32 %v3600_v49, %v3500_v23  ;;  %v1265_v34 = vmul.f32 %v3668_v13, %v3500_v23 }
  0x88   :  { %v3506_v24 = vpop.f32.mrf.mxu0 }
  0x89   :  { %v458_v45 = vadd.f32 %v3485_v18, %v3506_v24  ;;  %v1070_v24 = vmul.f32 %v3616_v56, %v1037_v16 }
  0x8b   :  { %3174 = vmatmul.msk.f32.gmra.mxu0 %vm240_vm1, %v188_v25  ;;  %v647_v55 = vmax.f32 %v458_v45, 0.0 }
  0x8d   :  { %v711_v4 = vmin.f32 %v647_v55, 6.0 }
  0x8e   :  { %v1134_v10 = vld [vmem:[#allocation2 + $0x27] sm:$0xff] }
  0x8f   :  { %776 = vst [vmem:[#allocation2 + $0x30] sm:$0xff] %v711_v4  ;;  %v1167_v20 = vmul.f32 %v3640_v7, %v1134_v10  ;;  %v875_v27 = vmul.f32 %v3587_v44, %v1134_v10  ;;  %v1266_v40 = vmul.f32 %v3668_v13, %v711_v4  ;;  %v974_v23 = vmul.f32 %v3600_v49, %v711_v4 }
  0x90   :  { %v460_v28 = vpop.f32.mrf.mxu0 }
  0x91   :  { %v461_v47 = vadd.f32 %v3485_v18, %v460_v28 }
  0x93   :  { %3175 = vmatmul.msk.f32.gmra.mxu0 %vm240_vm1, %v189_v29  ;;  %v648_v58 = vmax.f32 %v461_v47, 0.0  ;;  %v1199_v29 = vadd.f32 %v1167_v20, %v1101_v19 }
  0x95   :  { %v3643_v8 = vmin.f32 %v648_v58, 6.0  ;;  %v1297_v43 = vadd.f32 %v1265_v34, %v1199_v29 }
  0x96   :  { %v1330_v37 = vld [vmem:[#allocation2 + $0x29] sm:$0xff]  ;;  %v1331_v48 = vld [vmem:[#allocation2 + $0x31] sm:$0xff] }
  0x97   :  { %777 = vst [vmem:[#allocation2 + $0x48] sm:$0xff] %v3643_v8  ;;  %v1135_v39 = vld [vmem:[#allocation2 + $0x2f] sm:$0xff]  ;;  %v1363_v45 = vmul.f32 %v3681_v30, %v1330_v37  ;;  %v1071_v54 = vmul.f32 %v3616_v56, %v1330_v37  ;;  %v1072_v16 = vmul.f32 %v3616_v56, %v1331_v48  ;;  %v975_v29 = vmul.f32 %v3600_v49, %v3643_v8 }
  0x98   :  { %v463_v35 = vpop.f32.mrf.mxu0  ;;  %v1168_v47 = vmul.f32 %v3640_v7, %v1135_v39  ;;  %v876_v57 = vmul.f32 %v3587_v44, %v1135_v39  ;;  %v209_v39 = vld [vmem:[%s5387_s0 + $0x130] sm:$0xff] }
  0x99   :  { %v464_v50 = vadd.f32 %v3485_v18, %v463_v35  ;;  %v3695_v35 = vld [vmem:[%s5390_s3 + $0x7] ss:$0 sm:$0xff]  ;;  %v1395_v58 = vadd.f32 %v1363_v45, %v1297_v43 }
  0x9a   :  { %v1560_v59 = vmul.f32 %v3695_v35, %v3643_v8  ;;  %v1006_v14 = vadd.f32 %v974_v23, %v876_v57 }
  0x9b   :  { %3176 = vmatmul.msk.f32.gmra.mxu0 %vm240_vm1, %v190_v36  ;;  %v649_v61 = vmax.f32 %v464_v50, 0.0  ;;  %v1102_v36 = vadd.f32 %v1070_v24, %v1004_v22  ;;  %v208_v50 = vld [vmem:[%s5387_s0 + $0x128] sm:$0xff] }
  0x9c   :  { %3194 = vmatmul.msk.f32.gmra.mxu3 %vm240_vm1, %v208_v50 }
  0x9d   :  { %v3649_v11 = vmin.f32 %v649_v61, 6.0  ;;  %v1200_v60 = vadd.f32 %v1168_v47, %v1102_v36  ;;  %v1267_v61 = vmul.f32 %v3668_v13, %v3643_v8 }
  0x9e   :  { %v1429_v46 = vld [vmem:[#allocation2 + $0x47] sm:$0xff] }
  0x9f   :  { %778 = vst [vmem:[#allocation2 + $0x50] sm:$0xff] %v3649_v11  ;;  %v1169_v55 = vmul.f32 %v3640_v7, %v1429_v46  ;;  %v1298_v6 = vadd.f32 %v1266_v40, %v1200_v60  ;;  %v1561_v36 = vmul.f32 %v3695_v35, %v3649_v11  ;;  %v1268_v23 = vmul.f32 %v3668_v13, %v3649_v11 }
  0xa0   :  { %v466_v41 = vpop.f32.mrf.mxu0  ;;  %v877_v8 = vmul.f32 %v3587_v44, %v1429_v46 }
  0xa1   :  { %v467_v51 = vadd.f32 %v3485_v18, %v466_v41  ;;  %v1005_v41 = vadd.f32 %v973_v32, %v875_v27 }
  0xa3   :  { %3177 = vmatmul.msk.f32.gmra.mxu0 %vm240_vm1, %v191_v42  ;;  %v650_v62 = vmax.f32 %v467_v51, 0.0  ;;  %v1462_v51 = vmul.f32 %v3686_v31, %v1429_v46  ;;  %v1103_v3 = vadd.f32 %v1071_v54, %v1005_v41  ;;  %v195_v46 = vld [vmem:[%s5387_s0 + $0xc0] sm:$0xff] }
  0xa4   :  { %3195 = vmatmul.msk.f32.gmra.mxu3 %vm240_vm1, %v209_v39 }
  0xa5   :  { %v3654_v15 = vmin.f32 %v650_v62, 6.0  ;;  %v1494_v4 = vadd.f32 %v1462_v51, %v1395_v58 }
  0xa6   :  { %v1625_v52 = vld [vmem:[#allocation2 + $0x49] sm:$0xff] }
  0xa7   :  { %779 = vst [vmem:[#allocation2 + $0x68] sm:$0xff] %v3654_v15  ;;  %v3713_v53 = vld [vmem:[#allocation2 + $0x4f] sm:$0xff]  ;;  %v1658_v62 = vmul.f32 %v3701_v38, %v1625_v52  ;;  %v1365_v9 = vmul.f32 %v3681_v30, %v1625_v52  ;;  %v1592_v20 = vadd.f32 %v1560_v59, %v1494_v4 }
  0xa8   :  { %v469_v63 = vpop.f32.mrf.mxu0  ;;  %v1463_v1 = vmul.f32 %v3686_v31, %v3713_v53  ;;  %v1170_v19 = vmul.f32 %v3640_v7, %v3713_v53 }
  0xa9   :  { %v470_v5 = vadd.f32 %v3485_v18, %v469_v63  ;;  %v1690_v32 = vadd.f32 %v1658_v62, %v1592_v20  ;;  %v1073_v62 = vmul.f32 %v3616_v56, %v1625_v52  ;;  %v976_v52 = vmul.f32 %v3600_v49, %v3649_v11 }
  0xab   :  { %v651_v12 = vmax.f32 %v470_v5, 0.0  ;;  %3178 = vmatmul.msk.f32.gmra.mxu0 %vm240_vm1, %v192_v0  ;;  %v1364_v0 = vmul.f32 %v3681_v30, %v1331_v48  ;;  %v1726_v43 = vadd.f32 %v3741_v21, %v1690_v32  ;;  %v1562_v48 = vmul.f32 %v3695_v35, %v3654_v15 }
  0xad   :  { %v3656_v17 = vmin.f32 %v651_v12, 6.0  ;;  %v1201_v12 = vadd.f32 %v1169_v55, %v1103_v3  ;;  %v1396_v24 = vadd.f32 %v1364_v0, %v1298_v6  ;;  %v1758_v59 = vmax.f32 %v1726_v43, 0.0 }
  0xae   :  { %v3733_v10 = vld [vmem:[#allocation2 + $0x67] sm:$0xff]  ;;  %v1007_v0 = vadd.f32 %v975_v29, %v877_v8 }
  0xaf   :  { %780 = vst [vmem:[#allocation2 + $0x70] sm:$0xff] %v3656_v17  ;;  %v1464_v27 = vmul.f32 %v3686_v31, %v3733_v10  ;;  %v1495_v34 = vadd.f32 %v1463_v1, %v1396_v24  ;;  %v1171_v1 = vmul.f32 %v3640_v7, %v3733_v10  ;;  %v1790_v3 = vmin.f32 %v1758_v59, 6.0 }
  0xb0   :  { %v472_v25 = vpop.f32.mrf.mxu0  ;;  %v1563_v11 = vmul.f32 %v3695_v35, %v3656_v17 }
  0xb1   :  { %v473_v28 = vadd.f32 %v3485_v18, %v472_v25  ;;  %v1626_v25 = vld [vmem:[#allocation2 + $0x51] sm:$0xff]  ;;  %v1593_v45 = vadd.f32 %v1561_v36, %v1495_v34  ;;  %1858 = vmatmul.f32.vlgmr.msra.gmra.mxu1 %v1790_v3 }
  0xb2   :  { %v1659_v47 = vmul.f32 %v3701_v38, %v1626_v25  ;;  %v1366_v58 = vmul.f32 %v3681_v30, %v1626_v25  ;;  %v1074_v29 = vmul.f32 %v3616_v56, %v1626_v25 }
  0xb3   :  { %v652_v33 = vmax.f32 %v473_v28, 0.0  ;;  %3179 = vmatmul.msk.f32.gmra.mxu0 %vm240_vm1, %v193_v26  ;;  %v1299_v26 = vadd.f32 %v1267_v61, %v1201_v12  ;;  %v1104_v28 = vadd.f32 %v1072_v16, %v1006_v14  ;;  %v1105_v16 = vadd.f32 %v1073_v62, %v1007_v0 }
  0xb4   :  { %v1691_v60 = vadd.f32 %v1659_v47, %v1593_v45 }
  0xb5   :  { %v3705_v42 = vmin.f32 %v652_v33, 6.0  ;;  %v1397_v40 = vadd.f32 %v1365_v9, %v1299_v26  ;;  %v1202_v41 = vadd.f32 %v1170_v19, %v1104_v28  ;;  %v1203_v24 = vadd.f32 %v1171_v1, %v1105_v16 }
  0xb6   :  { %v3752_v37 = vld [vmem:[#allocation2 + $0x69] sm:$0xff]  ;;  %v1727_v4 = vadd.f32 %v3741_v21, %v1691_v60  ;;  %v1628_v39 = vld [vmem:[#allocation2 + $0x71] sm:$0xff]  ;;  %v1270_v60 = vmul.f32 %v3668_v13, %v3656_v17 }
  0xb7   :  { %781 = vst [vmem:[#allocation2 + $0x88] sm:$0xff] %v3705_v42  ;;  %v3766_v50 = vld [vmem:[#allocation2 + $0x6f] sm:$0xff]  ;;  %v1496_v54 = vadd.f32 %v1464_v27, %v1397_v40  ;;  %v1660_v55 = vmul.f32 %v3701_v38, %v3752_v37  ;;  %v1300_v57 = vadd.f32 %v1268_v23, %v1202_v41  ;;  %v1269_v40 = vmul.f32 %v3668_v13, %v3654_v15 }
  0xb8   :  { %v475_v63 = vpop.f32.mrf.mxu0  ;;  %v196_v27 = vld [vmem:[%s5387_s0 + $0xc8] sm:$0xff]  ;;  %v1172_v32 = vmul.f32 %v3640_v7, %v3766_v50  ;;  %v1367_v41 = vmul.f32 %v3681_v30, %v3752_v37  ;;  %v1564_v1 = vmul.f32 %v3695_v35, %v3705_v42 }
  0xb9   :  { %v476_v5 = vadd.f32 %v3485_v18, %v475_v63  ;;  %v1465_v63 = vmul.f32 %v3686_v31, %v3766_v50  ;;  %v1594_v6 = vadd.f32 %v1562_v48, %v1496_v54  ;;  %v1398_v9 = vadd.f32 %v1366_v58, %v1300_v57  ;;  %v211_v57 = vld [vmem:[%s5387_s0 + $0x140] sm:$0xff] }
  0xba   :  { %v1301_v25 = vadd.f32 %v1269_v40, %v1203_v24  ;;  %v1661_v48 = vmul.f32 %v3701_v38, %v1628_v39 }
  0xbb   :  { %v653_v22 = vmax.f32 %v476_v5, 0.0  ;;  %3180 = vmatmul.msk.f32.gmra.mxu0 %vm240_vm1, %v194_v2  ;;  %v878_v2 = vmul.f32 %v3587_v44, %v3713_v53  ;;  %v1692_v14 = vadd.f32 %v1660_v55, %v1594_v6  ;;  %v210_v53 = vld [vmem:[%s5387_s0 + $0x138] sm:$0xff]  ;;  %v1497_v19 = vadd.f32 %v1465_v63, %v1398_v9 }
  0xbc   :  { %3196 = vmatmul.msk.f32.gmra.mxu3 %vm240_vm1, %v210_v53  ;;  %v879_v63 = vmul.f32 %v3587_v44, %v3733_v10  ;;  %v1075_v10 = vmul.f32 %v3616_v56, %v3752_v37  ;;  %v880_v53 = vmul.f32 %v3587_v44, %v3766_v50  ;;  %v978_v37 = vmul.f32 %v3600_v49, %v3656_v17  ;;  %v212_v50 = vld [vmem:[%s5387_s0 + $0x148] sm:$0xff] }
  0xbd   :  { %v3748_v33 = vmin.f32 %v653_v22, 6.0  ;;  %v1008_v20 = vadd.f32 %v976_v52, %v878_v2  ;;  %v1759_v22 = vmax.f32 %v1727_v4, 0.0  ;;  %v1728_v34 = vadd.f32 %v3741_v21, %v1692_v14  ;;  %v197_v2 = vld [vmem:[%s5387_s0 + $0xd0] sm:$0xff] }
  0xbe   :  { %v3798_v28 = vld [vmem:[#allocation2 + $0x87] sm:$0xff]  ;;  %v1595_v23 = vadd.f32 %v1563_v11, %v1497_v19  ;;  %v977_v4 = vmul.f32 %v3600_v49, %v3654_v15  ;;  %v1368_v14 = vmul.f32 %v3681_v30, %v1628_v39 }
  0xbf   :  { %782 = vst [vmem:[#allocation2 + $0x90] sm:$0xff] %v3748_v33  ;;  %v1106_v8 = vadd.f32 %v1074_v29, %v1008_v20  ;;  %v1791_v43 = vmin.f32 %v1759_v22, 6.0  ;;  %v1466_v47 = vmul.f32 %v3686_v31, %v3798_v28  ;;  %v1760_v54 = vmax.f32 %v1728_v34, 0.0 }
  0xc0   :  { %v478_v51 = vpop.f32.mrf.mxu0  ;;  %v1693_v58 = vadd.f32 %v1661_v48, %v1595_v23  ;;  %v1009_v20 = vadd.f32 %v977_v4, %v879_v63  ;;  %v1173_v22 = vmul.f32 %v3640_v7, %v3798_v28  ;;  %v1565_v17 = vmul.f32 %v3695_v35, %v3748_v33 }
  0xc1   :  { %v479_v61 = vadd.f32 %v3485_v18, %v478_v51  ;;  %v1204_v51 = vadd.f32 %v1172_v32, %v1106_v8  ;;  %1861 = vmatmul.f32.gmra.mxu1 %v1791_v43  ;;  %v1010_v32 = vadd.f32 %v978_v37, %v880_v53  ;;  %v1076_v8 = vmul.f32 %v3616_v56, %v1628_v39  ;;  %v199_v53 = vld [vmem:[%s5387_s0 + $0xe0] sm:$0xff] }
  0xc2   :  { %v1729_v52 = vadd.f32 %v3741_v21, %v1693_v58  ;;  %v1271_v48 = vmul.f32 %v3668_v13, %v3705_v42 }
  0xc3   :  { %v654_v5 = vmax.f32 %v479_v61, 0.0  ;;  %3181 = vmatmul.msk.f32.gmra.mxu0 %vm240_vm1, %v195_v46  ;;  %v1399_v46 = vadd.f32 %v1367_v41, %v1301_v25  ;;  %v1302_v3 = vadd.f32 %v1270_v60, %v1204_v51  ;;  %v198_v41 = vld [vmem:[%s5387_s0 + $0xd8] sm:$0xff] }
  0xc4   :  { %3197 = vmatmul.msk.f32.gmra.mxu3 %vm240_vm1, %v211_v57  ;;  %v1761_v34 = vmax.f32 %v1729_v52, 0.0 }
  0xc5   :  { %v3786_v12 = vmin.f32 %v654_v5, 6.0  ;;  %v1498_v61 = vadd.f32 %v1466_v47, %v1399_v46  ;;  %v1792_v5 = vmin.f32 %v1760_v54, 6.0  ;;  %v1400_v24 = vadd.f32 %v1368_v14, %v1302_v3  ;;  %v213_v3 = vld [vmem:[%s5387_s0 + $0x150] sm:$0xff] }
  0xc6   :  { %v3818_v59 = vld [vmem:[#allocation2 + $0x89] sm:$0xff]  ;;  %v1630_v47 = vld [vmem:[#allocation2 + $0x91] sm:$0xff]  ;;  %v1108_v46 = vadd.f32 %v1076_v8, %v1010_v32  ;;  %v1793_v57 = vmin.f32 %v1761_v34, 6.0  ;;  %v980_v8 = vmul.f32 %v3600_v49, %v3748_v33 }
  0xc7   :  { %783 = vst [vmem:[#allocation2 + $0xa8] sm:$0xff] %v3786_v12  ;;  %v3824_v62 = vld [vmem:[#allocation2 + $0x8f] sm:$0xff]  ;;  %v1662_v9 = vmul.f32 %v3701_v38, %v3818_v59  ;;  %v1596_v19 = vadd.f32 %v1564_v1, %v1498_v61  ;;  %v1369_v51 = vmul.f32 %v3681_v30, %v3818_v59  ;;  %v1663_v61 = vmul.f32 %v3701_v38, %v1630_v47 }
  0xc8   :  { %v481_v26 = vpop.f32.mrf.mxu0  ;;  %v1467_v16 = vmul.f32 %v3686_v31, %v3824_v62  ;;  %v1174_v43 = vmul.f32 %v3640_v7, %v3824_v62  ;;  %v882_v34 = vmul.f32 %v3587_v44, %v3824_v62 }
  0xc9   :  { %v482_v36 = vadd.f32 %v3485_v18, %v481_v26  ;;  %1864 = vmatmul.f32.gmra.mxu1 %v1792_v5  ;;  %v1694_v11 = vadd.f32 %v1662_v9, %v1596_v19  ;;  %v881_v9 = vmul.f32 %v3587_v44, %v3798_v28  ;;  %v979_v19 = vmul.f32 %v3600_v49, %v3705_v42 }
  0xca   :  { %v1499_v29 = vadd.f32 %v1467_v16, %v1400_v24  ;;  %v1206_v63 = vadd.f32 %v1174_v43, %v1108_v46  ;;  %v1566_v16 = vmul.f32 %v3695_v35, %v3786_v12  ;;  %v1077_v24 = vmul.f32 %v3616_v56, %v3818_v59 }
  0xcb   :  { %v655_v45 = vmax.f32 %v482_v36, 0.0  ;;  %3182 = vmatmul.msk.f32.gmra.mxu0 %vm240_vm1, %v196_v27  ;;  %v1107_v27 = vadd.f32 %v1075_v10, %v1009_v20  ;;  %v1273_v46 = vmul.f32 %v3668_v13, %v3786_v12 }
  0xcc   :  { %3198 = vmatmul.msk.f32.gmra.mxu3 %vm240_vm1, %v212_v50  ;;  %v1597_v54 = vadd.f32 %v1565_v17, %v1499_v29  ;;  %v1011_v50 = vadd.f32 %v979_v19, %v881_v9 }
  0xcd   :  { %v3813_v55 = vmin.f32 %v655_v45, 6.0  ;;  %v1205_v36 = vadd.f32 %v1173_v22, %v1107_v27  ;;  %v1730_v45 = vadd.f32 %v3741_v21, %v1694_v11  ;;  %v1370_v11 = vmul.f32 %v3681_v30, %v1630_v47 }
  0xce   :  { %v3863_v23 = vld [vmem:[#allocation2 + $0xa7] sm:$0xff]  ;;  %v1695_v4 = vadd.f32 %v1663_v61, %v1597_v54  ;;  %v1109_v17 = vadd.f32 %v1077_v24, %v1011_v50 }
  0xcf   :  { %784 = vst [vmem:[#allocation2 + $0xb0] sm:$0xff] %v3813_v55  ;;  %v1303_v39 = vadd.f32 %v1271_v48, %v1205_v36  ;;  %v1468_v60 = vmul.f32 %v3686_v31, %v3863_v23  ;;  %v1175_v42 = vmul.f32 %v3640_v7, %v3863_v23  ;;  %v200_v54 = vld [vmem:[%s5387_s0 + $0xe8] sm:$0xff]  ;;  %v1274_v24 = vmul.f32 %v3668_v13, %v3813_v55 }
  0xd0   :  { %v484_v0 = vpop.f32.mrf.mxu0  ;;  %v1731_v37 = vadd.f32 %v3741_v21, %v1695_v4 }
  0xd1   :  { %v485_v6 = vadd.f32 %v3485_v18, %v484_v0  ;;  %1867 = vmatmul.f32.gmra.mxu1 %v1793_v57  ;;  %v1762_v0 = vmax.f32 %v1730_v45, 0.0  ;;  %v1207_v62 = vadd.f32 %v1175_v42, %v1109_v17  ;;  %v1078_v57 = vmul.f32 %v3616_v56, %v1630_v47 }
  0xd2   :  { %v1763_v43 = vmax.f32 %v1731_v37, 0.0 }
  0xd3   :  { %v656_v15 = vmax.f32 %v485_v6, 0.0  ;;  %3183 = vmatmul.msk.f32.gmra.mxu0 %vm240_vm1, %v197_v2  ;;  %v1401_v2 = vadd.f32 %v1369_v51, %v1303_v39  ;;  %v1272_v6 = vmul.f32 %v3668_v13, %v3748_v33  ;;  %v1794_v20 = vmin.f32 %v1762_v0, 6.0 }
  0xd4   :  { %3199 = vmatmul.msk.f32.gmra.mxu3 %vm240_vm1, %v213_v3  ;;  %v1567_v51 = vmul.f32 %v3695_v35, %v3813_v55  ;;  %v1795_v0 = vmin.f32 %v1763_v43, 6.0  ;;  %v1305_v4 = vadd.f32 %v1273_v46, %v1207_v62  ;;  %v982_v62 = vmul.f32 %v3600_v49, %v3813_v55  ;;  %v202_v55 = vld [vmem:[%s5387_s0 + $0xf8] sm:$0xff] }
  0xd5   :  { %v3851_v26 = vmin.f32 %v656_v15, 6.0  ;;  %v1500_v10 = vadd.f32 %v1468_v60, %v1401_v2  ;;  %v1304_v15 = vadd.f32 %v1272_v6, %v1206_v63 }
  0xd6   :  { %v3883_v5 = vld [vmem:[#allocation2 + $0xa9] sm:$0xff]  ;;  %v1632_v60 = vld [vmem:[#allocation2 + $0xb1] sm:$0xff] }
  0xd7   :  { %785 = vst [vmem:[#allocation2 + $0xc8] sm:$0xff] %v3851_v26  ;;  %v3891_v52 = vld [vmem:[#allocation2 + $0xaf] sm:$0xff]  ;;  %v1664_v22 = vmul.f32 %v3701_v38, %v3883_v5  ;;  %v1598_v32 = vadd.f32 %v1566_v16, %v1500_v10  ;;  %v1402_v36 = vadd.f32 %v1370_v11, %v1304_v15  ;;  %v1371_v61 = vmul.f32 %v3681_v30, %v3883_v5  ;;  %v215_v15 = vld [vmem:[%s5387_s0 + $0x160] sm:$0xff] }
  0xd8   :  { %v487_v40 = vpop.f32.mrf.mxu0  ;;  %v1469_v27 = vmul.f32 %v3686_v31, %v3891_v52  ;;  %v1176_v63 = vmul.f32 %v3640_v7, %v3891_v52  ;;  %v1665_v9 = vmul.f32 %v3701_v38, %v1632_v60  ;;  %v1568_v11 = vmul.f32 %v3695_v35, %v3851_v26 }
  0xd9   :  { %v488_v25 = vadd.f32 %v3485_v18, %v487_v40  ;;  %1870 = vmatmul.f32.gmra.mxu1 %v1794_v20  ;;  %v1696_v40 = vadd.f32 %v1664_v22, %v1598_v32  ;;  %v1403_v16 = vadd.f32 %v1371_v61, %v1305_v4  ;;  %v1372_v17 = vmul.f32 %v3681_v30, %v1632_v60 }
  0xda   :  { %v1501_v45 = vadd.f32 %v1469_v27, %v1402_v36  ;;  %v201_v27 = vld [vmem:[%s5387_s0 + $0xf0] sm:$0xff] }
  0xdb   :  { %v657_v58 = vmax.f32 %v488_v25, 0.0  ;;  %3184 = vmatmul.msk.f32.gmra.mxu0 %vm240_vm1, %v198_v41  ;;  %v214_v41 = vld [vmem:[%s5387_s0 + $0x158] sm:$0xff]  ;;  %v1012_v25 = vadd.f32 %v980_v8, %v882_v34  ;;  %v884_v8 = vmul.f32 %v3587_v44, %v3891_v52  ;;  %v216_v52 = vld [vmem:[%s5387_s0 + $0x168] sm:$0xff] }
  0xdc   :  { %3200 = vmatmul.msk.f32.gmra.mxu3 %vm240_vm1, %v214_v41  ;;  %v1599_v2 = vadd.f32 %v1567_v51, %v1501_v45 }
  0xdd   :  { %v3878_v1 = vmin.f32 %v657_v58, 6.0  ;;  %v1732_v58 = vadd.f32 %v3741_v21, %v1696_v40  ;;  %v1110_v6 = vadd.f32 %v1078_v57, %v1012_v25  ;;  %v1014_v57 = vadd.f32 %v982_v62, %v884_v8  ;;  %v203_v8 = vld [vmem:[%s5387_s0 + $0x100] sm:$0xff] }
  0xde   :  { %v3930_v33 = vld [vmem:[#allocation2 + $0xc7] sm:$0xff]  ;;  %v1697_v19 = vadd.f32 %v1665_v9, %v1599_v2  ;;  %v1080_v2 = vmul.f32 %v3616_v56, %v1632_v60 }
  0xdf   :  { %786 = vst [vmem:[#allocation2 + $0xd0] sm:$0xff] %v3878_v1  ;;  %v1470_v47 = vmul.f32 %v3686_v31, %v3930_v33  ;;  %v1764_v10 = vmax.f32 %v1732_v58, 0.0  ;;  %v1177_v45 = vmul.f32 %v3640_v7, %v3930_v33 }
  0xe0   :  { %v490_v14 = vpop.f32.mrf.mxu0  ;;  %v1733_v40 = vadd.f32 %v3741_v21, %v1697_v19 }
  0xe1   :  { %v491_v28 = vadd.f32 %v3485_v18, %v490_v14  ;;  %1873 = vmatmul.f32.gmra.mxu1 %v1795_v0  ;;  %v1502_v22 = vadd.f32 %v1470_v47, %v1403_v16  ;;  %v1796_v32 = vmin.f32 %v1764_v10, 6.0 }
  0xe2   :  { %v1765_v46 = vmax.f32 %v1733_v40, 0.0 }
  0xe3   :  { %v658_v29 = vmax.f32 %v491_v28, 0.0  ;;  %3185 = vmatmul.msk.f32.gmra.mxu0 %vm240_vm1, %v199_v53  ;;  %v1208_v53 = vadd.f32 %v1176_v63, %v1110_v6  ;;  %v883_v28 = vmul.f32 %v3587_v44, %v3863_v23  ;;  %v1079_v23 = vmul.f32 %v3616_v56, %v3883_v5 }
  0xe4   :  { %3201 = vmatmul.msk.f32.gmra.mxu3 %vm240_vm1, %v215_v15  ;;  %v1275_v63 = vmul.f32 %v3668_v13, %v3851_v26  ;;  %v1569_v6 = vmul.f32 %v3695_v35, %v3878_v1  ;;  %v1797_v10 = vmin.f32 %v1765_v46, 6.0 }
  0xe5   :  { %v3914_v59 = vmin.f32 %v658_v29, 6.0  ;;  %v981_v29 = vmul.f32 %v3600_v49, %v3786_v12  ;;  %v1306_v36 = vadd.f32 %v1274_v24, %v1208_v53  ;;  %v1600_v12 = vadd.f32 %v1568_v11, %v1502_v22 }
  0xe6   :  { %v3948_v20 = vld [vmem:[#allocation2 + $0xc9] sm:$0xff]  ;;  %v1634_v16 = vld [vmem:[#allocation2 + $0xd1] sm:$0xff]  ;;  %v1112_v53 = vadd.f32 %v1080_v2, %v1014_v57 }
  0xe7   :  { %787 = vst [vmem:[#allocation2 + $0xe8] sm:$0xff] %v3914_v59  ;;  %v3961_v50 = vld [vmem:[#allocation2 + $0xcf] sm:$0xff]  ;;  %v1666_v34 = vmul.f32 %v3701_v38, %v3948_v20  ;;  %v1013_v41 = vadd.f32 %v981_v29, %v883_v28  ;;  %v1404_v51 = vadd.f32 %v1372_v17, %v1306_v36  ;;  %v1373_v9 = vmul.f32 %v3681_v30, %v3948_v20 }
  0xe8   :  { %v493_v48 = vpop.f32.mrf.mxu0  ;;  %v1471_v5 = vmul.f32 %v3686_v31, %v3961_v50  ;;  %v1667_v11 = vmul.f32 %v3701_v38, %v1634_v16  ;;  %v217_v29 = vld [vmem:[%s5387_s0 + $0x170] sm:$0xff]  ;;  %v1081_v62 = vmul.f32 %v3616_v56, %v3948_v20  ;;  %v984_v20 = vmul.f32 %v3600_v49, %v3878_v1 }
  0xe9   :  { %v494_v39 = vadd.f32 %v3485_v18, %v493_v48  ;;  %1876 = vmatmul.f32.gmra.mxu1 %v1796_v32  ;;  %v1698_v48 = vadd.f32 %v1666_v34, %v1600_v12  ;;  %v1276_v32 = vmul.f32 %v3668_v13, %v3878_v1  ;;  %v983_v12 = vmul.f32 %v3600_v49, %v3851_v26 }
  0xea   :  { %v1503_v58 = vadd.f32 %v1471_v5, %v1404_v51 }
  0xeb   :  { %v659_v3 = vmax.f32 %v494_v39, 0.0  ;;  %3186 = vmatmul.msk.f32.gmra.mxu0 %vm240_vm1, %v200_v54  ;;  %v1111_v54 = vadd.f32 %v1079_v23, %v1013_v41  ;;  %v1734_v4 = vadd.f32 %v3741_v21, %v1698_v48  ;;  %v1570_v41 = vmul.f32 %v3695_v35, %v3914_v59 }
  0xec   :  { %3202 = vmatmul.msk.f32.gmra.mxu3 %vm240_vm1, %v216_v52  ;;  %v1601_v19 = vadd.f32 %v1569_v6, %v1503_v58  ;;  %v1374_v48 = vmul.f32 %v3681_v30, %v1634_v16  ;;  %v886_v52 = vmul.f32 %v3587_v44, %v3961_v50  ;;  %v204_v6 = vld [vmem:[%s5387_s0 + $0x108] sm:$0xff] }
  0xed   :  { %v3943_v14 = vmin.f32 %v659_v3, 6.0  ;;  %v1209_v39 = vadd.f32 %v1177_v45, %v1111_v54  ;;  %v1178_v3 = vmul.f32 %v3640_v7, %v3961_v50  ;;  %v1766_v24 = vmax.f32 %v1734_v4, 0.0  ;;  %v218_v50 = vld [vmem:[%s5387_s0 + $0x178] sm:$0xff] }
  0xee   :  { %v3993_v0 = vld [vmem:[#allocation2 + $0xe7] sm:$0xff]  ;;  %v1699_v34 = vadd.f32 %v1667_v11, %v1601_v19  ;;  %v1016_v2 = vadd.f32 %v984_v20, %v886_v52  ;;  %v4067_v19 = vld [vmem:[%s5389_s2] ss:$0 sm:$0xff]  ;;  %v985_v52 = vmul.f32 %v3600_v49, %v3914_v59 }
  0xef   :  { %788 = vst [vmem:[#allocation2 + $0xf0] sm:$0xff] %v3943_v14  ;;  %v1307_v60 = vadd.f32 %v1275_v63, %v1209_v39  ;;  %v1472_v28 = vmul.f32 %v3686_v31, %v3993_v0  ;;  %v1210_v22 = vadd.f32 %v1178_v3, %v1112_v53  ;;  %v1798_v5 = vmin.f32 %v1766_v24, 6.0 }
  0xf0   :  { %v496_v37 = vpop.f32.mrf.mxu0  ;;  %v1735_v26 = vadd.f32 %v3741_v21, %v1699_v34  ;;  %v1571_v1 = vmul.f32 %v3695_v35, %v3943_v14  ;;  %v1082_v53 = vmul.f32 %v3616_v56, %v1634_v16 }
  0xf1   :  { %v497_v42 = vadd.f32 %v3485_v18, %v496_v37  ;;  %1879 = vmatmul.f32.gmra.mxu1 %v1797_v10 }
  0xf2   :  { %v1767_v3 = vmax.f32 %v1735_v26, 0.0 }
  0xf3   :  { %v660_v43 = vmax.f32 %v497_v42, 0.0  ;;  %3187 = vmatmul.msk.f32.gmra.mxu0 %vm240_vm1, %v201_v27  ;;  %v1405_v27 = vadd.f32 %v1373_v9, %v1307_v60  ;;  %v885_v42 = vmul.f32 %v3587_v44, %v3930_v33  ;;  %v1277_v9 = vmul.f32 %v3668_v13, %v3914_v59 }
  0xf4   :  { %3203 = vmatmul.msk.f32.gmra.mxu3 %vm240_vm1, %v217_v29  ;;  %v1799_v29 = vmin.f32 %v1767_v3, 6.0 }
  0xf5   :  { %v3981_v25 = vmin.f32 %v660_v43, 6.0  ;;  %v1504_v36 = vadd.f32 %v1472_v28, %v1405_v27  ;;  %v1308_v43 = vadd.f32 %v1276_v32, %v1210_v22  ;;  %v1015_v54 = vadd.f32 %v983_v12, %v885_v42 }
  0xf6   :  { %v4013_v23 = vld [vmem:[#allocation2 + $0xe9] sm:$0xff]  ;;  %v1636_v28 = vld [vmem:[#allocation2 + $0xf1] sm:$0xff]  ;;  %v1114_v27 = vadd.f32 %v1082_v53, %v1016_v2  ;;  %v986_v2 = vmul.f32 %v3600_v49, %v3943_v14 }
  0xf7   :  { %789 = vst [vmem:[#allocation2 + $0x108] sm:$0xff] %v3981_v25  ;;  %v4021_v40 = vld [vmem:[#allocation2 + $0xef] sm:$0xff]  ;;  %v1668_v45 = vmul.f32 %v3701_v38, %v4013_v23  ;;  %v1602_v57 = vadd.f32 %v1570_v41, %v1504_v36  ;;  %v1406_v58 = vadd.f32 %v1374_v48, %v1308_v43  ;;  %v1375_v22 = vmul.f32 %v3681_v30, %v4013_v23  ;;  %v219_v43 = vld [vmem:[%s5387_s0 + $0x180] sm:$0xff] }
  0xf8   :  { %v499_v61 = vpop.f32.mrf.mxu0  ;;  %v1473_v51 = vmul.f32 %v3686_v31, %v4021_v40  ;;  %v1180_v24 = vmul.f32 %v3640_v7, %v4021_v40  ;;  %v1669_v34 = vmul.f32 %v3701_v38, %v1636_v28  ;;  %v1083_v26 = vmul.f32 %v3616_v56, %v4013_v23 }
  0xf9   :  { %v500_v47 = vadd.f32 %v3485_v18, %v499_v61  ;;  %1882 = vmatmul.f32.gmra.mxu1 %v1798_v5  ;;  %v1700_v61 = vadd.f32 %v1668_v45, %v1602_v57  ;;  %v1376_v20 = vmul.f32 %v3681_v30, %v1636_v28  ;;  %v1279_v49 = vmul.f32 %v3668_v13, %v3981_v25 }
  0xfa   :  { %v1505_v63 = vadd.f32 %v1473_v51, %v1406_v58  ;;  %v1572_v51 = vmul.f32 %v3695_v35, %v3981_v25 }
  0xfb   :  { %v661_v15 = vmax.f32 %v500_v47, 0.0  ;;  %3188 = vmatmul.msk.f32.gmra.mxu0 %vm240_vm1, %v202_v55  ;;  %v1113_v55 = vadd.f32 %v1081_v62, %v1015_v54  ;;  %v1278_v62 = vmul.f32 %v3668_v13, %v3943_v14 }
  0xfc   :  { %3204 = vmatmul.msk.f32.gmra.mxu3 %vm240_vm1, %v218_v50  ;;  %v1603_v11 = vadd.f32 %v1571_v1, %v1505_v63 }
  0xfd   :  { %v4007_v37 = vmin.f32 %v661_v15, 6.0  ;;  %v1736_v15 = vadd.f32 %v3741_v21, %v1700_v61 }
  0xfe   :  { %v4060_v10 = vld [vmem:[#allocation2 + $0x107] sm:$0xff]  ;;  %v1701_v12 = vadd.f32 %v1669_v34, %v1603_v11 }
  0xff   :  { %790 = vst [vmem:[#allocation2 + $0x110] sm:$0xff] %v4007_v37  ;;  %v1474_v42 = vmul.f32 %v3686_v31, %v4060_v10  ;;  %v1768_v36 = vmax.f32 %v1736_v15, 0.0  ;;  %v1181_v63 = vmul.f32 %v3640_v7, %v4060_v10 }
 0x100   :  { %v502_v17 = vpop.f32.mrf.mxu0  ;;  %v1737_v58 = vadd.f32 %v3741_v21, %v1701_v12 }
 0x101   :  { %v503_v33 = vadd.f32 %v3485_v18, %v502_v17  ;;  %v1179_v18 = vmul.f32 %v3640_v7, %v3993_v0  ;;  %1885 = vmatmul.f32.gmra.mxu1 %v1799_v29 }
 0x103   :  { %v662_v46 = vmax.f32 %v503_v33, 0.0  ;;  %3189 = vmatmul.msk.f32.gmra.mxu0 %vm240_vm1, %v203_v8  ;;  %v1211_v4 = vadd.f32 %v1179_v18, %v1113_v55  ;;  %v1212_v8 = vadd.f32 %v1180_v24, %v1114_v27  ;;  %v887_v33 = vmul.f32 %v3587_v44, %v3993_v0 }
 0x104   :  { %3205 = vmatmul.msk.f32.gmra.mxu3 %vm240_vm1, %v219_v43  ;;  %v888_v55 = vmul.f32 %v3587_v44, %v4021_v40  ;;  %v220_v44 = vld [vmem:[%s5387_s0 + $0x188] sm:$0xff]  ;;  %v1769_v40 = vmax.f32 %v1737_v58, 0.0  ;;  %v1573_v27 = vmul.f32 %v3695_v35, %v4007_v37 }
 0x105   :  { %v4046_v39 = vmin.f32 %v662_v46, 6.0  ;;  %v1309_v32 = vadd.f32 %v1277_v9, %v1211_v4  ;;  %v1800_v46 = vmin.f32 %v1768_v36, 6.0  ;;  %v1310_v18 = vadd.f32 %v1278_v62, %v1212_v8  ;;  %v221_v62 = vld [vmem:[%s5387_s0 + $0x190] sm:$0xff] }
 0x106   :  { %v4083_v5 = vld [vmem:[#allocation2 + $0x109] sm:$0xff]  ;;  %v1017_v61 = vadd.f32 %v985_v52, %v887_v33  ;;  %v1280_v52 = vmul.f32 %v3668_v13, %v4007_v37 }
 0x107   :  { %791 = vst [vmem:[#allocation2 + $0x128] sm:$0xff] %v4046_v39  ;;  %v1407_v41 = vadd.f32 %v1375_v22, %v1309_v32  ;;  %v4093_v54 = vld [vmem:[#allocation2 + $0x10f] sm:$0xff]  ;;  %v1670_v57 = vmul.f32 %v3701_v38, %v4083_v5  ;;  %v1377_v29 = vmul.f32 %v3681_v30, %v4083_v5 }
 0x108   :  { %v505_v47 = vpop.f32.mrf.mxu0  ;;  %v1475_v23 = vmul.f32 %v3686_v31, %v4093_v54  ;;  %v1115_v1 = vadd.f32 %v1083_v26, %v1017_v61  ;;  %v1182_v22 = vmul.f32 %v3640_v7, %v4093_v54  ;;  %v4132_v32 = vld [vmem:[#allocation2 + $0x111] sm:$0xff]  ;;  %v4159_v26 = vld [vmem:[%s5390_s3 + $0x1] ss:$0 sm:$0xff] }
 0x109   :  { %v506_v60 = vadd.f32 %v4067_v19, %v505_v47  ;;  %v1506_v45 = vadd.f32 %v1474_v42, %v1407_v41  ;;  %1888 = vmatmul.f32.gmra.mxu1 %v1800_v46  ;;  %v1408_v47 = vadd.f32 %v1376_v20, %v1310_v18  ;;  %v4139_v41 = vld [vmem:[%s5390_s3] ss:$0 sm:$0xff]  ;;  %v1671_v33 = vmul.f32 %v3701_v38, %v4132_v32 }
 0x10a   :  { %v1213_v53 = vadd.f32 %v1181_v63, %v1115_v1  ;;  %v889_v8 = vmul.f32 %v4139_v41, %v4060_v10  ;;  %v987_v46 = vmul.f32 %v4159_v26, %v3981_v25  ;;  %v1574_v20 = vmul.f32 %v3695_v35, %v4046_v39  ;;  %v4174_v25 = vld [vmem:[%s5390_s3 + $0x2] ss:$0 sm:$0xff] }
 0x10b   :  { %v663_v16 = vmax.f32 %v506_v60, 0.0  ;;  %3190 = vmatmul.msk.f32.gmra.mxu0 %vm240_vm1, %v204_v6  ;;  %v1604_v59 = vadd.f32 %v1572_v51, %v1506_v45  ;;  %v1018_v6 = vadd.f32 %v986_v2, %v888_v55  ;;  %v1507_v9 = vadd.f32 %v1475_v23, %v1408_v47 }
 0x10c   :  { %3206 = vmatmul.msk.f32.gmra.mxu3 %vm240_vm1, %v220_v44  ;;  %v1084_v60 = vmul.f32 %v3616_v56, %v1636_v28  ;;  %v1311_v56 = vadd.f32 %v1279_v49, %v1213_v53  ;;  %v1085_v2 = vmul.f32 %v4174_v25, %v4083_v5  ;;  %v890_v44 = vmul.f32 %v4139_v41, %v4093_v54  ;;  %v4188_v53 = vld [vmem:[%s5390_s3 + $0x3] ss:$0 sm:$0xff] }
 0x10d   :  { %v4078_v17 = vmin.f32 %v663_v16, 6.0  ;;  %v1702_v4 = vadd.f32 %v1670_v57, %v1604_v59  ;;  %v1801_v16 = vmin.f32 %v1769_v40, 6.0  ;;  %v1605_v36 = vadd.f32 %v1573_v27, %v1507_v9 }
 0x10e   :  { %v4121_v14 = vld [vmem:[#allocation2 + $0x127] sm:$0xff]  ;;  %v1116_v42 = vadd.f32 %v1084_v60, %v1018_v6  ;;  %v1409_v45 = vadd.f32 %v1377_v29, %v1311_v56  ;;  %v988_v49 = vmul.f32 %v4159_v26, %v4007_v37  ;;  %v1086_v56 = vmul.f32 %v4174_v25, %v4132_v32 }
 0x10f   :  { %792 = vst [vmem:[#allocation2 + $0x130] sm:$0xff] %v4078_v17  ;;  %v1738_v24 = vadd.f32 %v3741_v21, %v1702_v4  ;;  %v1476_v7 = vmul.f32 %v3686_v31, %v4121_v14  ;;  %v1378_v4 = vmul.f32 %v3681_v30, %v4132_v32  ;;  %v1183_v5 = vmul.f32 %v4188_v53, %v4121_v14 }
 0x110   :  { %v508_v48 = vpop.f32.mrf.mxu0  ;;  %v1214_v28 = vadd.f32 %v1182_v22, %v1116_v42  ;;  %v1020_v27 = vadd.f32 %v988_v49, %v890_v44  ;;  %v1575_v37 = vmul.f32 %v3695_v35, %v4078_v17 }
 0x111   :  { %v509_v0 = vadd.f32 %v4067_v19, %v508_v48  ;;  %1891 = vmatmul.f32.gmra.mxu1 %v1801_v16  ;;  %v1770_v43 = vmax.f32 %v1738_v24, 0.0  ;;  %v556_v48 = vpop.f32.mrf.mxu3  ;;  %v1508_v57 = vadd.f32 %v1476_v7, %v1409_v45  ;;  %v222_v24 = vld [vmem:[%s5387_s0 + $0x198] sm:$0xff] }
 0x112   :  { %v557_v10 = vadd.f32 %v4067_v19, %v556_v48  ;;  %v1312_v61 = vadd.f32 %v1280_v52, %v1214_v28 }
 0x113   :  { %v664_v50 = vmax.f32 %v509_v0, 0.0  ;;  %v1703_v0 = vadd.f32 %v1671_v33, %v1605_v36  ;;  %v1802_v59 = vmin.f32 %v1770_v43, 6.0  ;;  %v1606_v9 = vadd.f32 %v1574_v20, %v1508_v57 }
 0x114   :  { %3207 = vmatmul.msk.f32.gmra.mxu3 %vm240_vm1, %v221_v62  ;;  %v680_v55 = vmax.f32 %v557_v10, 0.0  ;;  %v1118_v62 = vadd.f32 %v1086_v56, %v1020_v27 }
 0x115   :  { %v4112_v3 = vmin.f32 %v664_v50, 6.0  ;;  %v1019_v50 = vadd.f32 %v987_v46, %v889_v8  ;;  %v1739_v40 = vadd.f32 %v3741_v21, %v1703_v0 }
 0x116   :  { %v4150_v51 = vld [vmem:[#allocation2 + $0x129] sm:$0xff]  ;;  %v744_v1 = vmin.f32 %v680_v55, 6.0  ;;  %v4211_v8 = vld [vmem:[#allocation2 + $0x131] sm:$0xff] }
 0x117   :  { %793 = vst [vmem:[#allocation2 + $0x148] sm:$0xff] %v4112_v3  ;;  %v4164_v18 = vld [vmem:[#allocation2 + $0x12f] sm:$0xff]  ;;  %v1672_v63 = vmul.f32 %v3701_v38, %v4150_v51  ;;  %v1117_v22 = vadd.f32 %v1085_v2, %v1019_v50  ;;  %v1771_v29 = vmax.f32 %v1739_v40, 0.0  ;;  %v1379_v43 = vmul.f32 %v3681_v30, %v4150_v51 }
 0x118   :  { %v511_v15 = vpop.f32.mrf.mxu0  ;;  %v1477_v47 = vmul.f32 %v3686_v31, %v4164_v18  ;;  %809 = vst [vmem:[#allocation2 + $0x288] sm:$0xff] %v744_v1  ;;  %v1184_v35 = vmul.f32 %v4188_v53, %v4164_v18  ;;  %v1673_v46 = vmul.f32 %v3701_v38, %v4211_v8  ;;  %v989_v2 = vmul.f32 %v4159_v26, %v4046_v39 }
 0x119   :  { %v512_v11 = vadd.f32 %v4067_v19, %v511_v15  ;;  %v1410_v15 = vadd.f32 %v1378_v4, %v1312_v61  ;;  %1894 = vmatmul.f32.gmra.mxu1 %v1802_v59  ;;  %v1704_v54 = vadd.f32 %v1672_v63, %v1606_v9  ;;  %v1215_v16 = vadd.f32 %v1183_v5, %v1117_v22  ;;  %v559_v33 = vpop.f32.mrf.mxu3  ;;  %v223_v61 = vld [vmem:[%s5387_s0 + $0x1a0] sm:$0xff]  ;;  %v4261_v5 = vld [vmem:[%s5390_s3 + $0x8] ss:$0 sm:$0xff] }
 0x11a   :  { %v1803_v48 = vmin.f32 %v1771_v29, 6.0  ;;  %v1216_v20 = vadd.f32 %v1184_v35, %v1118_v62  ;;  %v1087_v44 = vmul.f32 %v4174_v25, %v4150_v51  ;;  %v892_v40 = vmul.f32 %v4139_v41, %v4164_v18  ;;  %v4269_v18 = vld [vmem:[%s5390_s3 + $0x5] ss:$0 sm:$0xff]  ;;  %v4277_v29 = vld [vmem:[%s5390_s3 + $0x6] ss:$0 sm:$0xff] }
 0x11b   :  { %v665_v34 = vmax.f32 %v512_v11, 0.0  ;;  %v1509_v11 = vadd.f32 %v1477_v47, %v1410_v15  ;;  %v1740_v7 = vadd.f32 %v3741_v21, %v1704_v54  ;;  %v4245_v47 = vld [vmem:[%s5390_s3 + $0x7] ss:$0 sm:$0xff] }
 0x11c   :  { %3208 = vmatmul.msk.f32.gmra.mxu3 %vm240_vm1, %v222_v24 }
 0x11d   :  { %v4143_v12 = vmin.f32 %v665_v34, 6.0  ;;  %v1281_v34 = vmul.f32 %v3668_v13, %v4046_v39  ;;  %v1607_v45 = vadd.f32 %v1575_v37, %v1509_v11  ;;  %v560_v13 = vadd.f32 %v4067_v19, %v559_v33 }
 0x11e   :  { %v4205_v36 = vld [vmem:[#allocation2 + $0x147] sm:$0xff]  ;;  %v1772_v30 = vmax.f32 %v1740_v7, 0.0  ;;  %v990_v39 = vmul.f32 %v4159_v26, %v4078_v17 }
 0x11f   :  { %794 = vst [vmem:[#allocation2 + $0x150] sm:$0xff] %v4143_v12  ;;  %v1313_v32 = vadd.f32 %v1281_v34, %v1215_v16  ;;  %v1478_v10 = vmul.f32 %v3686_v31, %v4205_v36  ;;  %v681_v0 = vmax.f32 %v560_v13, 0.0  ;;  %v1705_v55 = vadd.f32 %v1673_v46, %v1607_v45 }
 0x120   :  { %v514_v58 = vpop.f32.mrf.mxu0  ;;  %v891_v31 = vmul.f32 %v4139_v41, %v4121_v14  ;;  %v1576_v14 = vmul.f32 %v4245_v47, %v4112_v3  ;;  %v1185_v16 = vmul.f32 %v4188_v53, %v4205_v36  ;;  %v1022_v37 = vadd.f32 %v990_v39, %v892_v40 }
 0x121   :  { %v515_v23 = vadd.f32 %v4067_v19, %v514_v58  ;;  %1897 = vmatmul.f32.gmra.mxu1 %v1803_v48  ;;  %v1411_v58 = vadd.f32 %v1379_v43, %v1313_v32  ;;  %v745_v59 = vmin.f32 %v681_v0, 6.0  ;;  %v562_v54 = vpop.f32.mrf.mxu3  ;;  %v1741_v51 = vadd.f32 %v3741_v21, %v1705_v55  ;;  %v224_v43 = vld [vmem:[%s5387_s0 + $0x1a8] sm:$0xff]  ;;  %v4301_v0 = vld [vmem:[%s5391_s4] ss:$0 sm:$0xff] }
 0x122   :  { %v563_v22 = vadd.f32 %v4067_v19, %v562_v54  ;;  %v1021_v24 = vadd.f32 %v989_v2, %v891_v31  ;;  %v1088_v45 = vmul.f32 %v4174_v25, %v4211_v8  ;;  %v893_v39 = vmul.f32 %v4139_v41, %v4205_v36  ;;  %v225_v54 = vld [vmem:[%s5387_s0 + $0x1b0] sm:$0xff] }
 0x123   :  { %v666_v6 = vmax.f32 %v515_v23, 0.0  ;;  %v1510_v38 = vadd.f32 %v1478_v10, %v1411_v58  ;;  %v4236_v23 = vld [vmem:[%s5390_s3 + $0x4] ss:$0 sm:$0xff]  ;;  %810 = vst [vmem:[#allocation2 + $0x290] sm:$0xff] %v745_v59  ;;  %v1773_v33 = vmax.f32 %v1741_v51, 0.0  ;;  %v1577_v58 = vmul.f32 %v4245_v47, %v4143_v12 }
 0x124   :  { %3209 = vmatmul.msk.f32.gmra.mxu3 %vm240_vm1, %v223_v61  ;;  %v1282_v63 = vmul.f32 %v4236_v23, %v4078_v17  ;;  %v1380_v17 = vmul.f32 %v4269_v18, %v4211_v8  ;;  %v1283_v32 = vmul.f32 %v4236_v23, %v4112_v3  ;;  %v1120_v46 = vadd.f32 %v1088_v45, %v1022_v37 }
 0x125   :  { %v4194_v60 = vmin.f32 %v666_v6, 6.0  ;;  %v1804_v6 = vmin.f32 %v1772_v30, 6.0  ;;  %v1608_v27 = vadd.f32 %v1576_v14, %v1510_v38  ;;  %v1805_v55 = vmin.f32 %v1773_v33, 6.0 }
 0x126   :  { %v4227_v50 = vld [vmem:[#allocation2 + $0x149] sm:$0xff]  ;;  %v1314_v49 = vadd.f32 %v1282_v63, %v1216_v20  ;;  %v1642_v59 = vld [vmem:[#allocation2 + $0x151] sm:$0xff]  ;;  %v1284_v40 = vmul.f32 %v4236_v23, %v4143_v12  ;;  %v991_v36 = vmul.f32 %v4159_v26, %v4112_v3 }
 0x127   :  { %795 = vst [vmem:[#allocation2 + $0x168] sm:$0xff] %v4194_v60  ;;  %v4249_v1 = vld [vmem:[#allocation2 + $0x14f] sm:$0xff]  ;;  %v1674_v15 = vmul.f32 %v4261_v5, %v4227_v50  ;;  %v1381_v20 = vmul.f32 %v4269_v18, %v4227_v50  ;;  %v1382_v3 = vmul.f32 %v4269_v18, %v1642_v59 }
 0x128   :  { %v517_v42 = vpop.f32.mrf.mxu0  ;;  %v1479_v21 = vmul.f32 %v4277_v29, %v4249_v1  ;;  %v1412_v7 = vadd.f32 %v1380_v17, %v1314_v49  ;;  %v1186_v13 = vmul.f32 %v4188_v53, %v4249_v1 }
 0x129   :  { %v518_v28 = vadd.f32 %v4067_v19, %v517_v42  ;;  %v682_v42 = vmax.f32 %v563_v22, 0.0  ;;  %1900 = vmatmul.f32.gmra.mxu1 %v1804_v6  ;;  %v1706_v56 = vadd.f32 %v1674_v15, %v1608_v27  ;;  %v565_v61 = vpop.f32.mrf.mxu3  ;;  %v1675_v15 = vmul.f32 %v4261_v5, %v1642_v59  ;;  %v4334_v27 = vld [vmem:[%s5393_s6] ss:$0 sm:$0xff] }
 0x12a   :  { %v1511_v62 = vadd.f32 %v1479_v21, %v1412_v7  ;;  %v566_v31 = vadd.f32 %v4067_v19, %v565_v61  ;;  %v1218_v38 = vadd.f32 %v1186_v13, %v1120_v46  ;;  %v1089_v7 = vmul.f32 %v4174_v25, %v4227_v50 }
 0x12b   :  { %v667_v52 = vmax.f32 %v518_v28, 0.0  ;;  %v1119_v28 = vadd.f32 %v1087_v44, %v1021_v24  ;;  %v746_v35 = vmin.f32 %v682_v42, 6.0  ;;  %v1742_v8 = vadd.f32 %v4301_v0, %v1706_v56 }
 0x12c   :  { %3210 = vmatmul.msk.f32.gmra.mxu3 %vm240_vm1, %v224_v43  ;;  %v1609_v2 = vadd.f32 %v1577_v58, %v1511_v62  ;;  %v683_v44 = vmax.f32 %v566_v31, 0.0  ;;  %v1316_v22 = vadd.f32 %v1284_v40, %v1218_v38  ;;  %v992_v42 = vmul.f32 %v4159_v26, %v4143_v12 }
 0x12d   :  { %v4222_v57 = vmin.f32 %v667_v52, 6.0  ;;  %v1217_v48 = vadd.f32 %v1185_v16, %v1119_v28  ;;  %811 = vst [vmem:[#allocation2 + $0x2a8] sm:$0xff] %v746_v35  ;;  %v1774_v6 = vmax.f32 %v1742_v8, 0.0  ;;  %v1578_v56 = vmul.f32 %v4245_v47, %v4194_v60 }
 0x12e   :  { %v4296_v10 = vld [vmem:[#allocation2 + $0x167] sm:$0xff]  ;;  %v747_v17 = vmin.f32 %v683_v44, 6.0  ;;  %v1707_v21 = vadd.f32 %v1675_v15, %v1609_v2  ;;  %v1859_v45 = vpop.f32.mrf.mxu1  ;;  %v1414_v13 = vadd.f32 %v1382_v3, %v1316_v22  ;;  %v1285_v15 = vmul.f32 %v4236_v23, %v4194_v60 }
 0x12f   :  { %796 = vst [vmem:[#allocation2 + $0x170] sm:$0xff] %v4222_v57  ;;  %v1480_v14 = vmul.f32 %v4277_v29, %v4296_v10  ;;  %v1806_v28 = vmin.f32 %v1774_v6, 6.0  ;;  %v1860_v50 = vadd.f32 %v4334_v27, %v1859_v45 }
 0x130   :  { %v520_v4 = vpop.f32.mrf.mxu0  ;;  %812 = vst [vmem:[#allocation2 + $0x2b0] sm:$0xff] %v747_v17  ;;  %v993_v17 = vmul.f32 %v4159_v26, %v4194_v60 }
 0x131   :  { %v521_v9 = vadd.f32 %v4067_v19, %v520_v4  ;;  %v1315_v4 = vadd.f32 %v1283_v32, %v1217_v48  ;;  %1903 = vmatmul.f32.gmra.mxu1 %v1805_v55  ;;  %v568_v35 = vpop.f32.mrf.mxu3  ;;  %v1187_v48 = vmul.f32 %v4188_v53, %v4296_v10  ;;  %v1743_v32 = vadd.f32 %v4301_v0, %v1707_v21 }
 0x132   :  { %v569_v62 = vadd.f32 %v4067_v19, %v568_v35  ;;  %1955 = vst [vmem:[#allocation3] sm:$0xff] %v1860_v50  ;;  %v227_v50 = vld [vmem:[%s5387_s0 + $0x1c0] sm:$0xff] }
 0x133   :  { %v668_v11 = vmax.f32 %v521_v9, 0.0  ;;  %v1413_v49 = vadd.f32 %v1381_v20, %v1315_v4  ;;  %v1090_v20 = vmul.f32 %v4174_v25, %v1642_v59  ;;  %v1775_v44 = vmax.f32 %v1743_v32, 0.0 }
 0x134   :  { %3211 = vmatmul.msk.f32.gmra.mxu3 %vm240_vm1, %v225_v54  ;;  %v1579_v59 = vmul.f32 %v4245_v47, %v4222_v57 }
 0x135   :  { %v4283_v34 = vmin.f32 %v668_v11, 6.0  ;;  %v894_v11 = vmul.f32 %v4139_v41, %v4249_v1  ;;  %v1512_v16 = vadd.f32 %v1480_v14, %v1413_v49  ;;  %v1023_v1 = vadd.f32 %v991_v36, %v893_v39 }
 0x136   :  { %v4322_v51 = vld [vmem:[#allocation2 + $0x169] sm:$0xff]  ;;  %v1644_v6 = vld [vmem:[#allocation2 + $0x171] sm:$0xff] }
 0x137   :  { %797 = vst [vmem:[#allocation2 + $0x188] sm:$0xff] %v4283_v34  ;;  %v4324_v24 = vld [vmem:[#allocation2 + $0x16f] sm:$0xff]  ;;  %v1676_v33 = vmul.f32 %v4261_v5, %v4322_v51  ;;  %v1610_v8 = vadd.f32 %v1578_v56, %v1512_v16  ;;  %v1121_v58 = vadd.f32 %v1089_v7, %v1023_v1  ;;  %v1383_v49 = vmul.f32 %v4269_v18, %v4322_v51 }
 0x138   :  { %v523_v52 = vpop.f32.mrf.mxu0  ;;  %v1481_v12 = vmul.f32 %v4277_v29, %v4324_v24  ;;  %v1188_v61 = vmul.f32 %v4188_v53, %v4324_v24  ;;  %v1286_v16 = vmul.f32 %v4236_v23, %v4222_v57  ;;  %v895_v1 = vmul.f32 %v4139_v41, %v4296_v10 }
 0x139   :  { %v524_v30 = vadd.f32 %v4067_v19, %v523_v52  ;;  %v1024_v52 = vadd.f32 %v992_v42, %v894_v11  ;;  %1906 = vmatmul.f32.gmra.mxu1 %v1806_v28  ;;  %v1708_v31 = vadd.f32 %v1676_v33, %v1610_v8  ;;  %v1219_v4 = vadd.f32 %v1187_v48, %v1121_v58 }
 0x13a   :  { %v1513_v38 = vadd.f32 %v1481_v12, %v1414_v13  ;;  %v1807_v7 = vmin.f32 %v1775_v44, 6.0  ;;  %v1384_v13 = vmul.f32 %v4269_v18, %v1644_v6  ;;  %v896_v32 = vmul.f32 %v4139_v41, %v4324_v24 }
 0x13b   :  { %v669_v63 = vmax.f32 %v524_v30, 0.0  ;;  %v684_v30 = vmax.f32 %v569_v62, 0.0  ;;  %v1122_v14 = vadd.f32 %v1090_v20, %v1024_v52  ;;  %v1744_v22 = vadd.f32 %v4301_v0, %v1708_v31 }
 0x13c   :  { %v1611_v11 = vadd.f32 %v1579_v59, %v1513_v38  ;;  %v1091_v58 = vmul.f32 %v4174_v25, %v4322_v51  ;;  %v1025_v20 = vadd.f32 %v993_v17, %v895_v1  ;;  %v1580_v24 = vmul.f32 %v4245_v47, %v4283_v34 }
 0x13d   :  { %v4316_v9 = vmin.f32 %v669_v63, 6.0  ;;  %v226_v63 = vld [vmem:[%s5387_s0 + $0x1b8] sm:$0xff]  ;;  %v748_v2 = vmin.f32 %v684_v30, 6.0  ;;  %v1220_v54 = vadd.f32 %v1188_v61, %v1122_v14  ;;  %v1776_v62 = vmax.f32 %v1744_v22, 0.0 }
 0x13e   :  { %3212 = vmatmul.msk.f32.gmra.mxu3 %vm240_vm1, %v226_v63  ;;  %v4366_v40 = vld [vmem:[#allocation2 + $0x187] sm:$0xff]  ;;  %v1862_v42 = vpop.f32.mrf.mxu1  ;;  %v994_v61 = vmul.f32 %v4159_v26, %v4222_v57 }
 0x13f   :  { %798 = vst [vmem:[#allocation2 + $0x190] sm:$0xff] %v4316_v9  ;;  %v571_v21 = vpop.f32.mrf.mxu3  ;;  %v1482_v56 = vmul.f32 %v4277_v29, %v4366_v40  ;;  %v1863_v60 = vadd.f32 %v4334_v27, %v1862_v42  ;;  %v1318_v45 = vadd.f32 %v1286_v16, %v1220_v54  ;;  %v1123_v54 = vadd.f32 %v1091_v58, %v1025_v20 }
 0x140   :  { %v526_v37 = vpop.f32.mrf.mxu0  ;;  %813 = vst [vmem:[#allocation2 + $0x2c8] sm:$0xff] %v748_v2  ;;  %v572_v3 = vadd.f32 %v4067_v19, %v571_v21  ;;  %v1189_v2 = vmul.f32 %v4188_v53, %v4366_v40  ;;  %v1026_v59 = vadd.f32 %v994_v61, %v896_v32  ;;  %v1581_v16 = vmul.f32 %v4245_v47, %v4316_v9 }
 0x141   :  { %v527_v43 = vadd.f32 %v4067_v19, %v526_v37  ;;  %v1317_v37 = vadd.f32 %v1285_v15, %v1219_v4  ;;  %1956 = vst [vmem:[#allocation3 + $0x8] sm:$0xff] %v1863_v60  ;;  %1909 = vmatmul.f32.gmra.mxu1 %v1807_v7  ;;  %v1416_v63 = vadd.f32 %v1384_v13, %v1318_v45  ;;  %v1808_v4 = vmin.f32 %v1776_v62, 6.0  ;;  %v228_v60 = vld [vmem:[%s5387_s0 + $0x1c8] sm:$0xff] }
 0x142   :  { %v685_v35 = vmax.f32 %v572_v3, 0.0  ;;  %v1288_v13 = vmul.f32 %v4236_v23, %v4316_v9  ;;  %v995_v62 = vmul.f32 %v4159_v26, %v4283_v34 }
 0x143   :  { %v670_v46 = vmax.f32 %v527_v43, 0.0  ;;  %v1677_v43 = vmul.f32 %v4261_v5, %v1644_v6  ;;  %v1415_v12 = vadd.f32 %v1383_v49, %v1317_v37  ;;  %v1221_v37 = vadd.f32 %v1189_v2, %v1123_v54 }
 0x144   :  { %v749_v8 = vmin.f32 %v685_v35, 6.0 }
 0x145   :  { %v4357_v55 = vmin.f32 %v670_v46, 6.0  ;;  %v1709_v52 = vadd.f32 %v1677_v43, %v1611_v11  ;;  %v1514_v46 = vadd.f32 %v1482_v56, %v1415_v12  ;;  %v1287_v43 = vmul.f32 %v4236_v23, %v4283_v34 }
 0x146   :  { %v4385_v33 = vld [vmem:[#allocation2 + $0x18f] sm:$0xff]  ;;  %3213 = vmatmul.msk.f32.gmra.mxu3 %vm240_vm1, %v227_v50  ;;  %814 = vst [vmem:[#allocation2 + $0x2d0] sm:$0xff] %v749_v8  ;;  %v1865_v57 = vpop.f32.mrf.mxu1  ;;  %v897_v8 = vmul.f32 %v4139_v41, %v4366_v40  ;;  %v996_v34 = vmul.f32 %v4159_v26, %v4316_v9 }
 0x147   :  { %799 = vst [vmem:[#allocation2 + $0x1a8] sm:$0xff] %v4357_v55  ;;  %v4390_v10 = vld [vmem:[#allocation2 + $0x189] sm:$0xff]  ;;  %v1483_v30 = vmul.f32 %v4277_v29, %v4385_v33  ;;  %v1745_v51 = vadd.f32 %v4301_v0, %v1709_v52  ;;  %v574_v44 = vpop.f32.mrf.mxu3  ;;  %v1866_v17 = vadd.f32 %v4334_v27, %v1865_v57  ;;  %v1190_v11 = vmul.f32 %v4188_v53, %v4385_v33  ;;  %v1646_v1 = vld [vmem:[#allocation2 + $0x191] sm:$0xff] }
 0x148   :  { %v529_v39 = vpop.f32.mrf.mxu0  ;;  %v1678_v38 = vmul.f32 %v4261_v5, %v4390_v10  ;;  %v575_v49 = vadd.f32 %v4067_v19, %v574_v44  ;;  %v1385_v12 = vmul.f32 %v4269_v18, %v4390_v10  ;;  %v1679_v32 = vmul.f32 %v4261_v5, %v1646_v1 }
 0x149   :  { %v530_v36 = vadd.f32 %v4067_v19, %v529_v39  ;;  %v1612_v39 = vadd.f32 %v1580_v24, %v1514_v46  ;;  %v1515_v15 = vadd.f32 %v1483_v30, %v1416_v63  ;;  %1957 = vst [vmem:[#allocation3 + $0x10] sm:$0xff] %v1866_v17  ;;  %1912 = vmatmul.f32.gmra.mxu1 %v1808_v4  ;;  %v1777_v56 = vmax.f32 %v1745_v51, 0.0  ;;  %v229_v17 = vld [vmem:[%s5387_s0 + $0x1d0] sm:$0xff] }
 0x14a   :  { %v686_v42 = vmax.f32 %v575_v49, 0.0  ;;  %v1319_v46 = vadd.f32 %v1287_v43, %v1221_v37  ;;  %v898_v40 = vmul.f32 %v4139_v41, %v4385_v33  ;;  %v1093_v44 = vmul.f32 %v4174_v25, %v4390_v10 }
 0x14b   :  { %v671_v28 = vmax.f32 %v530_v36, 0.0  ;;  %v1092_v36 = vmul.f32 %v4174_v25, %v1644_v6  ;;  %v1710_v21 = vadd.f32 %v1678_v38, %v1612_v39  ;;  %v1613_v7 = vadd.f32 %v1581_v16, %v1515_v15 }
 0x14c   :  { %v1809_v30 = vmin.f32 %v1777_v56, 6.0  ;;  %v1417_v38 = vadd.f32 %v1385_v12, %v1319_v46  ;;  %v1386_v39 = vmul.f32 %v4269_v18, %v1646_v1  ;;  %v1027_v15 = vadd.f32 %v995_v62, %v897_v8 }
 0x14d   :  { %v4388_v48 = vmin.f32 %v671_v28, 6.0  ;;  %v1124_v6 = vadd.f32 %v1092_v36, %v1026_v59  ;;  %v750_v28 = vmin.f32 %v686_v42, 6.0  ;;  %v1746_v52 = vadd.f32 %v4301_v0, %v1710_v21 }
 0x14e   :  { %v4429_v35 = vld [vmem:[#allocation2 + $0x1a7] sm:$0xff]  ;;  %3214 = vmatmul.msk.f32.gmra.mxu3 %vm240_vm1, %v228_v60  ;;  %v1711_v24 = vadd.f32 %v1679_v32, %v1613_v7  ;;  %v1582_v21 = vmul.f32 %v4245_v47, %v4357_v55  ;;  %v1125_v37 = vadd.f32 %v1093_v44, %v1027_v15  ;;  %v1094_v7 = vmul.f32 %v4174_v25, %v1646_v1 }
 0x14f   :  { %800 = vst [vmem:[#allocation2 + $0x1b0] sm:$0xff] %v4388_v48  ;;  %v1222_v45 = vadd.f32 %v1190_v11, %v1124_v6  ;;  %v1484_v20 = vmul.f32 %v4277_v29, %v4429_v35  ;;  %v577_v61 = vpop.f32.mrf.mxu3  ;;  %v1778_v59 = vmax.f32 %v1746_v52, 0.0  ;;  %v1191_v10 = vmul.f32 %v4188_v53, %v4429_v35 }
 0x150   :  { %v532_v31 = vpop.f32.mrf.mxu0  ;;  %815 = vst [vmem:[#allocation2 + $0x2e8] sm:$0xff] %v750_v28  ;;  %v578_v63 = vadd.f32 %v4067_v19, %v577_v61  ;;  %v1028_v11 = vadd.f32 %v996_v34, %v898_v40  ;;  %v1289_v6 = vmul.f32 %v4236_v23, %v4357_v55  ;;  %v1583_v32 = vmul.f32 %v4245_v47, %v4388_v48 }
 0x151   :  { %v533_v14 = vadd.f32 %v4067_v19, %v532_v31  ;;  %v1868_v31 = vpop.f32.mrf.mxu1  ;;  %1915 = vmatmul.f32.gmra.mxu1 %v1809_v30  ;;  %v1516_v54 = vadd.f32 %v1484_v20, %v1417_v38  ;;  %v1810_v56 = vmin.f32 %v1778_v59, 6.0  ;;  %v1223_v62 = vadd.f32 %v1191_v10, %v1125_v37 }
 0x152   :  { %v1869_v4 = vadd.f32 %v4334_v27, %v1868_v31  ;;  %v687_v9 = vmax.f32 %v578_v63, 0.0  ;;  %v1126_v30 = vadd.f32 %v1094_v7, %v1028_v11  ;;  %v899_v38 = vmul.f32 %v4139_v41, %v4429_v35 }
 0x153   :  { %v672_v22 = vmax.f32 %v533_v14, 0.0  ;;  %v1320_v14 = vadd.f32 %v1288_v13, %v1222_v45  ;;  %v1614_v12 = vadd.f32 %v1582_v21, %v1516_v54  ;;  %v1290_v35 = vmul.f32 %v4236_v23, %v4388_v48 }
 0x154   :  { %1958 = vst [vmem:[#allocation3 + $0x18] sm:$0xff] %v1869_v4  ;;  %v751_v36 = vmin.f32 %v687_v9, 6.0  ;;  %v1321_v4 = vadd.f32 %v1289_v6, %v1223_v62  ;;  %v997_v9 = vmul.f32 %v4159_v26, %v4357_v55 }
 0x155   :  { %v4420_v3 = vmin.f32 %v672_v22, 6.0  ;;  %v1747_v22 = vadd.f32 %v4301_v0, %v1711_v24  ;;  %v1418_v42 = vadd.f32 %v1386_v39, %v1320_v14  ;;  %v230_v14 = vld [vmem:[%s5387_s0 + $0x1d8] sm:$0xff] }
 0x156   :  { %v4447_v2 = vld [vmem:[#allocation2 + $0x1af] sm:$0xff]  ;;  %3215 = vmatmul.msk.f32.gmra.mxu3 %vm240_vm1, %v229_v17  ;;  %816 = vst [vmem:[#allocation2 + $0x2f0] sm:$0xff] %v751_v36  ;;  %v1029_v36 = vadd.f32 %v997_v9, %v899_v38 }
 0x157   :  { %801 = vst [vmem:[#allocation2 + $0x1c8] sm:$0xff] %v4420_v3  ;;  %v4454_v57 = vld [vmem:[#allocation2 + $0x1a9] sm:$0xff]  ;;  %v1485_v33 = vmul.f32 %v4277_v29, %v4447_v2  ;;  %v1192_v28 = vmul.f32 %v4188_v53, %v4447_v2  ;;  %v580_v13 = vpop.f32.mrf.mxu3  ;;  %v1648_v34 = vld [vmem:[#allocation2 + $0x1b1] sm:$0xff]  ;;  %v900_v55 = vmul.f32 %v4139_v41, %v4447_v2  ;;  %v1584_v37 = vmul.f32 %v4245_v47, %v4420_v3 }
 0x158   :  { %v535_v50 = vpop.f32.mrf.mxu0  ;;  %v1680_v16 = vmul.f32 %v4261_v5, %v4454_v57  ;;  %v581_v46 = vadd.f32 %v4067_v19, %v580_v13  ;;  %v1387_v61 = vmul.f32 %v4269_v18, %v4454_v57  ;;  %v1681_v15 = vmul.f32 %v4261_v5, %v1648_v34 }
 0x159   :  { %v536_v58 = vadd.f32 %v4067_v19, %v535_v50  ;;  %v1517_v45 = vadd.f32 %v1485_v33, %v1418_v42  ;;  %v1871_v52 = vpop.f32.mrf.mxu1  ;;  %v1779_v50 = vmax.f32 %v1747_v22, 0.0  ;;  %v1224_v24 = vadd.f32 %v1192_v28, %v1126_v30  ;;  %1918 = vmatmul.f32.gmra.mxu1 %v1810_v56 }
 0x15a   :  { %v1872_v1 = vadd.f32 %v4334_v27, %v1871_v52  ;;  %v1712_v20 = vadd.f32 %v1680_v16, %v1614_v12  ;;  %v688_v31 = vmax.f32 %v581_v46, 0.0  ;;  %v1419_v54 = vadd.f32 %v1387_v61, %v1321_v4 }
 0x15b   :  { %v673_v51 = vmax.f32 %v536_v58, 0.0  ;;  %v1615_v40 = vadd.f32 %v1583_v32, %v1517_v45  ;;  %v1811_v44 = vmin.f32 %v1779_v50, 6.0  ;;  %v998_v33 = vmul.f32 %v4159_v26, %v4388_v48 }
 0x15c   :  { %1959 = vst [vmem:[#allocation3 + $0x20] sm:$0xff] %v1872_v1  ;;  %v752_v59 = vmin.f32 %v688_v31, 6.0  ;;  %v1748_v39 = vadd.f32 %v4301_v0, %v1712_v20  ;;  %v1322_v22 = vadd.f32 %v1290_v35, %v1224_v24  ;;  %v1095_v11 = vmul.f32 %v4174_v25, %v4454_v57  ;;  %v231_v1 = vld [vmem:[%s5387_s0 + $0x1e0] sm:$0xff] }
 0x15d   :  { %v4457_v49 = vmin.f32 %v673_v51, 6.0  ;;  %v1713_v16 = vadd.f32 %v1681_v15, %v1615_v40  ;;  %v1388_v7 = vmul.f32 %v4269_v18, %v1648_v34  ;;  %v1030_v50 = vadd.f32 %v998_v33, %v900_v55 }
 0x15e   :  { %v4482_v8 = vld [vmem:[#allocation2 + $0x1c7] sm:$0xff]  ;;  %3216 = vmatmul.msk.f32.gmra.mxu3 %vm240_vm1, %v230_v14  ;;  %817 = vst [vmem:[#allocation2 + $0x308] sm:$0xff] %v752_v59  ;;  %v1127_v52 = vadd.f32 %v1095_v11, %v1029_v36  ;;  %v1291_v40 = vmul.f32 %v4236_v23, %v4420_v3 }
 0x15f   :  { %802 = vst [vmem:[#allocation2 + $0x1d0] sm:$0xff] %v4457_v49  ;;  %v1486_v51 = vmul.f32 %v4277_v29, %v4482_v8  ;;  %v583_v48 = vpop.f32.mrf.mxu3  ;;  %v1193_v57 = vmul.f32 %v4188_v53, %v4482_v8  ;;  %v1420_v62 = vadd.f32 %v1388_v7, %v1322_v22  ;;  %v1749_v46 = vadd.f32 %v4301_v0, %v1713_v16 }
 0x160   :  { %v538_v60 = vpop.f32.mrf.mxu0  ;;  %v584_v6 = vadd.f32 %v4067_v19, %v583_v48  ;;  %v1585_v14 = vmul.f32 %v4245_v47, %v4457_v49  ;;  %v901_v33 = vmul.f32 %v4139_v41, %v4482_v8  ;;  %v1292_v8 = vmul.f32 %v4236_v23, %v4457_v49 }
 0x161   :  { %v539_v43 = vadd.f32 %v4067_v19, %v538_v60  ;;  %v1518_v42 = vadd.f32 %v1486_v51, %v1419_v54  ;;  %v1874_v60 = vpop.f32.mrf.mxu1  ;;  %1921 = vmatmul.f32.gmra.mxu1 %v1811_v44  ;;  %v1225_v31 = vadd.f32 %v1193_v57, %v1127_v52  ;;  %v999_v44 = vmul.f32 %v4159_v26, %v4420_v3 }
 0x162   :  { %v1875_v2 = vadd.f32 %v4334_v27, %v1874_v60  ;;  %v689_v13 = vmax.f32 %v584_v6, 0.0  ;;  %v1781_v59 = vmax.f32 %v1749_v46, 0.0 }
 0x163   :  { %v674_v58 = vmax.f32 %v539_v43, 0.0  ;;  %v1780_v43 = vmax.f32 %v1748_v39, 0.0  ;;  %v1616_v30 = vadd.f32 %v1584_v37, %v1518_v42  ;;  %v1323_v11 = vadd.f32 %v1291_v40, %v1225_v31 }
 0x164   :  { %1960 = vst [vmem:[#allocation3 + $0x28] sm:$0xff] %v1875_v2  ;;  %v753_v20 = vmin.f32 %v689_v13, 6.0  ;;  %v1813_v60 = vmin.f32 %v1781_v59, 6.0 }
 0x165   :  { %v4489_v63 = vmin.f32 %v674_v58, 6.0  ;;  %v1096_v58 = vmul.f32 %v4174_v25, %v1648_v34  ;;  %v1812_v4 = vmin.f32 %v1780_v43, 6.0 }
 0x166   :  { %v4506_v10 = vld [vmem:[#allocation2 + $0x1c9] sm:$0xff]  ;;  %3217 = vmatmul.msk.f32.gmra.mxu3 %vm240_vm1, %v231_v1  ;;  %818 = vst [vmem:[#allocation2 + $0x310] sm:$0xff] %v753_v20  ;;  %v1650_v9 = vld [vmem:[#allocation2 + $0x1d1] sm:$0xff]  ;;  %v4581_v20 = vld [vmem:[%s5389_s2] ss:$0 sm:$0xff] }
 0x167   :  { %803 = vst [vmem:[#allocation2 + $0x1e8] sm:$0xff] %v4489_v63  ;;  %v1454_v56 = vld [vmem:[#allocation2 + $0x1cf] sm:$0xff]  ;;  %v1682_v45 = vmul.f32 %v4261_v5, %v4506_v10  ;;  %v1128_v34 = vadd.f32 %v1096_v58, %v1030_v50  ;;  %v586_v39 = vpop.f32.mrf.mxu3  ;;  %v1389_v15 = vmul.f32 %v4269_v18, %v4506_v10  ;;  %v1683_v37 = vmul.f32 %v4261_v5, %v1650_v9 }
 0x168   :  { %v541_v17 = vpop.f32.mrf.mxu0  ;;  %v1487_v28 = vmul.f32 %v4277_v29, %v1454_v56  ;;  %v1194_v24 = vmul.f32 %v4188_v53, %v1454_v56  ;;  %v587_v36 = vadd.f32 %v4067_v19, %v586_v39  ;;  %v902_v57 = vmul.f32 %v4139_v41, %v1454_v56 }
 0x169   :  { %v542_v21 = vadd.f32 %v4067_v19, %v541_v17  ;;  %v1714_v38 = vadd.f32 %v1682_v45, %v1616_v30  ;;  %v1877_v17 = vpop.f32.mrf.mxu1  ;;  %1924 = vmatmul.f32.gmra.mxu1 %v1812_v4  ;;  %v1421_v7 = vadd.f32 %v1389_v15, %v1323_v11  ;;  %v1586_v52 = vmul.f32 %v4245_v47, %v4489_v63 }
 0x16a   :  { %v1519_v61 = vadd.f32 %v1487_v28, %v1420_v62  ;;  %v1226_v55 = vadd.f32 %v1194_v24, %v1128_v34  ;;  %v1878_v3 = vadd.f32 %v4334_v27, %v1877_v17  ;;  %v690_v48 = vmax.f32 %v587_v36, 0.0  ;;  %v232_v28 = vld [vmem:[%s5387_s0 + $0x1e8] sm:$0xff] }
 0x16b   :  { %v675_v12 = vmax.f32 %v542_v21, 0.0  ;;  %v4549_v16 = vadd.f32 %v4301_v0, %v1714_v38  ;;  %v1000_v50 = vmul.f32 %v4159_v26, %v4457_v49  ;;  %v1390_v46 = vmul.f32 %v4269_v18, %v1650_v9 }
 0x16c   :  { %v1617_v22 = vadd.f32 %v1585_v14, %v1519_v61  ;;  %1961 = vst [vmem:[#allocation3 + $0x30] sm:$0xff] %v1878_v3  ;;  %v754_v43 = vmin.f32 %v690_v48, 6.0  ;;  %v1324_v45 = vadd.f32 %v1292_v8, %v1226_v55  ;;  %v1293_v58 = vmul.f32 %v4236_v23, %v4489_v63  ;;  %v2987_v55 = vld [vmem:[%s5392_s5 + $0x78] sm:$0xff]  ;;  %v2986_v3 = vld [vmem:[%s5392_s5 + $0x70] sm:$0xff] }
 0x16d   :  { %v4523_v32 = vmin.f32 %v675_v12, 6.0  ;;  %v1782_v13 = vmax.f32 %v4549_v16, 0.0  ;;  %v1032_v38 = vadd.f32 %v1000_v50, %v902_v57  ;;  %v1098_v40 = vmul.f32 %v4174_v25, %v1650_v9  ;;  %2992 = vmatpush.msra.mxu2 %v2987_v55  ;;  %3238 = vmatpush.msra.mxu3 %v2987_v55  ;;  %v2982_v55 = vld [vmem:[%s5392_s5 + $0x50] sm:$0xff] }
 0x16e   :  { %v4542_v54 = vld [vmem:[#allocation2 + $0x1e7] sm:$0xff]  ;;  %v1715_v2 = vadd.f32 %v1683_v37, %v1617_v22  ;;  %3218 = vmatmul.msk.f32.gmra.mxu3 %vm240_vm1, %v232_v28  ;;  %819 = vst [vmem:[#allocation2 + $0x328] sm:$0xff] %v754_v43  ;;  %v1422_v34 = vadd.f32 %v1390_v46, %v1324_v45 }
 0x16f   :  { %804 = vst [vmem:[#allocation2 + $0x1f0] sm:$0xff] %v4523_v32  ;;  %v1488_v42 = vmul.f32 %v4277_v29, %v4542_v54  ;;  %v1195_v1 = vmul.f32 %v4188_v53, %v4542_v54  ;;  %v589_v31 = vpop.f32.mrf.mxu3  ;;  %v1587_v15 = vmul.f32 %v4245_v47, %v4523_v32  ;;  %v1130_v16 = vadd.f32 %v1098_v40, %v1032_v38 }
 0x170   :  { %v544_v51 = vpop.f32.mrf.mxu0  ;;  %v590_v14 = vadd.f32 %v4581_v20, %v589_v31  ;;  %2993 = vmatpush.msra.mxu2 %v2986_v3  ;;  %3239 = vmatpush.msra.mxu3 %v2986_v3 }
 0x171   :  { %v545_v35 = vadd.f32 %v4067_v19, %v544_v51  ;;  %v1097_v19 = vmul.f32 %v4174_v25, %v4506_v10  ;;  %v1031_v10 = vadd.f32 %v999_v44, %v901_v33  ;;  %v1520_v62 = vadd.f32 %v1488_v42, %v1421_v7  ;;  %v1880_v4 = vpop.f32.mrf.mxu1  ;;  %1927 = vmatmul.f32.gmra.mxu1 %v1813_v60 }
 0x172   :  { %v4588_v51 = vadd.f32 %v4301_v0, %v1715_v2  ;;  %v1881_v59 = vadd.f32 %v4334_v27, %v1880_v4  ;;  %v691_v33 = vmax.f32 %v590_v14, 0.0  ;;  %v903_v42 = vmul.f32 %v4139_v41, %v4542_v54  ;;  %v2985_v54 = vld [vmem:[%s5392_s5 + $0x68] sm:$0xff]  ;;  %v2984_v14 = vld [vmem:[%s5392_s5 + $0x60] sm:$0xff] }
 0x173   :  { %v676_v21 = vmax.f32 %v545_v35, 0.0  ;;  %v1129_v30 = vadd.f32 %v1097_v19, %v1031_v10  ;;  %v1618_v39 = vadd.f32 %v1586_v52, %v1520_v62  ;;  %v1001_v60 = vmul.f32 %v4159_v26, %v4489_v63  ;;  %2994 = vmatpush.msra.mxu2 %v2985_v54  ;;  %3240 = vmatpush.msra.mxu3 %v2985_v54 }
 0x174   :  { %1962 = vst [vmem:[#allocation3 + $0x38] sm:$0xff] %v1881_v59  ;;  %v755_v37 = vmin.f32 %v691_v33, 6.0  ;;  %v1814_v7 = vmin.f32 %v1782_v13, 6.0  ;;  %v1294_v2 = vmul.f32 %v4236_v23, %v4523_v32  ;;  %v1783_v43 = vmax.f32 %v4588_v51, 0.0 }
 0x175   :  { %v4558_v6 = vmin.f32 %v676_v21, 6.0  ;;  %v1227_v22 = vadd.f32 %v1195_v1, %v1129_v30  ;;  %v233_v21 = vld [vmem:[%s5387_s0 + $0x1f0] sm:$0xff]  ;;  %v1002_v63 = vmul.f32 %v4159_v26, %v4523_v32  ;;  %v1033_v46 = vadd.f32 %v1001_v60, %v903_v42  ;;  %2995 = vmatpush.msra.mxu2 %v2984_v14  ;;  %3241 = vmatpush.msra.mxu3 %v2984_v14 }
 0x176   :  { %v4564_v12 = vld [vmem:[#allocation2 + $0x1e9] sm:$0xff]  ;;  %v1652_v48 = vld [vmem:[#allocation2 + $0x1f1] sm:$0xff]  ;;  %3219 = vmatmul.msk.f32.gmra.mxu3 %vm240_vm1, %v233_v21  ;;  %820 = vst [vmem:[#allocation2 + $0x330] sm:$0xff] %v755_v37  ;;  %v1815_v4 = vmin.f32 %v1783_v43, 6.0  ;;  %v3294_v43 = vld [vmem:[%s5390_s3 + $0x3] ss:$0 sm:$0xff] }
 0x177   :  { %805 = vst [vmem:[#allocation2 + $0x208] sm:$0xff] %v4558_v6  ;;  %v1684_v49 = vmul.f32 %v4261_v5, %v4564_v12  ;;  %v1456_v24 = vld [vmem:[#allocation2 + $0x1ef] sm:$0xff]  ;;  %v1391_v8 = vmul.f32 %v4269_v18, %v4564_v12  ;;  %v1099_v10 = vmul.f32 %v4174_v25, %v4564_v12  ;;  %v1685_v52 = vmul.f32 %v4261_v5, %v1652_v48  ;;  %v592_v50 = vpop.f32.mrf.mxu3 }
 0x178   :  { %v547_v56 = vpop.f32.mrf.mxu0  ;;  %v1489_v44 = vmul.f32 %v4277_v29, %v1456_v24  ;;  %v1196_v9 = vmul.f32 %v4188_v53, %v1456_v24  ;;  %v904_v19 = vmul.f32 %v4139_v41, %v1456_v24  ;;  %v1325_v41 = vadd.f32 %v1293_v58, %v1227_v22  ;;  %v1655_v14 = vld [vmem:[#allocation2 + $0x229] sm:$0xff] }
 0x179   :  { %v548_v61 = vadd.f32 %v4581_v20, %v547_v56  ;;  %v1716_v11 = vadd.f32 %v1684_v49, %v1618_v39  ;;  %v1883_v30 = vpop.f32.mrf.mxu1  ;;  %v593_v1 = vadd.f32 %v4581_v20, %v592_v50  ;;  %v1131_v38 = vadd.f32 %v1099_v10, %v1033_v46  ;;  %1930 = vmatmul.f32.gmra.mxu1 %v1814_v7  ;;  %v4686_v46 = vld [vmem:[%s5390_s3 + $0x1] ss:$0 sm:$0xff] }
 0x17a   :  { %v1521_v17 = vadd.f32 %v1489_v44, %v1422_v34  ;;  %v1228_v57 = vadd.f32 %v1196_v9, %v1130_v16  ;;  %v1423_v58 = vadd.f32 %v1391_v8, %v1325_v41  ;;  %v1034_v32 = vadd.f32 %v1002_v63, %v904_v19  ;;  %v2983_v34 = vld [vmem:[%s5392_s5 + $0x58] sm:$0xff]  ;;  %v2981_v8 = vld [vmem:[%s5392_s5 + $0x48] sm:$0xff] }
 0x17b   :  { %v677_v35 = vmax.f32 %v548_v61, 0.0  ;;  %v4628_v62 = vadd.f32 %v4301_v0, %v1716_v11  ;;  %v1884_v25 = vadd.f32 %v4334_v27, %v1883_v30  ;;  %v692_v31 = vmax.f32 %v593_v1, 0.0  ;;  %2996 = vmatpush.msra.mxu2 %v2983_v34  ;;  %3242 = vmatpush.msra.mxu3 %v2983_v34  ;;  %v2979_v1 = vld [vmem:[%s5392_s5 + $0x38] sm:$0xff]  ;;  %v1989_v34 = vld [vmem:[#allocation2 + $0x247] sm:$0xff] }
 0x17c   :  { %v1619_v28 = vadd.f32 %v1587_v15, %v1521_v17  ;;  %v1326_v49 = vadd.f32 %v1294_v2, %v1228_v57  ;;  %v1588_v44 = vmul.f32 %v4245_v47, %v4558_v6  ;;  %v1392_v39 = vmul.f32 %v4269_v18, %v1652_v48  ;;  %v3293_v15 = vld [vmem:[%s5390_s3 + $0x2] ss:$0 sm:$0xff] }
 0x17d   :  { %v4596_v36 = vmin.f32 %v677_v35, 6.0  ;;  %1963 = vst [vmem:[#allocation3 + $0x40] sm:$0xff] %v1884_v25  ;;  %v756_v59 = vmin.f32 %v692_v31, 6.0  ;;  %v1100_v33 = vmul.f32 %v3293_v15, %v1652_v48  ;;  %v1784_v22 = vmax.f32 %v4628_v62, 0.0  ;;  %2997 = vmatpush.msra.mxu2 %v2982_v55  ;;  %3243 = vmatpush.msra.mxu3 %v2982_v55  ;;  %v1656_v31 = vld [vmem:[#allocation2 + $0x231] sm:$0xff]  ;;  %v2185_v15 = vld [vmem:[#allocation2 + $0x249] sm:$0xff] }
 0x17e   :  { %v1457_v56 = vld [vmem:[#allocation2 + $0x207] sm:$0xff]  ;;  %v1717_v61 = vadd.f32 %v1685_v52, %v1619_v28  ;;  %v1295_v3 = vmul.f32 %v4236_v23, %v4558_v6  ;;  %v1424_v42 = vadd.f32 %v1392_v39, %v1326_v49  ;;  %v1460_v49 = vld [vmem:[#allocation2 + $0x22f] sm:$0xff] }
 0x17f   :  { %806 = vst [vmem:[#allocation2 + $0x210] sm:$0xff] %v4596_v36  ;;  %v1490_v26 = vmul.f32 %v4277_v29, %v1457_v56  ;;  %v1197_v40 = vmul.f32 %v4188_v53, %v1457_v56  ;;  %v234_v53 = vld [vmem:[%s5387_s0 + $0x1f8] sm:$0xff]  ;;  %v1132_v37 = vadd.f32 %v1100_v33, %v1034_v32  ;;  %v595_v19 = vpop.f32.mrf.mxu3  ;;  %v1589_v6 = vmul.f32 %v4245_v47, %v4596_v36  ;;  %v4701_v32 = vld [vmem:[%s5390_s3] ss:$0 sm:$0xff]  ;;  %v4723_v33 = vld [vmem:[%s5390_s3 + $0x3] ss:$0 sm:$0xff] }
 0x180   :  { %v550_v45 = vpop.f32.mrf.mxu0  ;;  %3220 = vmatmul.msk.f32.gmra.mxu3 %vm240_vm1, %v234_v53  ;;  %v4662_v16 = vadd.f32 %v4301_v0, %v1717_v61  ;;  %821 = vst [vmem:[#allocation2 + $0x348] sm:$0xff] %v756_v59  ;;  %v1296_v28 = vmul.f32 %v4236_v23, %v4596_v36  ;;  %v596_v57 = vadd.f32 %v4581_v20, %v595_v19  ;;  %v1459_v36 = vld [vmem:[#allocation2 + $0x227] sm:$0xff] }
 0x181   :  { %v551_v13 = vadd.f32 %v4581_v20, %v550_v45  ;;  %v1522_v24 = vadd.f32 %v1490_v26, %v1423_v58  ;;  %v1229_v17 = vadd.f32 %v1197_v40, %v1131_v38  ;;  %v1886_v54 = vpop.f32.mrf.mxu1  ;;  %2998 = vmatpush.msra.mxu2 %v2981_v8  ;;  %1933 = vmatmul.f32.gmra.mxu1 %v1815_v4  ;;  %v3295_v58 = vld [vmem:[#allocation2] sm:$0xff]  ;;  %v1816_v38 = vmin.f32 %v1784_v22, 6.0  ;;  %v2978_v40 = vld [vmem:[%s5392_s5 + $0x30] sm:$0xff]  ;;  %v3296_v59 = vld [vmem:[%s5390_s3 + $0x8] ss:$0 sm:$0xff] }
 0x182   :  { %v1887_v63 = vadd.f32 %v4334_v27, %v1886_v54  ;;  %v693_v62 = vmax.f32 %v596_v57, 0.0  ;;  %v1492_v26 = vmul.f32 %v4277_v29, %v1459_v36  ;;  %3244 = vmatpush.msra.mxu3 %v2981_v8  ;;  %v1493_v4 = vmul.f32 %v4277_v29, %v1460_v49  ;;  %v4734_v8 = vld [vmem:[%s5390_s3 + $0x4] ss:$0 sm:$0xff]  ;;  %v4790_v49 = vld [vmem:[%s5390_s3 + $0x8] ss:$0 sm:$0xff] }
 0x183   :  { %v678_v12 = vmax.f32 %v551_v13, 0.0  ;;  %v1620_v9 = vadd.f32 %v1588_v44, %v1522_v24  ;;  %v1327_v41 = vadd.f32 %v1295_v3, %v1229_v17  ;;  %v4710_v44 = vmul.f32 %v3295_v58, %v4686_v46 }
 0x184   :  { %1964 = vst [vmem:[#allocation3 + $0x48] sm:$0xff] %v1887_v63  ;;  %v757_v25 = vmin.f32 %v693_v62, 6.0  ;;  %v1689_v22 = vmul.f32 %v3296_v59, %v1656_v31  ;;  %v1688_v55 = vmul.f32 %v3296_v59, %v1655_v14  ;;  %v2022_v3 = vmul.f32 %v4701_v32, %v1989_v34  ;;  %v2579_v62 = vld [vmem:[#allocation2 + $0x287] sm:$0xff]  ;;  %v1990_v31 = vld [vmem:[#allocation2 + $0x24f] sm:$0xff] }
 0x185   :  { %v4635_v51 = vmin.f32 %v678_v12, 6.0  ;;  %v2186_v14 = vld [vmem:[#allocation2 + $0x251] sm:$0xff] }
 0x186   :  { %v1653_v35 = vld [vmem:[#allocation2 + $0x209] sm:$0xff]  ;;  %v1654_v7 = vld [vmem:[#allocation2 + $0x211] sm:$0xff]  ;;  %822 = vst [vmem:[#allocation2 + $0x350] sm:$0xff] %v757_v25 }
 0x187   :  { %807 = vst [vmem:[#allocation2 + $0x268] sm:$0xff] %v4635_v51  ;;  %v1686_v11 = vmul.f32 %v4261_v5, %v1653_v35  ;;  %v1458_v60 = vld [vmem:[#allocation2 + $0x20f] sm:$0xff]  ;;  %v1394_v23 = vmul.f32 %v4269_v18, %v1654_v7  ;;  %v1393_v56 = vmul.f32 %v4269_v18, %v1653_v35  ;;  %v1591_v18 = vmul.f32 %v3295_v58, %v4245_v47 }
 0x188   :  { %v553_v21 = vpop.f32.mrf.mxu0  ;;  %v1491_v2 = vmul.f32 %v4277_v29, %v1458_v60  ;;  %v1198_v45 = vmul.f32 %v3294_v43, %v1458_v60  ;;  %v1785_v47 = vmax.f32 %v4662_v16, 0.0  ;;  %v1687_v35 = vmul.f32 %v3296_v59, %v1654_v7  ;;  %v4718_v29 = vld [vmem:[%s5390_s3 + $0x2] ss:$0 sm:$0xff] }
 0x189   :  { %v554_v5 = vadd.f32 %v4581_v20, %v553_v21  ;;  %v1718_v48 = vadd.f32 %v1686_v11, %v1620_v9  ;;  %v1425_v24 = vadd.f32 %v1393_v56, %v1327_v41  ;;  %v2977_v9 = vld [vmem:[%s5392_s5 + $0x28] sm:$0xff]  ;;  %v598_v11 = vpop.f32.mrf.mxu3  ;;  %v1889_v16 = vpop.f32.mrf.mxu1  ;;  %v2152_v60 = vadd.f32 %v4710_v44, %v2022_v3  ;;  %1936 = vmatmul.f32.gmra.mxu1 %v1816_v38 }
 0x18a   :  { %v1523_v52 = vadd.f32 %v1491_v2, %v1424_v42  ;;  %v1230_v50 = vadd.f32 %v1198_v45, %v1132_v37  ;;  %v1890_v19 = vadd.f32 %v4334_v27, %v1889_v16  ;;  %v1817_v2 = vmin.f32 %v1785_v47, 6.0  ;;  %v2976_v27 = vld [vmem:[%s5392_s5 + $0x20] sm:$0xff]  ;;  %v2975_v45 = vld [vmem:[%s5392_s5 + $0x18] sm:$0xff] }
 0x18b   :  { %v679_v10 = vmax.f32 %v554_v5, 0.0  ;;  %v4679_v13 = vadd.f32 %v4301_v0, %v1718_v48  ;;  %v2980_v0 = vld [vmem:[%s5392_s5 + $0x40] sm:$0xff]  ;;  %v1524_v39 = vadd.f32 %v1492_v26, %v1425_v24  ;;  %v599_v5 = vadd.f32 %v4581_v20, %v598_v11  ;;  %v4776_v26 = vld [vmem:[#allocation2 + $0x288] sm:$0xff] }
 0x18c   :  { %2999 = vmatpush.msra.mxu2 %v2980_v0  ;;  %v1621_v12 = vadd.f32 %v1589_v6, %v1523_v52  ;;  %v1328_v61 = vadd.f32 %v1296_v28, %v1230_v50  ;;  %3245 = vmatpush.msra.mxu3 %v2980_v0  ;;  %v2218_v6 = vmul.f32 %v4718_v29, %v2185_v15  ;;  %v3297_v50 = vld [vmem:[%s5391_s4] ss:$0 sm:$0xff] }
 0x18d   :  { %v4688_v30 = vmin.f32 %v679_v10, 6.0  ;;  %v1786_v17 = vmax.f32 %v4679_v13, 0.0  ;;  %v1622_v48 = vadd.f32 %v1591_v18, %v1524_v39  ;;  %v694_v54 = vmax.f32 %v599_v5, 0.0  ;;  %1965 = vst [vmem:[#allocation3 + $0x50] sm:$0xff] %v1890_v19  ;;  %v4810_v11 = vld [vmem:[%s5393_s6] ss:$0 sm:$0xff] }
 0x18e   :  { %3000 = vmatpush.msra.mxu2 %v2979_v1  ;;  %v1426_v53 = vadd.f32 %v1394_v23, %v1328_v61  ;;  %v2284_v21 = vld [vmem:[#allocation2 + $0x267] sm:$0xff]  ;;  %3246 = vmatpush.msra.mxu3 %v2979_v1  ;;  %v1719_v42 = vadd.f32 %v1687_v35, %v1621_v12  ;;  %v2250_v41 = vadd.f32 %v2218_v6, %v2152_v60  ;;  %v2974_v23 = vld [vmem:[%s5392_s5 + $0x10] sm:$0xff] }
 0x18f   :  { %808 = vst [vmem:[#allocation2 + $0x270] sm:$0xff] %v4688_v30  ;;  %v2317_v7 = vmul.f32 %v4723_v33, %v2284_v21  ;;  %v1720_v57 = vadd.f32 %v1688_v55, %v1622_v48  ;;  %v4740_v43 = vmin.f32 %v1786_v17, 6.0  ;;  %v2024_v63 = vmul.f32 %v4701_v32, %v2284_v21  ;;  %v2973_v1 = vld [vmem:[%s5392_s5 + $0x8] sm:$0xff]  ;;  %v4785_v61 = vld [vmem:[%s5390_s3 + $0x7] ss:$0 sm:$0xff] }
 0x190   :  { %3001 = vmatpush.msra.mxu2 %v2978_v40  ;;  %v1525_v37 = vadd.f32 %v1493_v4, %v1426_v53  ;;  %3247 = vmatpush.msra.mxu3 %v2978_v40  ;;  %v758_v13 = vmin.f32 %v694_v54, 6.0  ;;  %v2415_v36 = vmul.f32 %v4734_v8, %v4635_v51  ;;  %v2122_v52 = vmul.f32 %v4686_v46, %v4635_v51  ;;  %v4774_v51 = vld [vmem:[%s5390_s3 + $0x6] ss:$0 sm:$0xff]  ;;  %v4817_v60 = vld [vmem:[#allocation2 + $0x28f] sm:$0xff] }
 0x191   :  { %v4759_v56 = vadd.f32 %v3297_v50, %v1719_v42  ;;  %v4761_v0 = vadd.f32 %v3297_v50, %v1720_v57  ;;  %v2349_v58 = vadd.f32 %v2317_v7, %v2250_v41  ;;  %v4780_v25 = vmul.f32 %v4734_v8, %v4688_v30  ;;  %v601_v47 = vpop.f32.mrf.mxu3  ;;  %v1892_v39 = vpop.f32.mrf.mxu1  ;;  %1939 = vmatmul.f32.gmra.mxu1 %v1817_v2  ;;  %v2972_v6 = vld [vmem:[%s5392_s5] sm:$0xff] }
 0x192   :  { %v1623_v28 = vadd.f32 %v1591_v18, %v1525_v37  ;;  %3002 = vmatpush.msra.mxu2 %v2977_v9  ;;  %3248 = vmatpush.msra.mxu3 %v2977_v9  ;;  %v4769_v18 = vld [vmem:[%s5390_s3 + $0x5] ss:$0 sm:$0xff]  ;;  %823 = vst [vmem:[#allocation2 + $0x368] sm:$0xff] %v758_v13  ;;  %v2154_v24 = vadd.f32 %v2122_v52, %v2024_v63  ;;  %v4805_v9 = vld [vmem:[#allocation2 + $0x289] sm:$0xff] }
 0x193   :  { %v2123_v38 = vmul.f32 %v4686_v46, %v4688_v30  ;;  %v2023_v4 = vmul.f32 %v4701_v32, %v1990_v31  ;;  %v2319_v59 = vmul.f32 %v4723_v33, %v2579_v62  ;;  %v4798_v35 = vmul.f32 %v4734_v8, %v4776_v26 }
 0x194   :  { %v1721_v10 = vadd.f32 %v1689_v22, %v1623_v28  ;;  %3003 = vmatpush.msra.mxu2 %v2976_v27  ;;  %3249 = vmatpush.msra.mxu3 %v2976_v27  ;;  %v4801_v53 = vmul.f32 %v4701_v32, %v2579_v62  ;;  %v602_v30 = vadd.f32 %v4581_v20, %v601_v47 }
 0x195   :  { %v2447_v17 = vadd.f32 %v2415_v36, %v2349_v58  ;;  %v1893_v55 = vadd.f32 %v4810_v11, %v1892_v39  ;;  %v2612_v3 = vmul.f32 %v4774_v51, %v2579_v62  ;;  %v2153_v21 = vadd.f32 %v4710_v44, %v2023_v4  ;;  %v4838_v36 = vld [vmem:[#allocation2 + $0x290] sm:$0xff] }
 0x196   :  { %v1757_v12 = vadd.f32 %v3297_v50, %v1721_v10  ;;  %3004 = vmatpush.msra.mxu2 %v2975_v45  ;;  %v2480_v40 = vld [vmem:[#allocation2 + $0x269] sm:$0xff]  ;;  %3250 = vmatpush.msra.mxu3 %v2975_v45  ;;  %v2219_v16 = vmul.f32 %v4718_v29, %v2186_v14  ;;  %v2481_v42 = vld [vmem:[#allocation2 + $0x271] sm:$0xff]  ;;  %v695_v5 = vmax.f32 %v602_v30, 0.0  ;;  %v2710_v44 = vmul.f32 %v4785_v61, %v4776_v26 }
 0x197   :  { %v2285_v34 = vld [vmem:[#allocation2 + $0x26f] sm:$0xff]  ;;  %v2513_v22 = vmul.f32 %v4769_v18, %v2480_v40  ;;  %1966 = vst [vmem:[#allocation3 + $0x58] sm:$0xff] %v1893_v55  ;;  %v2808_v7 = vmul.f32 %v4790_v49, %v4805_v9  ;;  %v2514_v27 = vmul.f32 %v4769_v18, %v2481_v42  ;;  %v2220_v2 = vmul.f32 %v4718_v29, %v2480_v40 }
 0x198   :  { %v1789_v15 = vmax.f32 %v1757_v12, 0.0  ;;  %3005 = vmatpush.msra.mxu2 %v2974_v23  ;;  %3251 = vmatpush.msra.mxu3 %v2974_v23  ;;  %v2318_v19 = vmul.f32 %v4723_v33, %v2285_v34  ;;  %v2251_v28 = vadd.f32 %v2219_v16, %v2153_v21  ;;  %v759_v54 = vmin.f32 %v695_v5, 6.0  ;;  %v4836_v23 = vld [vmem:[%s5391_s4] ss:$0 sm:$0xff]  ;;  %v4840_v62 = vld [vmem:[#allocation2 + $0x291] sm:$0xff] }
 0x199   :  { %v2545_v48 = vadd.f32 %v2513_v22, %v2447_v17  ;;  %v2613_v41 = vmul.f32 %v4774_v51, %v4817_v60  ;;  %v2515_v63 = vmul.f32 %v4769_v18, %v4805_v9  ;;  %v2025_v10 = vmul.f32 %v4701_v32, %v2285_v34  ;;  %v604_v58 = vpop.f32.mrf.mxu3  ;;  %v1895_v4 = vpop.f32.mrf.mxu1  ;;  %v4854_v17 = vld [vmem:[#allocation2 + $0x2a7] sm:$0xff]  ;;  %1942 = vmatmul.f32.gmra.mxu1 %v4740_v43 }
 0x19a   :  { %v1821_v37 = vmin.f32 %v1789_v15, 6.0  ;;  %3006 = vmatpush.msra.mxu2 %v2973_v1  ;;  %3252 = vmatpush.msra.mxu3 %v2973_v1  ;;  %v2350_v45 = vadd.f32 %v2318_v19, %v2251_v28  ;;  %824 = vst [vmem:[#allocation2 + $0x370] sm:$0xff] %v759_v54  ;;  %v2252_v52 = vadd.f32 %v2220_v2, %v2154_v24  ;;  %v1787_v21 = vmax.f32 %v4759_v56, 0.0  ;;  %v4879_v2 = vld [vmem:[#allocation2 + $0x2b0] sm:$0xff] }
 0x19b   :  { %v2644_v57 = vadd.f32 %v2612_v3, %v2545_v48  ;;  %v2221_v50 = vmul.f32 %v4718_v29, %v2481_v42  ;;  %v2320_v1 = vmul.f32 %v4723_v33, %v4817_v60  ;;  %v2711_v31 = vmul.f32 %v4785_v61, %v4838_v36  ;;  %v4864_v42 = vld [vmem:[#allocation2 + $0x2a8] sm:$0xff] }
 0x19c   :  { %1951 = vmatmul.f32.vlgmr.msrb.gmra.mxu3 %v1821_v37  ;;  %3007 = vmatpush.msra.mxu2 %v2972_v6  ;;  %v2448_v12 = vadd.f32 %v4780_v25, %v2350_v45  ;;  %v2809_v47 = vmul.f32 %v4790_v49, %v4840_v62  ;;  %v2155_v40 = vadd.f32 %v2123_v38, %v2025_v10 }
 0x19d   :  { %3253 = vmatpush.msra.mxu3 %v2972_v6  ;;  %v2742_v13 = vadd.f32 %v2710_v44, %v2644_v57  ;;  %v605_v34 = vadd.f32 %v4581_v20, %v604_v58  ;;  %v2351_v24 = vadd.f32 %v2319_v59, %v2252_v52  ;;  %v2418_v39 = vmul.f32 %v4734_v8, %v4838_v36  ;;  %v4870_v6 = vld [vmem:[#allocation2 + $0x2af] sm:$0xff] }
 0x19e   :  { %v1896_v15 = vadd.f32 %v4810_v11, %v1895_v4  ;;  %v2546_v30 = vadd.f32 %v2514_v27, %v2448_v12  ;;  %v2253_v25 = vadd.f32 %v2221_v50, %v2155_v40  ;;  %v2124_v22 = vmul.f32 %v4686_v46, %v4776_v26 }
 0x19f   :  { %v2840_v14 = vadd.f32 %v2808_v7, %v2742_v13  ;;  %v696_v38 = vmax.f32 %v605_v34, 0.0  ;;  %v2449_v3 = vadd.f32 %v4798_v35, %v2351_v24  ;;  %v2614_v59 = vmul.f32 %v4774_v51, %v4854_v17  ;;  %v4872_v7 = vld [vmem:[#allocation2 + $0x2a9] sm:$0xff]  ;;  %v2778_v34 = vld [vmem:[#allocation2 + $0x2b1] sm:$0xff] }
 0x1a0   :  { %1967 = vst [vmem:[#allocation3 + $0x60] sm:$0xff] %v1896_v15  ;;  %v2645_v16 = vadd.f32 %v2613_v41, %v2546_v30  ;;  %v2352_v37 = vadd.f32 %v2320_v1, %v2253_v25  ;;  %v2516_v26 = vmul.f32 %v4769_v18, %v4840_v62  ;;  %v2712_v35 = vmul.f32 %v4785_v61, %v4864_v42  ;;  %v4894_v15 = vld [vmem:[#allocation2 + $0x2c7] sm:$0xff] }
 0x1a1   :  { %v2876_v55 = vadd.f32 %v4836_v23, %v2840_v14  ;;  %v760_v48 = vmin.f32 %v696_v38, 6.0  ;;  %v2547_v19 = vadd.f32 %v2515_v63, %v2449_v3  ;;  %v2615_v56 = vmul.f32 %v4774_v51, %v4870_v6  ;;  %v607_v63 = vpop.f32.mrf.mxu3  ;;  %v1898_v52 = vpop.f32.mrf.mxu1 }
 0x1a2   :  { %v2743_v44 = vadd.f32 %v2711_v31, %v2645_v16  ;;  %v2450_v43 = vadd.f32 %v2418_v39, %v2352_v37  ;;  %v2156_v28 = vadd.f32 %v2124_v22, %v4801_v53  ;;  %v2810_v27 = vmul.f32 %v4790_v49, %v4872_v7 }
 0x1a3   :  { %v2908_v5 = vmax.f32 %v2876_v55, 0.0  ;;  %825 = vst [vmem:[#allocation2 + $0x388] sm:$0xff] %v760_v48  ;;  %v2646_v57 = vadd.f32 %v2614_v59, %v2547_v19  ;;  %v2222_v45 = vmul.f32 %v4718_v29, %v4805_v9  ;;  %v2713_v13 = vmul.f32 %v4785_v61, %v4879_v2 }
 0x1a4   :  { %v2841_v41 = vadd.f32 %v2809_v47, %v2743_v44  ;;  %v2548_v10 = vadd.f32 %v2516_v26, %v2450_v43  ;;  %v2321_v53 = vmul.f32 %v4723_v33, %v4854_v17  ;;  %v608_v50 = vadd.f32 %v4581_v20, %v607_v63 }
 0x1a5   :  { %v2940_v54 = vmin.f32 %v2908_v5, 6.0  ;;  %v2744_v1 = vadd.f32 %v2712_v35, %v2646_v57  ;;  %v2254_v58 = vadd.f32 %v2222_v45, %v2156_v28  ;;  %v2419_v12 = vmul.f32 %v4734_v8, %v4864_v42 }
 0x1a6   :  { %v1899_v9 = vadd.f32 %v4810_v11, %v1898_v52  ;;  %v1819_v31 = vmin.f32 %v1787_v21, 6.0  ;;  %v2877_v47 = vadd.f32 %v4836_v23, %v2841_v41  ;;  %v2647_v40 = vadd.f32 %v2615_v56, %v2548_v10  ;;  %v4900_v21 = vld [vmem:[#allocation2 + $0x2c8] sm:$0xff] }
 0x1a7   :  { %3008 = vmatmul.f32.vlgmr.msra.gmra.mxu2 %v2940_v54  ;;  %v697_v4 = vmax.f32 %v608_v50, 0.0  ;;  %v2842_v14 = vadd.f32 %v2810_v27, %v2744_v1  ;;  %v2353_v24 = vadd.f32 %v2321_v53, %v2254_v58  ;;  %v2517_v39 = vmul.f32 %v4769_v18, %v4872_v7  ;;  %v2779_v54 = vld [vmem:[#allocation2 + $0x2c9] sm:$0xff] }
 0x1a8   :  { %1968 = vst [vmem:[#allocation3 + $0x68] sm:$0xff] %v1899_v9  ;;  %1945 = vmatmul.f32.gmra.mxu1 %v1819_v31  ;;  %v1788_v30 = vmax.f32 %v4761_v0, 0.0  ;;  %v2909_v25 = vmax.f32 %v2877_v47, 0.0  ;;  %v2811_v22 = vmul.f32 %v4790_v49, %v2778_v34  ;;  %v2027_v55 = vmul.f32 %v4701_v32, %v4817_v60  ;;  %v4920_v52 = vld [vmem:[#allocation2 + $0x2cf] sm:$0xff] }
 0x1a9   :  { %v761_v38 = vmin.f32 %v697_v4, 6.0  ;;  %v2745_v3 = vadd.f32 %v2713_v13, %v2647_v40  ;;  %v2451_v59 = vadd.f32 %v2419_v12, %v2353_v24  ;;  %v2125_v16 = vmul.f32 %v4686_v46, %v4838_v36  ;;  %v610_v44 = vpop.f32.mrf.mxu3  ;;  %v1901_v43 = vpop.f32.mrf.mxu1 }
 0x1aa   :  { %v2878_v37 = vadd.f32 %v4836_v23, %v2842_v14  ;;  %v2616_v26 = vmul.f32 %v4774_v51, %v4894_v15  ;;  %v2223_v0 = vmul.f32 %v4718_v29, %v4840_v62  ;;  %v2941_v5 = vmin.f32 %v2909_v25, 6.0  ;;  %v2682_v14 = vld [vmem:[#allocation2 + $0x2d0] sm:$0xff] }
 0x1ab   :  { %826 = vst [vmem:[#allocation2 + $0x390] sm:$0xff] %v761_v38  ;;  %v2549_v48 = vadd.f32 %v2517_v39, %v2451_v59  ;;  %v2157_v60 = vadd.f32 %v2125_v16, %v2027_v55  ;;  %v2322_v19 = vmul.f32 %v4723_v33, %v4870_v6  ;;  %v1820_v35 = vmin.f32 %v1788_v30, 6.0 }
 0x1ac   :  { %v2714_v36 = vmul.f32 %v4785_v61, %v4900_v21  ;;  %v611_v56 = vadd.f32 %v4581_v20, %v610_v44  ;;  %v2843_v28 = vadd.f32 %v2811_v22, %v2745_v3  ;;  %v2420_v62 = vmul.f32 %v4734_v8, %v4879_v2 }
 0x1ad   :  { %v2255_v57 = vadd.f32 %v2223_v0, %v2157_v60  ;;  %v1902_v27 = vadd.f32 %v4810_v11, %v1901_v43  ;;  %v2910_v45 = vmax.f32 %v2878_v37, 0.0  ;;  %v2648_v41 = vadd.f32 %v2616_v26, %v2549_v48  ;;  %v4942_v26 = vld [vmem:[#allocation2 + $0x2e7] sm:$0xff] }
 0x1ae   :  { %v2028_v63 = vmul.f32 %v4701_v32, %v4854_v17  ;;  %v698_v10 = vmax.f32 %v611_v56, 0.0  ;;  %v2518_v53 = vmul.f32 %v4769_v18, %v2778_v34  ;;  %v2126_v50 = vmul.f32 %v4686_v46, %v4864_v42 }
 0x1af   :  { %3011 = vmatmul.f32.gmra.mxu2 %v2941_v5  ;;  %v2354_v13 = vadd.f32 %v2322_v19, %v2255_v57  ;;  %1969 = vst [vmem:[#allocation3 + $0x70] sm:$0xff] %v1902_v27  ;;  %v2812_v1 = vmul.f32 %v4790_v49, %v2779_v54  ;;  %v2224_v58 = vmul.f32 %v4718_v29, %v4872_v7  ;;  %v2942_v47 = vmin.f32 %v2910_v45, 6.0  ;;  %v2780_v19 = vld [vmem:[#allocation2 + $0x2d1] sm:$0xff]  ;;  %v2683_v57 = vld [vmem:[#allocation2 + $0x2e8] sm:$0xff] }
 0x1b0   :  { %1948 = vmatmul.f32.gmra.mxu1 %v1820_v35  ;;  %v762_v12 = vmin.f32 %v698_v10, 6.0  ;;  %v2158_v31 = vadd.f32 %v2126_v50, %v2028_v63  ;;  %v2323_v17 = vmul.f32 %v4723_v33, %v4894_v15  ;;  %v2879_v40 = vadd.f32 %v4836_v23, %v2843_v28 }
 0x1b1   :  { %v2452_v9 = vadd.f32 %v2420_v62, %v2354_v13  ;;  %v2746_v4 = vadd.f32 %v2714_v36, %v2648_v41  ;;  %v2617_v42 = vmul.f32 %v4774_v51, %v4920_v52  ;;  %v2421_v7 = vmul.f32 %v4734_v8, %v4900_v21  ;;  %v613_v25 = vpop.f32.mrf.mxu3  ;;  %v1904_v38 = vpop.f32.mrf.mxu1 }
 0x1b2   :  { %827 = vst [vmem:[#allocation2 + $0x3a8] sm:$0xff] %v762_v12  ;;  %v2256_v39 = vadd.f32 %v2224_v58, %v2158_v31  ;;  %v2029_v30 = vmul.f32 %v4701_v32, %v4870_v6  ;;  %v2127_v22 = vmul.f32 %v4686_v46, %v4879_v2  ;;  %v2225_v55 = vmul.f32 %v4718_v29, %v2778_v34  ;;  %v2781_v31 = vld [vmem:[#allocation2 + $0x2e9] sm:$0xff] }
 0x1b3   :  { %v2550_v24 = vadd.f32 %v2518_v53, %v2452_v9  ;;  %v614_v3 = vadd.f32 %v4581_v20, %v613_v25  ;;  %v2715_v59 = vmul.f32 %v4785_v61, %v2682_v14  ;;  %v2519_v37 = vmul.f32 %v4769_v18, %v2779_v54 }
 0x1b4   :  { %v2355_v16 = vadd.f32 %v2323_v17, %v2256_v39  ;;  %v1905_v0 = vadd.f32 %v4810_v11, %v1904_v38  ;;  %v2911_v6 = vmax.f32 %v2879_v40, 0.0  ;;  %v2159_v5 = vadd.f32 %v2127_v22, %v2029_v30  ;;  %v4963_v40 = vld [vmem:[#allocation2 + $0x2ef] sm:$0xff] }
 0x1b5   :  { %v2324_v2 = vmul.f32 %v4723_v33, %v4920_v52  ;;  %v699_v48 = vmax.f32 %v614_v3, 0.0  ;;  %v2844_v34 = vadd.f32 %v2812_v1, %v2746_v4  ;;  %v2649_v60 = vadd.f32 %v2617_v42, %v2550_v24 }
 0x1b6   :  { %v2453_v35 = vadd.f32 %v2421_v7, %v2355_v16  ;;  %1970 = vst [vmem:[#allocation3 + $0x78] sm:$0xff] %v1905_v0  ;;  %v2618_v44 = vmul.f32 %v4774_v51, %v4942_v26  ;;  %v2257_v36 = vadd.f32 %v2225_v55, %v2159_v5  ;;  %v2030_v43 = vmul.f32 %v4701_v32, %v4894_v15 }
 0x1b7   :  { %3014 = vmatmul.f32.gmra.mxu2 %v2942_v47  ;;  %v763_v56 = vmin.f32 %v699_v48, 6.0  ;;  %v2422_v62 = vmul.f32 %v4734_v8, %v2682_v14  ;;  %v2128_v27 = vmul.f32 %v4686_v46, %v4900_v21  ;;  %v2813_v45 = vmul.f32 %v4790_v49, %v2780_v19 }
 0x1b8   :  { %v2551_v28 = vadd.f32 %v2519_v37, %v2453_v35  ;;  %v2356_v41 = vadd.f32 %v2324_v2, %v2257_v36  ;;  %v2226_v63 = vmul.f32 %v4718_v29, %v2779_v54  ;;  %v2943_v10 = vmin.f32 %v2911_v6, 6.0 }
 0x1b9   :  { %828 = vst [vmem:[#allocation2 + $0x3b0] sm:$0xff] %v763_v56  ;;  %v2880_v13 = vadd.f32 %v4836_v23, %v2844_v34  ;;  %v2747_v53 = vadd.f32 %v2715_v59, %v2649_v60  ;;  %v2160_v50 = vadd.f32 %v2128_v27, %v2030_v43  ;;  %v616_v15 = vpop.f32.mrf.mxu3  ;;  %v2716_v1 = vmul.f32 %v4785_v61, %v2683_v57  ;;  %v1907_v12 = vpop.f32.mrf.mxu1  ;;  %v2684_v59 = vld [vmem:[#allocation2 + $0x2f0] sm:$0xff] }
 0x1ba   :  { %v2520_v58 = vmul.f32 %v4769_v18, %v2780_v19  ;;  %v617_v21 = vadd.f32 %v4581_v20, %v616_v15  ;;  %v2650_v9 = vadd.f32 %v2618_v44, %v2551_v28  ;;  %v2454_v17 = vadd.f32 %v2422_v62, %v2356_v41  ;;  %v2782_v43 = vld [vmem:[#allocation2 + $0x2f1] sm:$0xff]  ;;  %v2685_v15 = vld [vmem:[#allocation2 + $0x308] sm:$0xff] }
 0x1bb   :  { %v2325_v54 = vmul.f32 %v4723_v33, %v4942_v26  ;;  %v1908_v47 = vadd.f32 %v4810_v11, %v1907_v12  ;;  %v2258_v4 = vadd.f32 %v2226_v63, %v2160_v50  ;;  %v2031_v42 = vmul.f32 %v4701_v32, %v4920_v52 }
 0x1bc   :  { %v2129_v24 = vmul.f32 %v4686_v46, %v2682_v14  ;;  %v2912_v39 = vmax.f32 %v2880_v13, 0.0  ;;  %v700_v7 = vmax.f32 %v617_v21, 0.0  ;;  %v2845_v30 = vadd.f32 %v2813_v45, %v2747_v53  ;;  %v2587_v45 = vld [vmem:[#allocation2 + $0x307] sm:$0xff] }
 0x1bd   :  { %1971 = vst [vmem:[#allocation3 + $0x80] sm:$0xff] %v1908_v47  ;;  %v2814_v25 = vmul.f32 %v4790_v49, %v2781_v31  ;;  %v2748_v55 = vadd.f32 %v2716_v1, %v2650_v9  ;;  %v2552_v38 = vadd.f32 %v2520_v58, %v2454_v17  ;;  %v2619_v3 = vmul.f32 %v4774_v51, %v4963_v40 }
 0x1be   :  { %v764_v22 = vmin.f32 %v700_v7, 6.0  ;;  %v2357_v16 = vadd.f32 %v2325_v54, %v2258_v4  ;;  %v2423_v37 = vmul.f32 %v4734_v8, %v2683_v57  ;;  %v2161_v0 = vadd.f32 %v2129_v24, %v2031_v42 }
 0x1bf   :  { %3017 = vmatmul.f32.gmra.mxu2 %v2943_v10  ;;  %v2227_v52 = vmul.f32 %v4718_v29, %v2780_v19  ;;  %v2944_v14 = vmin.f32 %v2912_v39, 6.0  ;;  %v2881_v6 = vadd.f32 %v4836_v23, %v2845_v30  ;;  %v2717_v2 = vmul.f32 %v4785_v61, %v2684_v59 }
 0x1c0   :  { %829 = vst [vmem:[#allocation2 + $0x3c8] sm:$0xff] %v764_v22  ;;  %v2846_v60 = vadd.f32 %v2814_v25, %v2748_v55  ;;  %v2651_v35 = vadd.f32 %v2619_v3, %v2552_v38  ;;  %v2521_v44 = vmul.f32 %v4769_v18, %v2781_v31  ;;  %v2455_v56 = vadd.f32 %v2423_v37, %v2357_v16  ;;  %v2783_v25 = vld [vmem:[#allocation2 + $0x309] sm:$0xff] }
 0x1c1   :  { %v619_v5 = vpop.f32.mrf.mxu3  ;;  %v1910_v48 = vpop.f32.mrf.mxu1  ;;  %v2259_v19 = vadd.f32 %v2227_v52, %v2161_v0  ;;  %v2326_v28 = vmul.f32 %v4723_v33, %v4963_v40  ;;  %v2913_v62 = vmax.f32 %v2881_v6, 0.0  ;;  %v2032_v41 = vmul.f32 %v4701_v32, %v4942_v26 }
 0x1c2   :  { %v620_v34 = vadd.f32 %v4581_v20, %v619_v5  ;;  %v1911_v36 = vadd.f32 %v4810_v11, %v1910_v48  ;;  %v2130_v63 = vmul.f32 %v4686_v46, %v2683_v57  ;;  %v2882_v13 = vadd.f32 %v4836_v23, %v2846_v60 }
 0x1c3   :  { %v2749_v53 = vadd.f32 %v2717_v2, %v2651_v35  ;;  %v2815_v50 = vmul.f32 %v4790_v49, %v2782_v43  ;;  %v2553_v1 = vadd.f32 %v2521_v44, %v2455_v56  ;;  %v2620_v58 = vmul.f32 %v4774_v51, %v2587_v45 }
 0x1c4   :  { %v701_v27 = vmax.f32 %v620_v34, 0.0  ;;  %1972 = vst [vmem:[#allocation3 + $0x88] sm:$0xff] %v1911_v36  ;;  %v2358_v12 = vadd.f32 %v2326_v28, %v2259_v19  ;;  %v2424_v21 = vmul.f32 %v4734_v8, %v2684_v59  ;;  %v2945_v9 = vmin.f32 %v2913_v62, 6.0  ;;  %v5005_v19 = vld [vmem:[%s5389_s2] ss:$0 sm:$0xff]  ;;  %s3341_s2 = smov 8  }
 0x1c5   :  { %v2162_v17 = vadd.f32 %v2130_v63, %v2032_v41  ;;  %v2228_v26 = vmul.f32 %v4718_v29, %v2781_v31  ;;  %v2718_v54 = vmul.f32 %v4785_v61, %v2685_v15  ;;  %v2914_v4 = vmax.f32 %v2882_v13, 0.0  ;;  %v2588_v31 = vld [vmem:[#allocation2 + $0x30f] sm:$0xff] }
 0x1c6   :  { %v765_v10 = vmin.f32 %v701_v27, 6.0  ;;  %v2847_v24 = vadd.f32 %v2815_v50, %v2749_v53  ;;  %v2522_v39 = vmul.f32 %v4769_v18, %v2782_v43  ;;  %v2652_v30 = vadd.f32 %v2620_v58, %v2553_v1  ;;  %v2784_v53 = vld [vmem:[#allocation2 + $0x311] sm:$0xff]  ;;  %v2589_v1 = vld [vmem:[#allocation2 + $0x327] sm:$0xff] }
 0x1c7   :  { %3020 = vmatmul.f32.gmra.mxu2 %v2944_v14  ;;  %v2456_v22 = vadd.f32 %v2424_v21, %v2358_v12  ;;  %v2327_v55 = vmul.f32 %v4723_v33, %v2587_v45  ;;  %v2260_v3 = vadd.f32 %v2228_v26, %v2162_v17  ;;  %v2033_v16 = vmul.f32 %v4701_v32, %v4963_v40  ;;  %v2686_v14 = vld [vmem:[#allocation2 + $0x310] sm:$0xff] }
 0x1c8   :  { %830 = vst [vmem:[#allocation2 + $0x3d0] sm:$0xff] %v765_v10  ;;  %v2131_v37 = vmul.f32 %v4686_v46, %v2684_v59  ;;  %v2883_v0 = vadd.f32 %v4836_v23, %v2847_v24  ;;  %v2816_v52 = vmul.f32 %v4790_v49, %v2783_v25  ;;  %v2946_v6 = vmin.f32 %v2914_v4, 6.0  ;;  %v2687_v4 = vld [vmem:[#allocation2 + $0x328] sm:$0xff] }
 0x1c9   :  { %v622_v57 = vpop.f32.mrf.mxu3  ;;  %v1913_v47 = vpop.f32.mrf.mxu1  ;;  %v2750_v5 = vadd.f32 %v2718_v54, %v2652_v30  ;;  %v2554_v2 = vadd.f32 %v2522_v39, %v2456_v22  ;;  %v2621_v48 = vmul.f32 %v4774_v51, %v2588_v31  ;;  %v2359_v34 = vadd.f32 %v2327_v55, %v2260_v3 }
 0x1ca   :  { %v623_v42 = vadd.f32 %v4581_v20, %v622_v57  ;;  %v1914_v7 = vadd.f32 %v4810_v11, %v1913_v47  ;;  %v2425_v60 = vmul.f32 %v4734_v8, %v2685_v15  ;;  %v2163_v35 = vadd.f32 %v2131_v37, %v2033_v16 }
 0x1cb   :  { %v2229_v40 = vmul.f32 %v4718_v29, %v2782_v43  ;;  %v2719_v44 = vmul.f32 %v4785_v61, %v2686_v14  ;;  %v2915_v56 = vmax.f32 %v2883_v0, 0.0  ;;  %v2034_v62 = vmul.f32 %v4701_v32, %v2587_v45 }
 0x1cc   :  { %v702_v38 = vmax.f32 %v623_v42, 0.0  ;;  %1973 = vst [vmem:[#allocation3 + $0x90] sm:$0xff] %v1914_v7  ;;  %v2132_v27 = vmul.f32 %v4686_v46, %v2685_v15  ;;  %v2848_v43 = vadd.f32 %v2816_v52, %v2750_v5  ;;  %v2653_v63 = vadd.f32 %v2621_v48, %v2554_v2  ;;  %v2590_v5 = vld [vmem:[#allocation2 + $0x32f] sm:$0xff] }
 0x1cd   :  { %v2523_v10 = vmul.f32 %v4769_v18, %v2783_v25  ;;  %v2457_v50 = vadd.f32 %v2425_v60, %v2359_v34  ;;  %v2261_v58 = vadd.f32 %v2229_v40, %v2163_v35  ;;  %v2328_v12 = vmul.f32 %v4723_v33, %v2588_v31 }
 0x1ce   :  { %v766_v20 = vmin.f32 %v702_v38, 6.0  ;;  %v2230_v45 = vmul.f32 %v4718_v29, %v2783_v25  ;;  %v2947_v17 = vmin.f32 %v2915_v56, 6.0  ;;  %v2884_v15 = vadd.f32 %v4836_v23, %v2848_v43 }
 0x1cf   :  { %3023 = vmatmul.f32.gmra.mxu2 %v2945_v9  ;;  %v2164_v9 = vadd.f32 %v2132_v27, %v2034_v62  ;;  %v2817_v26 = vmul.f32 %v4790_v49, %v2784_v53  ;;  %v2622_v57 = vmul.f32 %v4774_v51, %v2589_v1  ;;  %v2751_v54 = vadd.f32 %v2719_v44, %v2653_v63  ;;  %v2688_v62 = vld [vmem:[#allocation2 + $0x330] sm:$0xff] }
 0x1d0   :  { %831 = vst [vmem:[#allocation2 + $0x3e8] sm:$0xff] %v766_v20  ;;  %v2555_v47 = vadd.f32 %v2523_v10, %v2457_v50  ;;  %v2360_v42 = vadd.f32 %v2328_v12, %v2261_v58  ;;  %v2426_v24 = vmul.f32 %v4734_v8, %v2686_v14  ;;  %v2035_v7 = vmul.f32 %v4701_v32, %v2588_v31  ;;  %v5035_v12 = vld [vmem:[#allocation2 + $0x347] sm:$0xff] }
 0x1d1   :  { %v625_v59 = vpop.f32.mrf.mxu3  ;;  %v1916_v36 = vpop.f32.mrf.mxu1  ;;  %v2133_v30 = vmul.f32 %v4686_v46, %v2686_v14  ;;  %v2262_v55 = vadd.f32 %v2230_v45, %v2164_v9  ;;  %v2329_v38 = vmul.f32 %v4723_v33, %v2589_v1  ;;  %v2916_v16 = vmax.f32 %v2884_v15, 0.0  ;;  %v2785_v14 = vld [vmem:[#allocation2 + $0x329] sm:$0xff] }
 0x1d2   :  { %v626_v28 = vadd.f32 %v5005_v19, %v625_v59  ;;  %v1917_v41 = vadd.f32 %v4810_v11, %v1916_v36  ;;  %v2720_v37 = vmul.f32 %v4785_v61, %v2687_v4  ;;  %v2524_v20 = vmul.f32 %v4769_v18, %v2784_v53 }
 0x1d3   :  { %v2849_v52 = vadd.f32 %v2817_v26, %v2751_v54  ;;  %v2458_v31 = vadd.f32 %v2426_v24, %v2360_v42  ;;  %v2165_v2 = vadd.f32 %v2133_v30, %v2035_v7  ;;  %v2231_v48 = vmul.f32 %v4718_v29, %v2784_v53  ;;  %v2689_v7 = vld [vmem:[#allocation2 + $0x348] sm:$0xff] }
 0x1d4   :  { %v703_v13 = vmax.f32 %v626_v28, 0.0  ;;  %1974 = vst [vmem:[#allocation3 + $0x98] sm:$0xff] %v1917_v41  ;;  %v2361_v60 = vadd.f32 %v2329_v38, %v2262_v55  ;;  %v2427_v35 = vmul.f32 %v4734_v8, %v2687_v4  ;;  %v2948_v40 = vmin.f32 %v2916_v16, 6.0 }
 0x1d5   :  { %v2623_v59 = vmul.f32 %v4774_v51, %v2590_v5  ;;  %v2885_v44 = vadd.f32 %v4836_v23, %v2849_v52  ;;  %v2818_v56 = vmul.f32 %v4790_v49, %v2785_v14  ;;  %v2556_v28 = vadd.f32 %v2524_v20, %v2458_v31 }
 0x1d6   :  { %v767_v21 = vmin.f32 %v703_v13, 6.0  ;;  %v2263_v41 = vadd.f32 %v2231_v48, %v2165_v2  ;;  %v2330_v43 = vmul.f32 %v4723_v33, %v2590_v5  ;;  %v2459_v13 = vadd.f32 %v2427_v35, %v2361_v60  ;;  %v2787_v2 = vld [vmem:[#allocation2 + $0x349] sm:$0xff] }
 0x1d7   :  { %3026 = vmatmul.f32.gmra.mxu2 %v2946_v6  ;;  %v2654_v6 = vadd.f32 %v2622_v57, %v2555_v47  ;;  %v2525_v53 = vmul.f32 %v4769_v18, %v2785_v14  ;;  %v2721_v58 = vmul.f32 %v4785_v61, %v2688_v62  ;;  %v2134_v9 = vmul.f32 %v4686_v46, %v2687_v4  ;;  %v2786_v57 = vld [vmem:[#allocation2 + $0x331] sm:$0xff] }
 0x1d8   :  { %832 = vst [vmem:[#allocation2 + $0x3f0] sm:$0xff] %v767_v21  ;;  %v2036_v21 = vmul.f32 %v4701_v32, %v2589_v1  ;;  %v2917_v45 = vmax.f32 %v2885_v44, 0.0  ;;  %v2655_v26 = vadd.f32 %v2623_v59, %v2556_v28  ;;  %v2362_v54 = vadd.f32 %v2330_v43, %v2263_v41 }
 0x1d9   :  { %v628_v39 = vpop.f32.mrf.mxu3  ;;  %v1919_v25 = vpop.f32.mrf.mxu1  ;;  %v2752_v36 = vadd.f32 %v2720_v37, %v2654_v6  ;;  %v2428_v47 = vmul.f32 %v4734_v8, %v2688_v62  ;;  %v2557_v24 = vadd.f32 %v2525_v53, %v2459_v13  ;;  %v2232_v1 = vmul.f32 %v4718_v29, %v2785_v14  ;;  %v2592_v6 = vld [vmem:[#allocation2 + $0x34f] sm:$0xff] }
 0x1da   :  { %v629_v22 = vadd.f32 %v5005_v19, %v628_v39  ;;  %v1920_v3 = vadd.f32 %v4810_v11, %v1919_v25  ;;  %v2624_v39 = vmul.f32 %v4774_v51, %v5035_v12  ;;  %v2166_v30 = vadd.f32 %v2134_v9, %v2036_v21 }
 0x1db   :  { %v2850_v15 = vadd.f32 %v2818_v56, %v2752_v36  ;;  %v2949_v25 = vmin.f32 %v2917_v45, 6.0  ;;  %v2819_v55 = vmul.f32 %v4790_v49, %v2786_v57  ;;  %v2526_v16 = vmul.f32 %v4769_v18, %v2786_v57 }
 0x1dc   :  { %v704_v0 = vmax.f32 %v629_v22, 0.0  ;;  %1975 = vst [vmem:[#allocation3 + $0xa0] sm:$0xff] %v1920_v3  ;;  %v2753_v22 = vadd.f32 %v2721_v58, %v2655_v26  ;;  %v2460_v3 = vadd.f32 %v2428_v47, %v2362_v54  ;;  %v2722_v52 = vmul.f32 %v4785_v61, %v2689_v7  ;;  %v2593_v47 = vld [vmem:[#allocation2 + $0x367] sm:$0xff] }
 0x1dd   :  { %v2886_v4 = vadd.f32 %v4836_v23, %v2850_v15  ;;  %v2037_v31 = vmul.f32 %v4701_v32, %v2590_v5  ;;  %v2264_v48 = vadd.f32 %v2232_v1, %v2166_v30  ;;  %v2135_v60 = vmul.f32 %v4686_v46, %v2688_v62  ;;  %v2690_v5 = vld [vmem:[#allocation2 + $0x350] sm:$0xff] }
 0x1de   :  { %v768_v34 = vmin.f32 %v704_v0, 6.0  ;;  %v2656_v0 = vadd.f32 %v2624_v39, %v2557_v24  ;;  %v2851_v59 = vadd.f32 %v2819_v55, %v2753_v22  ;;  %v2625_v44 = vmul.f32 %v4774_v51, %v2592_v6 }
 0x1df   :  { %3029 = vmatmul.f32.gmra.mxu2 %v2947_v17  ;;  %v2918_v35 = vmax.f32 %v2886_v4, 0.0  ;;  %v2820_v28 = vmul.f32 %v4790_v49, %v2787_v2  ;;  %v2558_v32 = vadd.f32 %v2526_v16, %v2460_v3  ;;  %v2429_v41 = vmul.f32 %v4734_v8, %v2689_v7 }
 0x1e0   :  { %833 = vst [vmem:[#allocation2 + $0x408] sm:$0xff] %v768_v34  ;;  %v2331_v34 = vmul.f32 %v4723_v33, %v5035_v12  ;;  %v2754_v56 = vadd.f32 %v2722_v52, %v2656_v0  ;;  %v2167_v43 = vadd.f32 %v2135_v60, %v2037_v31  ;;  %v2887_v46 = vadd.f32 %v4836_v23, %v2851_v59  ;;  %v2691_v0 = vld [vmem:[#allocation2 + $0x368] sm:$0xff] }
 0x1e1   :  { %v631_v27 = vpop.f32.mrf.mxu3  ;;  %v1922_v63 = vpop.f32.mrf.mxu1  ;;  %v2723_v13 = vmul.f32 %v4785_v61, %v2690_v5  ;;  %v2657_v21 = vadd.f32 %v2625_v44, %v2558_v32  ;;  %v2332_v9 = vmul.f32 %v4723_v33, %v2592_v6  ;;  %v5073_v33 = vld [vmem:[%s5390_s3 + $0x1] ss:$0 sm:$0xff]  ;;  %v2626_v55 = vmul.f32 %v4774_v51, %v2593_v47  ;;  %v2789_v32 = vld [vmem:[#allocation2 + $0x369] sm:$0xff] }
 0x1e2   :  { %v632_v10 = vadd.f32 %v5005_v19, %v631_v27  ;;  %v1923_v50 = vadd.f32 %v4810_v11, %v1922_v63  ;;  %v2363_v27 = vadd.f32 %v2331_v34, %v2264_v48  ;;  %v2233_v63 = vmul.f32 %v4718_v29, %v2786_v57 }
 0x1e3   :  { %v2852_v58 = vadd.f32 %v2820_v28, %v2754_v56  ;;  %v2527_v29 = vmul.f32 %v4769_v18, %v2787_v2  ;;  %v2919_v57 = vmax.f32 %v2887_v46, 0.0  ;;  %v2136_v39 = vmul.f32 %v5073_v33, %v2689_v7  ;;  %v5083_v7 = vld [vmem:[%s5390_s3 + $0x2] ss:$0 sm:$0xff]  ;;  %v5097_v56 = vld [vmem:[%s5390_s3 + $0x3] ss:$0 sm:$0xff] }
 0x1e4   :  { %v705_v17 = vmax.f32 %v632_v10, 0.0  ;;  %1976 = vst [vmem:[#allocation3 + $0xa8] sm:$0xff] %v1923_v50  ;;  %v2950_v10 = vmin.f32 %v2918_v35, 6.0  ;;  %v2461_v15 = vadd.f32 %v2429_v41, %v2363_v27  ;;  %v2265_v26 = vadd.f32 %v2233_v63, %v2167_v43 }
 0x1e5   :  { %v2888_v1 = vadd.f32 %v4836_v23, %v2852_v58  ;;  %v2951_v3 = vmin.f32 %v2919_v57, 6.0  ;;  %v2137_v31 = vmul.f32 %v5073_v33, %v2690_v5  ;;  %v2333_v28 = vmul.f32 %v5097_v56, %v2593_v47 }
 0x1e6   :  { %v769_v42 = vmin.f32 %v705_v17, 6.0  ;;  %v2788_v17 = vld [vmem:[#allocation2 + $0x351] sm:$0xff]  ;;  %v2559_v22 = vadd.f32 %v2527_v29, %v2461_v15  ;;  %v2822_v46 = vmul.f32 %v4790_v49, %v2789_v32 }
 0x1e7   :  { %3032 = vmatmul.f32.gmra.mxu2 %v2948_v40  ;;  %v2821_v4 = vmul.f32 %v4790_v49, %v2788_v17  ;;  %v2920_v48 = vmax.f32 %v2888_v1, 0.0  ;;  %v2528_v59 = vmul.f32 %v4769_v18, %v2788_v17  ;;  %v2235_v27 = vmul.f32 %v5083_v7, %v2788_v17  ;;  %v2595_v1 = vld [vmem:[#allocation2 + $0x387] sm:$0xff] }
 0x1e8   :  { %834 = vst [vmem:[#allocation2 + $0x410] sm:$0xff] %v769_v42  ;;  %v5066_v42 = vld [vmem:[%s5390_s3] ss:$0 sm:$0xff]  ;;  %v2658_v35 = vadd.f32 %v2626_v55, %v2559_v22  ;;  %v2138_v49 = vmul.f32 %v5073_v33, %v2691_v0  ;;  %v2236_v55 = vmul.f32 %v5083_v7, %v2789_v32 }
 0x1e9   :  { %v634_v38 = vpop.f32.mrf.mxu3  ;;  %v1925_v37 = vpop.f32.mrf.mxu1  ;;  %v2038_v24 = vmul.f32 %v5066_v42, %v5035_v12  ;;  %v2430_v12 = vmul.f32 %v4734_v8, %v2690_v5  ;;  %v2039_v52 = vmul.f32 %v5066_v42, %v2592_v6  ;;  %v2952_v18 = vmin.f32 %v2920_v48, 6.0 }
 0x1ea   :  { %v635_v20 = vadd.f32 %v5005_v19, %v634_v38  ;;  %v1926_v14 = vadd.f32 %v4810_v11, %v1925_v37  ;;  %v2364_v38 = vadd.f32 %v2332_v9, %v2265_v26  ;;  %v2234_v37 = vmul.f32 %v5083_v7, %v2787_v2  ;;  %v5120_v26 = vld [vmem:[%s5390_s3 + $0x7] ss:$0 sm:$0xff] }
 0x1eb   :  { %v2168_v16 = vadd.f32 %v2136_v39, %v2038_v24  ;;  %v2724_v2 = vmul.f32 %v4785_v61, %v2691_v0  ;;  %v2169_v5 = vadd.f32 %v2137_v31, %v2039_v52  ;;  %v2790_v39 = vld [vmem:[#allocation2 + $0x371] sm:$0xff]  ;;  %v5143_v52 = vld [vmem:[%s5390_s3 + $0x6] ss:$0 sm:$0xff] }
 0x1ec   :  { %v706_v40 = vmax.f32 %v635_v20, 0.0  ;;  %1977 = vst [vmem:[#allocation3 + $0xb0] sm:$0xff] %v1926_v14  ;;  %v2628_v31 = vmul.f32 %v5143_v52, %v2595_v1 }
 0x1ed   :  { %v2266_v6 = vadd.f32 %v2234_v37, %v2168_v16  ;;  %v2267_v58 = vadd.f32 %v2235_v27, %v2169_v5 }
 0x1ee   :  { %v770_v36 = vmin.f32 %v706_v40, 6.0  ;;  %v2462_v40 = vadd.f32 %v2430_v12, %v2364_v38 }
 0x1ef   :  { %3035 = vmatmul.f32.gmra.mxu2 %v2949_v25  ;;  %v2755_v25 = vadd.f32 %v2723_v13, %v2657_v21  ;;  %v2365_v13 = vadd.f32 %v2333_v28, %v2266_v6 }
 0x1f0   :  { %835 = vst [vmem:[#allocation2 + $0x428] sm:$0xff] %v770_v36  ;;  %v5092_v36 = vld [vmem:[#allocation2 + $0x36f] sm:$0xff]  ;;  %v2560_v61 = vadd.f32 %v2528_v59, %v2462_v40  ;;  %v2335_v40 = vmul.f32 %v5097_v56, %v2595_v1 }
 0x1f1   :  { %v637_v62 = vpop.f32.mrf.mxu3  ;;  %v1928_v53 = vpop.f32.mrf.mxu1  ;;  %v2853_v34 = vadd.f32 %v2821_v4, %v2755_v25  ;;  %v2627_v63 = vmul.f32 %v4774_v51, %v5092_v36  ;;  %v2334_v21 = vmul.f32 %v5097_v56, %v5092_v36  ;;  %v2041_v59 = vmul.f32 %v5066_v42, %v5092_v36 }
 0x1f2   :  { %v638_v50 = vadd.f32 %v5005_v19, %v637_v62  ;;  %v1929_v45 = vadd.f32 %v4810_v11, %v1928_v53  ;;  %v2692_v62 = vld [vmem:[#allocation2 + $0x370] sm:$0xff]  ;;  %v5108_v53 = vld [vmem:[%s5390_s3 + $0x4] ss:$0 sm:$0xff] }
 0x1f3   :  { %v2889_v43 = vadd.f32 %v4836_v23, %v2853_v34  ;;  %v2725_v57 = vmul.f32 %v5120_v26, %v2692_v62  ;;  %v2659_v24 = vadd.f32 %v2627_v63, %v2560_v61  ;;  %v2366_v25 = vadd.f32 %v2334_v21, %v2267_v58 }
 0x1f4   :  { %v707_v54 = vmax.f32 %v638_v50, 0.0  ;;  %1978 = vst [vmem:[#allocation3 + $0xb8] sm:$0xff] %v1929_v45  ;;  %v2431_v50 = vmul.f32 %v5108_v53, %v2691_v0  ;;  %v2040_v45 = vmul.f32 %v5066_v42, %v2593_v47  ;;  %v5126_v47 = vld [vmem:[%s5390_s3 + $0x5] ss:$0 sm:$0xff]  ;;  %v2432_v4 = vmul.f32 %v5108_v53, %v2692_v62 }
 0x1f5   :  { %v2921_v15 = vmax.f32 %v2889_v43, 0.0  ;;  %v2694_v43 = vld [vmem:[#allocation2 + $0x390] sm:$0xff] }
 0x1f6   :  { %v771_v30 = vmin.f32 %v707_v54, 6.0  ;;  %v2170_v22 = vadd.f32 %v2138_v49, %v2040_v45  ;;  %v2464_v48 = vadd.f32 %v2432_v4, %v2366_v25  ;;  %v2792_v45 = vld [vmem:[#allocation2 + $0x391] sm:$0xff] }
 0x1f7   :  { %3038 = vmatmul.f32.gmra.mxu2 %v2950_v10  ;;  %v2756_v10 = vadd.f32 %v2724_v2, %v2658_v35  ;;  %v2953_v38 = vmin.f32 %v2921_v15, 6.0  ;;  %v5157_v2 = vld [vmem:[%s5393_s6] ss:$0 sm:$0xff] }
 0x1f8   :  { %836 = vst [vmem:[#allocation2 + $0x430] sm:$0xff] %v771_v30  ;;  %v2463_v30 = vadd.f32 %v2431_v50, %v2365_v13  ;;  %v2268_v35 = vadd.f32 %v2236_v55, %v2170_v22  ;;  %v2434_v55 = vmul.f32 %v5108_v53, %v2694_v43 }
 0x1f9   :  { %v640_v20 = vpop.f32.mrf.mxu3  ;;  %v1931_v14 = vpop.f32.mrf.mxu1  ;;  %v2854_v54 = vadd.f32 %v2822_v46, %v2756_v10  ;;  %v2237_v46 = vmul.f32 %v5083_v7, %v2790_v39 }
 0x1fa   :  { %v641_v8 = vadd.f32 %v5005_v19, %v640_v20  ;;  %v1932_v60 = vadd.f32 %v4810_v11, %v1931_v14  ;;  %v2757_v20 = vadd.f32 %v2725_v57, %v2659_v24  ;;  %v2693_v14 = vld [vmem:[#allocation2 + $0x388] sm:$0xff]  ;;  %v2367_v61 = vadd.f32 %v2335_v40, %v2268_v35 }
 0x1fb   :  { %v2890_v37 = vadd.f32 %v4836_v23, %v2854_v54  ;;  %v2726_v27 = vmul.f32 %v5120_v26, %v2693_v14  ;;  %v2433_v63 = vmul.f32 %v5108_v53, %v2693_v14  ;;  %v2597_v54 = vld [vmem:[#allocation2 + $0x3a7] sm:$0xff]  ;;  %v2532_v40 = vmul.f32 %v5126_v47, %v2792_v45 }
 0x1fc   :  { %v708_v44 = vmax.f32 %v641_v8, 0.0  ;;  %1979 = vst [vmem:[#allocation3 + $0xc0] sm:$0xff] %v1932_v60  ;;  %v2530_v8 = vmul.f32 %v5126_v47, %v2790_v39  ;;  %v5148_v60 = vld [vmem:[#allocation2 + $0x38f] sm:$0xff]  ;;  %v2630_v4 = vmul.f32 %v5143_v52, %v2597_v54 }
 0x1fd   :  { %v2922_v28 = vmax.f32 %v2890_v37, 0.0  ;;  %v2629_v36 = vmul.f32 %v5143_v52, %v5148_v60  ;;  %v2465_v49 = vadd.f32 %v2433_v63, %v2367_v61  ;;  %v2695_v37 = vld [vmem:[#allocation2 + $0x3a8] sm:$0xff] }
 0x1fe   :  { %v772_v41 = vmin.f32 %v708_v44, 6.0  ;;  %v2139_v44 = vmul.f32 %v5073_v33, %v2692_v62 }
 0x1ff   :  { %3041 = vmatmul.f32.gmra.mxu2 %v2951_v3  ;;  %v5136_v3 = vld [vmem:[%s5390_s3 + $0x8] ss:$0 sm:$0xff]  ;;  %v2954_v62 = vmin.f32 %v2922_v28, 6.0  ;;  %v2043_v28 = vmul.f32 %v5066_v42, %v5148_v60 }
 0x200   :  { %837 = vst [vmem:[#allocation2 + $0x448] sm:$0xff] %v772_v41  ;;  %v2823_v16 = vmul.f32 %v5136_v3, %v2790_v39  ;;  %v2791_v41 = vld [vmem:[#allocation2 + $0x389] sm:$0xff]  ;;  %v2171_v10 = vadd.f32 %v2139_v44, %v2041_v59  ;;  %v2042_v39 = vmul.f32 %v5066_v42, %v2595_v1  ;;  %v2728_v44 = vmul.f32 %v5120_v26, %v2695_v37 }
 0x201   :  { %v1934_v9 = vpop.f32.mrf.mxu1  ;;  %v2824_v58 = vmul.f32 %v5136_v3, %v2791_v41 }
 0x202   :  { %v1935_v17 = vadd.f32 %v4810_v11, %v1934_v9  ;;  %v2529_v11 = vmul.f32 %v5126_v47, %v2789_v32  ;;  %v2855_v32 = vadd.f32 %v2823_v16, %v2757_v20  ;;  %v2727_v9 = vmul.f32 %v5120_v26, %v2694_v43  ;;  %v5180_v16 = vld [vmem:[%s5391_s4] ss:$0 sm:$0xff] }
 0x203   :  { %v643_v51 = vpop.f32.mrf.mxu3  ;;  %v2269_v15 = vadd.f32 %v2237_v46, %v2171_v10 }
 0x204   :  { %v644_v29 = vadd.f32 %v5005_v19, %v643_v51  ;;  %1980 = vst [vmem:[#allocation3 + $0xc8] sm:$0xff] %v1935_v17  ;;  %v2561_v0 = vadd.f32 %v2529_v11, %v2463_v30  ;;  %v2891_v13 = vadd.f32 %v4836_v23, %v2855_v32  ;;  %v2531_v17 = vmul.f32 %v5126_v47, %v2791_v41 }
 0x205   :  { %v2140_v30 = vmul.f32 %v5073_v33, %v2693_v14  ;;  %v2141_v32 = vmul.f32 %v5073_v33, %v2694_v43 }
 0x206   :  { %v709_v19 = vmax.f32 %v644_v29, 0.0  ;;  %v2660_v5 = vadd.f32 %v2628_v31, %v2561_v0  ;;  %v2336_v29 = vmul.f32 %v5097_v56, %v5148_v60  ;;  %v2923_v23 = vmax.f32 %v2891_v13, 0.0 }
 0x207   :  { %3044 = vmatmul.f32.gmra.mxu2 %v2952_v18  ;;  %v2562_v18 = vadd.f32 %v2530_v8, %v2464_v48  ;;  %v2563_v25 = vadd.f32 %v2531_v17, %v2465_v49  ;;  %v2172_v20 = vadd.f32 %v2140_v30, %v2042_v39  ;;  %v2238_v0 = vmul.f32 %v5083_v7, %v2791_v41 }
 0x208   :  { %v5131_v12 = vmin.f32 %v709_v19, 6.0  ;;  %v2758_v50 = vadd.f32 %v2726_v27, %v2660_v5  ;;  %v2825_v19 = vmul.f32 %v5136_v3, %v2792_v45  ;;  %v2368_v22 = vadd.f32 %v2336_v29, %v2269_v15  ;;  %v2793_v27 = vld [vmem:[#allocation2 + $0x3a9] sm:$0xff] }
 0x209   :  { %v1937_v34 = vpop.f32.mrf.mxu1  ;;  %v2661_v21 = vadd.f32 %v2629_v36, %v2562_v18  ;;  %v2270_v41 = vadd.f32 %v2238_v0, %v2172_v20  ;;  %v2337_v18 = vmul.f32 %v5097_v56, %v2597_v54  ;;  %v2826_v46 = vmul.f32 %v5136_v3, %v2793_v27 }
 0x20a   :  { %838 = vst [vmem:[#allocation2 + $0x450] sm:$0xff] %v5131_v12  ;;  %v1938_v6 = vadd.f32 %v5157_v2, %v1937_v34  ;;  %v2856_v24 = vadd.f32 %v2824_v58, %v2758_v50  ;;  %v2662_v34 = vadd.f32 %v2630_v4, %v2563_v25  ;;  %v2466_v35 = vadd.f32 %v2434_v55, %v2368_v22  ;;  %v2599_v25 = vld [vmem:[#allocation2 + $0x3c7] sm:$0xff] }
 0x20b   :  { %v2759_v11 = vadd.f32 %v2727_v9, %v2661_v21  ;;  %v2173_v13 = vadd.f32 %v2141_v32, %v2043_v28  ;;  %v2239_v60 = vmul.f32 %v5083_v7, %v2792_v45  ;;  %v2369_v50 = vadd.f32 %v2337_v18, %v2270_v41  ;;  %v5200_v9 = vld [vmem:[%s5393_s6] ss:$0 sm:$0xff]  ;;  %v2600_v18 = vld [vmem:[#allocation2 + $0x3cf] sm:$0xff]  ;;  %s3339_s6 = smov [#allocation3]  }
 0x20c   :  { %1981 = vst [vmem:[#allocation3 + $0xd0] sm:$0xff] %v1938_v6  ;;  %v2892_v1 = vadd.f32 %v5180_v16, %v2856_v24  ;;  %v2598_v6 = vld [vmem:[#allocation2 + $0x3af] sm:$0xff]  ;;  %v2564_v61 = vadd.f32 %v2532_v40, %v2466_v35  ;;  %v2760_v10 = vadd.f32 %v2728_v44, %v2662_v34  ;;  %v2435_v58 = vmul.f32 %v5108_v53, %v2695_v37  ;;  %s3142_s27 = sshll.u32 %s3339_s6, 4  ;;  %s3143_s27 = int_to_ptr.vmem [resolvable:$true] %s3142_s27 }
 0x20d   :  { %v2857_v14 = vadd.f32 %v2825_v19, %v2759_v11  ;;  %v2631_v63 = vmul.f32 %v5143_v52, %v2598_v6  ;;  %v2271_v45 = vadd.f32 %v2239_v60, %v2173_v13  ;;  %v2533_v39 = vmul.f32 %v5126_v47, %v2793_v27 }
 0x20e   :  { %v2924_v5 = vmax.f32 %v2892_v1, 0.0  ;;  %v2858_v29 = vadd.f32 %v2826_v46, %v2760_v10  ;;  %v2467_v24 = vadd.f32 %v2435_v58, %v2369_v50  ;;  %v2044_v30 = vmul.f32 %v5066_v42, %v2597_v54  ;;  %v2698_v58 = vld [vmem:[#allocation2 + $0x3d0] sm:$0xff] }
 0x20f   :  { %3047 = vmatmul.f32.gmra.mxu2 %v2953_v38  ;;  %v2955_v38 = vmin.f32 %v2923_v23, 6.0  ;;  %v2893_v36 = vadd.f32 %v5180_v16, %v2857_v14  ;;  %v2663_v49 = vadd.f32 %v2631_v63, %v2564_v61  ;;  %v2338_v23 = vmul.f32 %v5097_v56, %v2598_v6  ;;  %v2795_v61 = vld [vmem:[#allocation2 + $0x3c9] sm:$0xff] }
 0x210   :  { %v2956_v43 = vmin.f32 %v2924_v5, 6.0  ;;  %v2142_v11 = vmul.f32 %v5073_v33, %v2695_v37  ;;  %v2894_v1 = vadd.f32 %v5180_v16, %v2858_v29  ;;  %v2632_v54 = vmul.f32 %v5143_v52, %v2599_v25 }
 0x211   :  { %v1940_v51 = vpop.f32.mrf.mxu1  ;;  %v2370_v20 = vadd.f32 %v2338_v23, %v2271_v45  ;;  %v2240_v37 = vmul.f32 %v5083_v7, %v2793_v27  ;;  %v2339_v27 = vmul.f32 %v5097_v56, %v2599_v25  ;;  %v2633_v60 = vmul.f32 %v5143_v52, %v2600_v18 }
 0x212   :  { %v1941_v57 = vadd.f32 %v5157_v2, %v1940_v51  ;;  %v2925_v51 = vmax.f32 %v2893_v36, 0.0  ;;  %v2174_v14 = vadd.f32 %v2142_v11, %v2044_v30  ;;  %v2926_v44 = vmax.f32 %v2894_v1, 0.0 }
 0x213   :  { %v2828_v50 = vmul.f32 %v5136_v3, %v2795_v61  ;;  %v2731_v29 = vmul.f32 %v5120_v26, %v2698_v58  ;;  %v2535_v11 = vmul.f32 %v5126_v47, %v2795_v61  ;;  %v2047_v1 = vmul.f32 %v5066_v42, %v2600_v18 }
 0x214   :  { %1982 = vst [vmem:[#allocation3 + $0xd8] sm:$0xff] %v1941_v57  ;;  %v2794_v57 = vld [vmem:[#allocation2 + $0x3b1] sm:$0xff]  ;;  %v2272_v36 = vadd.f32 %v2240_v37, %v2174_v14 }
 0x215   :  { %v2827_v55 = vmul.f32 %v5136_v3, %v2794_v57  ;;  %v2534_v32 = vmul.f32 %v5126_v47, %v2794_v57  ;;  %v2241_v10 = vmul.f32 %v5083_v7, %v2794_v57  ;;  %v2046_v57 = vmul.f32 %v5066_v42, %v2599_v25 }
 0x217   :  { %3050 = vmatmul.f32.gmra.mxu2 %v2954_v62  ;;  %v2696_v62 = vld [vmem:[#allocation2 + $0x3b0] sm:$0xff] }
 0x218   :  { %v2729_v17 = vmul.f32 %v5120_v26, %v2696_v62  ;;  %v2436_v0 = vmul.f32 %v5108_v53, %v2696_v62  ;;  %v2143_v34 = vmul.f32 %v5073_v33, %v2696_v62 }
 0x219   :  { %v1943_v48 = vpop.f32.mrf.mxu1 }
 0x21a   :  { %v1944_v59 = vadd.f32 %v5157_v2, %v1943_v48  ;;  %v2761_v22 = vadd.f32 %v2729_v17, %v2663_v49  ;;  %v2697_v48 = vld [vmem:[#allocation2 + $0x3c8] sm:$0xff]  ;;  %v2468_v28 = vadd.f32 %v2436_v0, %v2370_v20  ;;  %v2340_v17 = vmul.f32 %v5097_v56, %v2600_v18 }
 0x21b   :  { %v2730_v41 = vmul.f32 %v5120_v26, %v2697_v48  ;;  %v2144_v45 = vmul.f32 %v5073_v33, %v2697_v48  ;;  %v2145_v20 = vmul.f32 %v5073_v33, %v2698_v58 }
 0x21c   :  { %1983 = vst [vmem:[#allocation3 + $0xe0] sm:$0xff] %v1944_v59  ;;  %v2859_v40 = vadd.f32 %v2827_v55, %v2761_v22  ;;  %v2566_v13 = vadd.f32 %v2534_v32, %v2468_v28 }
 0x21e   :  { %v2895_v62 = vadd.f32 %v5180_v16, %v2859_v40 }
 0x21f   :  { %v1952_v31 = vpop.f32.mrf.mxu3  ;;  %3053 = vmatmul.f32.gmra.mxu2 %v2955_v38  ;;  %v2957_v38 = vmin.f32 %v2925_v51, 6.0  ;;  %v2437_v51 = vmul.f32 %v5108_v53, %v2697_v48 }
 0x220   :  { %v1953_v8 = vadd.f32 %v5157_v2, %v1952_v31  ;;  %v2565_v31 = vadd.f32 %v2533_v39, %v2467_v24  ;;  %v2665_v24 = vadd.f32 %v2633_v60, %v2566_v13  ;;  %v2796_v39 = vld [vmem:[#allocation2 + $0x3d1] sm:$0xff] }
 0x221   :  { %v2829_v0 = vmul.f32 %v5136_v3, %v2796_v39  ;;  %v2536_v40 = vmul.f32 %v5126_v47, %v2796_v39  ;;  %v2243_v28 = vmul.f32 %v5083_v7, %v2796_v39  ;;  %v2700_v13 = vld [vmem:[#allocation2 + $0x3f0] sm:$0xff] }
 0x222   :  { %1986 = vst [vmem:[#allocation3 + $0xf8] sm:$0xff] %v1953_v8  ;;  %v2045_v8 = vmul.f32 %v5066_v42, %v2598_v6  ;;  %v2664_v5 = vadd.f32 %v2632_v54, %v2565_v31  ;;  %v2176_v31 = vadd.f32 %v2144_v45, %v2046_v57  ;;  %v2242_v54 = vmul.f32 %v5083_v7, %v2795_v61  ;;  %v2797_v61 = vld [vmem:[#allocation2 + $0x3e9] sm:$0xff]  ;;  %v2798_v57 = vld [vmem:[#allocation2 + $0x3f1] sm:$0xff] }
 0x223   :  { %v2763_v37 = vadd.f32 %v2731_v29, %v2665_v24  ;;  %v2733_v29 = vmul.f32 %v5120_v26, %v2700_v13  ;;  %v2537_v39 = vmul.f32 %v5126_v47, %v2797_v61 }
 0x224   :  { %v2175_v63 = vadd.f32 %v2143_v34, %v2045_v8  ;;  %v2699_v34 = vld [vmem:[#allocation2 + $0x3e8] sm:$0xff]  ;;  %v2274_v32 = vadd.f32 %v2242_v54, %v2176_v31 }
 0x225   :  { %v1946_v21 = vpop.f32.mrf.mxu1  ;;  %v2861_v18 = vadd.f32 %v2829_v0, %v2763_v37  ;;  %v2538_v0 = vmul.f32 %v5126_v47, %v2798_v57 }
 0x226   :  { %v1947_v15 = vadd.f32 %v5157_v2, %v1946_v21  ;;  %v2371_v21 = vadd.f32 %v2339_v27, %v2272_v36  ;;  %v2273_v49 = vadd.f32 %v2241_v10, %v2175_v63  ;;  %v2732_v27 = vmul.f32 %v5120_v26, %v2699_v34 }
 0x227   :  { %3056 = vmatmul.f32.gmra.mxu2 %v2956_v43  ;;  %v2762_v43 = vadd.f32 %v2730_v41, %v2664_v5 }
 0x228   :  { %1984 = vst [vmem:[#allocation3 + $0xe8] sm:$0xff] %v1947_v15  ;;  %v2927_v15 = vmax.f32 %v2895_v62, 0.0  ;;  %v2469_v30 = vadd.f32 %v2437_v51, %v2371_v21  ;;  %v2372_v22 = vadd.f32 %v2340_v17, %v2273_v49  ;;  %v2830_v51 = vmul.f32 %v5136_v3, %v2797_v61 }
 0x229   :  { %v2860_v23 = vadd.f32 %v2828_v50, %v2762_v43  ;;  %v2439_v43 = vmul.f32 %v5108_v53, %v2699_v34  ;;  %v2146_v17 = vmul.f32 %v5073_v33, %v2699_v34 }
 0x22a   :  { %v3009_v19 = vpop.f32.mrf.mxu2  ;;  %v2959_v25 = vmin.f32 %v2927_v15, 6.0  ;;  %v2567_v48 = vadd.f32 %v2535_v11, %v2469_v30 }
 0x22b   :  { %v3010_v4 = vadd.f32 %v5200_v9, %v3009_v19  ;;  %v2896_v14 = vadd.f32 %v5180_v16, %v2860_v23  ;;  %v2440_v23 = vmul.f32 %v5108_v53, %v2700_v13 }
 0x22d   :  { %3106 = vst [vmem:[#allocation3 + $0x100] sm:$0xff] %v3010_v4  ;;  %v1949_v35 = vpop.f32.mrf.mxu1  ;;  %v2601_v4 = vld [vmem:[#allocation2 + $0x3e7] sm:$0xff]  ;;  %v2928_v41 = vmax.f32 %v2896_v14, 0.0  ;;  %v5259_v14 = vld [vmem:[#allocation2 + $0x40f] sm:$0xff] }
 0x22e   :  { %v1950_v59 = vadd.f32 %v5157_v2, %v1949_v35  ;;  %v2958_v2 = vmin.f32 %v2926_v44, 6.0  ;;  %v2634_v8 = vmul.f32 %v5143_v52, %v2601_v4  ;;  %v2177_v44 = vadd.f32 %v2145_v20, %v2047_v1 }
 0x22f   :  { %3059 = vmatmul.f32.gmra.mxu2 %v2957_v38  ;;  %v2438_v38 = vmul.f32 %v5108_v53, %v2698_v58  ;;  %v2341_v5 = vmul.f32 %v5097_v56, %v2601_v4  ;;  %v2960_v50 = vmin.f32 %v2928_v41, 6.0  ;;  %v2897_v58 = vadd.f32 %v5180_v16, %v2861_v18 }
 0x230   :  { %1985 = vst [vmem:[#allocation3 + $0xf0] sm:$0xff] %v1950_v59  ;;  %v2602_v59 = vld [vmem:[#allocation2 + $0x3ef] sm:$0xff]  ;;  %v2666_v36 = vadd.f32 %v2634_v8, %v2567_v48  ;;  %v2048_v49 = vmul.f32 %v5066_v42, %v2601_v4 }
 0x231   :  { %v2470_v35 = vadd.f32 %v2438_v38, %v2372_v22  ;;  %v2635_v63 = vmul.f32 %v5143_v52, %v2602_v59  ;;  %v2342_v62 = vmul.f32 %v5097_v56, %v2602_v59  ;;  %v2373_v60 = vadd.f32 %v2341_v5, %v2274_v32  ;;  %v2701_v8 = vld [vmem:[#allocation2 + $0x408] sm:$0xff] }
 0x232   :  { %v3012_v6 = vpop.f32.mrf.mxu2  ;;  %v2764_v21 = vadd.f32 %v2732_v27, %v2666_v36  ;;  %v2929_v30 = vmax.f32 %v2897_v58, 0.0  ;;  %v2178_v4 = vadd.f32 %v2146_v17, %v2048_v49  ;;  %v2244_v38 = vmul.f32 %v5083_v7, %v2797_v61  ;;  %v2702_v36 = vld [vmem:[#allocation2 + $0x410] sm:$0xff] }
 0x233   :  { %v3013_v46 = vadd.f32 %v5200_v9, %v3012_v6  ;;  %v2471_v24 = vadd.f32 %v2439_v43, %v2373_v60  ;;  %v2049_v34 = vmul.f32 %v5066_v42, %v2602_v59  ;;  %v2637_v5 = vmul.f32 %v5143_v52, %v5259_v14  ;;  %v2800_v58 = vld [vmem:[#allocation2 + $0x411] sm:$0xff] }
 0x234   :  { %v2862_v11 = vadd.f32 %v2830_v51, %v2764_v21  ;;  %v2961_v37 = vmin.f32 %v2929_v30, 6.0  ;;  %v2734_v18 = vmul.f32 %v5120_v26, %v2701_v8  ;;  %v2245_v59 = vmul.f32 %v5083_v7, %v2798_v57 }
 0x235   :  { %3107 = vst [vmem:[#allocation3 + $0x108] sm:$0xff] %v3013_v46  ;;  %v2568_v46 = vadd.f32 %v2536_v40, %v2470_v35  ;;  %v2569_v31 = vadd.f32 %v2537_v39, %v2471_v24  ;;  %v2147_v35 = vmul.f32 %v5073_v33, %v2700_v13  ;;  %v2276_v40 = vadd.f32 %v2244_v38, %v2178_v4 }
 0x236   :  { %v2898_v48 = vadd.f32 %v5180_v16, %v2862_v11  ;;  %v2735_v60 = vmul.f32 %v5120_v26, %v2702_v36  ;;  %v2344_v49 = vmul.f32 %v5097_v56, %v5259_v14  ;;  %v2148_v30 = vmul.f32 %v5073_v33, %v2701_v8 }
 0x237   :  { %3062 = vmatmul.f32.gmra.mxu2 %v2958_v2  ;;  %v2275_v2 = vadd.f32 %v2243_v28, %v2177_v44  ;;  %v2667_v15 = vadd.f32 %v2635_v63, %v2568_v46  ;;  %v2179_v61 = vadd.f32 %v2147_v35, %v2049_v34  ;;  %v2441_v46 = vmul.f32 %v5108_v53, %v2701_v8 }
 0x238   :  { %v2930_v27 = vmax.f32 %v2898_v48, 0.0  ;;  %v2540_v48 = vmul.f32 %v5126_v47, %v2800_v58 }
 0x239   :  { %v2374_v45 = vadd.f32 %v2342_v62, %v2275_v2  ;;  %v2765_v20 = vadd.f32 %v2733_v29, %v2667_v15  ;;  %v2277_v51 = vadd.f32 %v2245_v59, %v2179_v61 }
 0x23a   :  { %v3015_v19 = vpop.f32.mrf.mxu2  ;;  %v2962_v21 = vmin.f32 %v2930_v27, 6.0  ;;  %v2149_v27 = vmul.f32 %v5073_v33, %v2702_v36 }
 0x23b   :  { %v3016_v55 = vadd.f32 %v5200_v9, %v3015_v19  ;;  %v2603_v19 = vld [vmem:[#allocation2 + $0x407] sm:$0xff]  ;;  %v2376_v11 = vadd.f32 %v2344_v49, %v2277_v51 }
 0x23c   :  { %v2636_v54 = vmul.f32 %v5143_v52, %v2603_v19  ;;  %v2343_v44 = vmul.f32 %v5097_v56, %v2603_v19  ;;  %v2050_v39 = vmul.f32 %v5066_v42, %v2603_v19  ;;  %v5289_v19 = vld [vmem:[#allocation2 + $0x431] sm:$0xff] }
 0x23d   :  { %3108 = vst [vmem:[#allocation3 + $0x110] sm:$0xff] %v3016_v55  ;;  %v2831_v55 = vmul.f32 %v5136_v3, %v2798_v57 }
 0x23e   :  { %v2668_v41 = vadd.f32 %v2636_v54, %v2569_v31  ;;  %v2020_v54 = vld [vmem:[#allocation2 + $0x42f] sm:$0xff]  ;;  %v2180_v8 = vadd.f32 %v2148_v30, %v2050_v39 }
 0x23f   :  { %3065 = vmatmul.f32.gmra.mxu2 %v2959_v25  ;;  %v2472_v25 = vadd.f32 %v2440_v23, %v2374_v45  ;;  %v2863_v28 = vadd.f32 %v2831_v55, %v2765_v20  ;;  %v2833_v45 = vmul.f32 %v5136_v3, %v2800_v58  ;;  %v5278_v23 = vld [vmem:[#allocation2 + $0x427] sm:$0xff]  ;;  %v2053_v35 = vmul.f32 %v5066_v42, %v2020_v54 }
 0x240   :  { %v2766_v43 = vadd.f32 %v2734_v18, %v2668_v41  ;;  %v2638_v38 = vmul.f32 %v5143_v52, %v5278_v23  ;;  %v5299_v41 = vld [vmem:[#allocation2 + $0x44f] sm:$0xff]  ;;  %v2051_v18 = vmul.f32 %v5066_v42, %v5259_v14  ;;  %v2639_v14 = vmul.f32 %v5143_v52, %v2020_v54 }
 0x241   :  { %v2570_v32 = vadd.f32 %v2538_v0, %v2472_v25  ;;  %v2899_v62 = vadd.f32 %v5180_v16, %v2863_v28  ;;  %v2703_v0 = vld [vmem:[#allocation2 + $0x428] sm:$0xff]  ;;  %v2348_v59 = vmul.f32 %v5097_v56, %v5299_v41 }
 0x242   :  { %v3018_v6 = vpop.f32.mrf.mxu2  ;;  %v2181_v49 = vadd.f32 %v2149_v27, %v2051_v18 }
 0x243   :  { %v3019_v10 = vadd.f32 %v5200_v9, %v3018_v6  ;;  %v2799_v6 = vld [vmem:[#allocation2 + $0x409] sm:$0xff]  ;;  %v2669_v13 = vadd.f32 %v2637_v5, %v2570_v32  ;;  %v2931_v29 = vmax.f32 %v2899_v62, 0.0  ;;  %v2736_v5 = vmul.f32 %v5120_v26, %v2703_v0 }
 0x244   :  { %v2539_v15 = vmul.f32 %v5126_v47, %v2799_v6  ;;  %v2246_v34 = vmul.f32 %v5083_v7, %v2799_v6 }
 0x245   :  { %3109 = vst [vmem:[#allocation3 + $0x118] sm:$0xff] %v3019_v10  ;;  %v2375_v10 = vadd.f32 %v2343_v44, %v2276_v40  ;;  %v2767_v57 = vadd.f32 %v2735_v60, %v2669_v13  ;;  %v2963_v20 = vmin.f32 %v2931_v29, 6.0  ;;  %v2249_v44 = vmul.f32 %v5083_v7, %v5289_v19 }
 0x246   :  { %v2446_v13 = vmul.f32 %v5108_v53, %v5131_v12 }
 0x247   :  { %3068 = vmatmul.f32.gmra.mxu2 %v2960_v50  ;;  %v2832_v50 = vmul.f32 %v5136_v3, %v2799_v6  ;;  %v2473_v17 = vadd.f32 %v2441_v46, %v2375_v10  ;;  %v2865_v25 = vadd.f32 %v2833_v45, %v2767_v57  ;;  %v2801_v6 = vld [vmem:[#allocation2 + $0x429] sm:$0xff]  ;;  %v2278_v10 = vadd.f32 %v2246_v34, %v2180_v8 }
 0x248   :  { %v2345_v46 = vmul.f32 %v5097_v56, %v5278_v23  ;;  %v2247_v57 = vmul.f32 %v5083_v7, %v2800_v58  ;;  %v2443_v45 = vmul.f32 %v5108_v53, %v2703_v0  ;;  %v2346_v8 = vmul.f32 %v5097_v56, %v2020_v54 }
 0x249   :  { %v2864_v24 = vadd.f32 %v2832_v50, %v2766_v43  ;;  %v2571_v4 = vadd.f32 %v2539_v15, %v2473_v17  ;;  %v2834_v43 = vmul.f32 %v5136_v3, %v2801_v6  ;;  %v5313_v50 = vld [vmem:[#allocation2 + $0x451] sm:$0xff] }
 0x24a   :  { %v3021_v22 = vpop.f32.mrf.mxu2  ;;  %v2544_v29 = vmul.f32 %v5126_v47, %v5313_v50  ;;  %v2377_v12 = vadd.f32 %v2345_v46, %v2278_v10 }
 0x24b   :  { %v3022_v1 = vadd.f32 %v5200_v9, %v3021_v22  ;;  %v2442_v22 = vmul.f32 %v5108_v53, %v2702_v36  ;;  %v2900_v31 = vadd.f32 %v5180_v16, %v2864_v24  ;;  %v2670_v32 = vadd.f32 %v2638_v38, %v2571_v4 }
 0x24d   :  { %3110 = vst [vmem:[#allocation3 + $0x120] sm:$0xff] %v3022_v1  ;;  %v2474_v28 = vadd.f32 %v2442_v22, %v2376_v11  ;;  %v2768_v60 = vadd.f32 %v2736_v5, %v2670_v32  ;;  %v2806_v22 = vld [vmem:[#allocation2 + $0x471] sm:$0xff]  ;;  %v2607_v5 = vld [vmem:[#allocation2 + $0x447] sm:$0xff] }
 0x24f   :  { %3071 = vmatmul.f32.gmra.mxu2 %v2961_v37  ;;  %v5287_v37 = vld [vmem:[#allocation2 + $0x430] sm:$0xff]  ;;  %v2572_v51 = vadd.f32 %v2540_v48, %v2474_v28  ;;  %v2866_v4 = vadd.f32 %v2834_v43, %v2768_v60  ;;  %v2541_v48 = vmul.f32 %v5126_v47, %v2801_v6  ;;  %v2542_v43 = vmul.f32 %v5126_v47, %v5289_v19 }
 0x250   :  { %v2151_v40 = vmul.f32 %v5073_v33, %v5287_v37 }
 0x251   :  { %v2902_v54 = vadd.f32 %v5180_v16, %v2866_v4 }
 0x252   :  { %v3024_v63 = vpop.f32.mrf.mxu2  ;;  %v2183_v61 = vadd.f32 %v2151_v40, %v2053_v35  ;;  %v2839_v35 = vmul.f32 %v5136_v3, %v2806_v22  ;;  %v2052_v40 = vmul.f32 %v5066_v42, %v5278_v23  ;;  %v2444_v42 = vmul.f32 %v5108_v53, %v5287_v37 }
 0x253   :  { %v3025_v2 = vadd.f32 %v5200_v9, %v3024_v63  ;;  %v2901_v63 = vadd.f32 %v5180_v16, %v2865_v25  ;;  %v3311_v25 = vld [vmem:[#allocation2] sm:$0xff]  ;;  %v2640_v23 = vmul.f32 %v5143_v52, %v2607_v5 }
 0x254   :  { %v2281_v62 = vadd.f32 %v2249_v44, %v2183_v61  ;;  %v5324_v58 = vmul.f32 %v3311_v25, %v5120_v26  ;;  %v2150_v44 = vmul.f32 %v5073_v33, %v2703_v0  ;;  %v2705_v0 = vld [vmem:[#allocation2 + $0x448] sm:$0xff] }
 0x255   :  { %3111 = vst [vmem:[#allocation3 + $0x128] sm:$0xff] %v3025_v2  ;;  %v2932_v2 = vmax.f32 %v2900_v31, 0.0  ;;  %v2933_v11 = vmax.f32 %v2901_v63, 0.0  ;;  %v2475_v31 = vadd.f32 %v2443_v45, %v2377_v12  ;;  %v2641_v45 = vmul.f32 %v5143_v52, %v5299_v41  ;;  %v2609_v25 = vld [vmem:[#allocation2 + $0x467] sm:$0xff] }
 0x256   :  { %v2380_v15 = vadd.f32 %v2348_v59, %v2281_v62  ;;  %v2835_v59 = vmul.f32 %v5136_v3, %v5289_v19  ;;  %v2182_v46 = vadd.f32 %v2150_v44, %v2052_v40 }
 0x257   :  { %3074 = vmatmul.f32.gmra.mxu2 %v2962_v21  ;;  %v2610_v21 = vld [vmem:[#allocation2 + $0x46f] sm:$0xff]  ;;  %v2964_v24 = vmin.f32 %v2932_v2, 6.0  ;;  %v2965_v32 = vmin.f32 %v2933_v11, 6.0  ;;  %v2573_v63 = vadd.f32 %v2541_v48, %v2475_v31  ;;  %v2248_v2 = vmul.f32 %v5083_v7, %v2801_v6 }
 0x258   :  { %v2478_v39 = vadd.f32 %v2446_v13, %v2380_v15  ;;  %v2643_v30 = vmul.f32 %v5143_v52, %v2610_v21  ;;  %v2837_v48 = vmul.f32 %v5136_v3, %v5313_v50 }
 0x259   :  { %v2672_v21 = vadd.f32 %v2640_v23, %v2573_v63 }
 0x25a   :  { %v3027_v55 = vpop.f32.mrf.mxu2  ;;  %v2576_v38 = vadd.f32 %v2544_v29, %v2478_v39  ;;  %v2706_v39 = vld [vmem:[#allocation2 + $0x450] sm:$0xff] }
 0x25b   :  { %v3028_v1 = vadd.f32 %v5200_v9, %v3027_v55  ;;  %v2737_v55 = vmul.f32 %v5120_v26, %v5287_v37  ;;  %v2739_v22 = vmul.f32 %v5120_v26, %v2706_v39 }
 0x25c   :  { %v2675_v34 = vadd.f32 %v2643_v30, %v2576_v38 }
 0x25d   :  { %3112 = vst [vmem:[#allocation3 + $0x130] sm:$0xff] %v3028_v1  ;;  %v2671_v1 = vadd.f32 %v2639_v14, %v2572_v51  ;;  %v2934_v14 = vmax.f32 %v2902_v54, 0.0  ;;  %v2803_v51 = vld [vmem:[#allocation2 + $0x449] sm:$0xff] }
 0x25e   :  { %v2773_v27 = vadd.f32 %v5324_v58, %v2675_v34 }
 0x25f   :  { %3077 = vmatmul.f32.gmra.mxu2 %v2963_v20  ;;  %v2279_v20 = vadd.f32 %v2247_v57, %v2181_v49  ;;  %v2769_v61 = vadd.f32 %v2737_v55, %v2671_v1  ;;  %v2280_v49 = vadd.f32 %v2248_v2, %v2182_v46  ;;  %v2836_v57 = vmul.f32 %v5136_v3, %v2803_v51 }
 0x260   :  { %v2871_v33 = vadd.f32 %v2839_v35, %v2773_v27  ;;  %v2966_v19 = vmin.f32 %v2934_v14, 6.0  ;;  %v2543_v1 = vmul.f32 %v5126_v47, %v2803_v51 }
 0x261   :  { %v2378_v10 = vadd.f32 %v2346_v8, %v2279_v20  ;;  %v2867_v13 = vadd.f32 %v2835_v59, %v2769_v61 }
 0x262   :  { %v3030_v36 = vpop.f32.mrf.mxu2  ;;  %v2907_v62 = vadd.f32 %v5180_v16, %v2871_v33 }
 0x263   :  { %v3031_v17 = vadd.f32 %v5200_v9, %v3030_v36  ;;  %v2738_v36 = vmul.f32 %v5120_v26, %v2705_v0  ;;  %v2476_v60 = vadd.f32 %v2444_v42, %v2378_v10  ;;  %v2903_v29 = vadd.f32 %v5180_v16, %v2867_v13 }
 0x264   :  { %v2939_v37 = vmax.f32 %v2907_v62, 0.0  ;;  %v2642_v26 = vmul.f32 %v5143_v52, %v2609_v25 }
 0x265   :  { %3113 = vst [vmem:[#allocation3 + $0x138] sm:$0xff] %v3031_v17  ;;  %v2347_v17 = vmul.f32 %v5097_v56, %v2607_v5  ;;  %v2574_v12 = vadd.f32 %v2542_v43, %v2476_v60  ;;  %v2445_v56 = vmul.f32 %v5108_v53, %v2705_v0  ;;  %v2935_v11 = vmax.f32 %v2903_v29, 0.0 }
 0x266   :  { %v2971_v6 = vmin.f32 %v2939_v37, 6.0 }
 0x267   :  { %3080 = vmatmul.f32.gmra.mxu2 %v2964_v24  ;;  %v2770_v24 = vadd.f32 %v2738_v36, %v2672_v21  ;;  %v2379_v30 = vadd.f32 %v2347_v17, %v2280_v49  ;;  %v2673_v4 = vadd.f32 %v2641_v45, %v2574_v12  ;;  %v2967_v31 = vmin.f32 %v2935_v11, 6.0 }
 0x268   :  { %3101 = vmatmul.f32.vlgmr.msra.gmra.mxu3 %v2971_v6 }
 0x269   :  { %v2868_v55 = vadd.f32 %v2836_v57, %v2770_v24  ;;  %v2477_v38 = vadd.f32 %v2445_v56, %v2379_v30  ;;  %v2771_v8 = vadd.f32 %v2739_v22, %v2673_v4 }
 0x26a   :  { %v3033_v28 = vpop.f32.mrf.mxu2 }
 0x26b   :  { %v3034_v18 = vadd.f32 %v5200_v9, %v3033_v28  ;;  %v2904_v53 = vadd.f32 %v5180_v16, %v2868_v55  ;;  %v2575_v34 = vadd.f32 %v2543_v1, %v2477_v38  ;;  %v2869_v40 = vadd.f32 %v2837_v48, %v2771_v8  ;;  %v2805_v28 = vld [vmem:[#allocation2 + $0x469] sm:$0xff] }
 0x26c   :  { %v2838_v27 = vmul.f32 %v5136_v3, %v2805_v28 }
 0x26d   :  { %3114 = vst [vmem:[#allocation3 + $0x140] sm:$0xff] %v3034_v18  ;;  %v2936_v35 = vmax.f32 %v2904_v53, 0.0  ;;  %v2674_v44 = vadd.f32 %v2642_v26, %v2575_v34  ;;  %v2905_v18 = vadd.f32 %v5180_v16, %v2869_v40 }
 0x26f   :  { %3083 = vmatmul.f32.gmra.mxu2 %v2965_v32  ;;  %v2968_v5 = vmin.f32 %v2936_v35, 6.0  ;;  %v2772_v50 = vadd.f32 %v5324_v58, %v2674_v44  ;;  %v2937_v61 = vmax.f32 %v2905_v18, 0.0 }
 0x271   :  { %v2870_v59 = vadd.f32 %v2838_v27, %v2772_v50  ;;  %v2969_v63 = vmin.f32 %v2937_v61, 6.0 }
 0x272   :  { %v3036_v15 = vpop.f32.mrf.mxu2 }
 0x273   :  { %v3037_v7 = vadd.f32 %v5200_v9, %v3036_v15  ;;  %v2906_v10 = vadd.f32 %v5180_v16, %v2870_v59 }
 0x275   :  { %3115 = vst [vmem:[#allocation3 + $0x148] sm:$0xff] %v3037_v7  ;;  %v2938_v42 = vmax.f32 %v2906_v10, 0.0 }
 0x277   :  { %3086 = vmatmul.f32.gmra.mxu2 %v2966_v19  ;;  %v2970_v0 = vmin.f32 %v2938_v42, 6.0 }
 0x27a   :  { %v3039_v20 = vpop.f32.mrf.mxu2 }
 0x27b   :  { %v3040_v41 = vadd.f32 %v5200_v9, %v3039_v20 }
 0x27d   :  { %3116 = vst [vmem:[#allocation3 + $0x150] sm:$0xff] %v3040_v41 }
 0x27f   :  { %3089 = vmatmul.f32.gmra.mxu2 %v2967_v31 }
 0x282   :  { %v3042_v47 = vpop.f32.mrf.mxu2 }
 0x283   :  { %v3043_v32 = vadd.f32 %v5200_v9, %v3042_v47 }
 0x285   :  { %3117 = vst [vmem:[#allocation3 + $0x158] sm:$0xff] %v3043_v32 }
 0x287   :  { %3092 = vmatmul.f32.gmra.mxu2 %v2968_v5 }
 0x28a   :  { %v3045_v52 = vpop.f32.mrf.mxu2 }
 0x28b   :  { %v3046_v54 = vadd.f32 %v5200_v9, %v3045_v52 }
 0x28d   :  { %3118 = vst [vmem:[#allocation3 + $0x160] sm:$0xff] %v3046_v54 }
 0x28f   :  { %3095 = vmatmul.f32.gmra.mxu2 %v2969_v63 }
 0x292   :  { %v3048_v33 = vpop.f32.mrf.mxu2 }
 0x293   :  { %v3049_v23 = vadd.f32 %v5200_v9, %v3048_v33 }
 0x295   :  { %3119 = vst [vmem:[#allocation3 + $0x168] sm:$0xff] %v3049_v23 }
 0x297   :  { %3098 = vmatmul.f32.gmra.mxu2 %v2970_v0 }
 0x29a   :  { %v3051_v58 = vpop.f32.mrf.mxu2 }
 0x29b   :  { %v3052_v3 = vadd.f32 %v5200_v9, %v3051_v58 }
 0x29d   :  { %3120 = vst [vmem:[#allocation3 + $0x170] sm:$0xff] %v3052_v3 }
 0x2a2   :  { %v3054_v46 = vpop.f32.mrf.mxu2 }
 0x2a3   :  { %v3055_v2 = vadd.f32 %v5200_v9, %v3054_v46 }
 0x2a5   :  { %3121 = vst [vmem:[#allocation3 + $0x178] sm:$0xff] %v3055_v2 }
 0x2aa   :  { %v3057_v62 = vpop.f32.mrf.mxu2 }
 0x2ab   :  { %v3058_v13 = vadd.f32 %v5200_v9, %v3057_v62 }
 0x2ad   :  { %3122 = vst [vmem:[#allocation3 + $0x180] sm:$0xff] %v3058_v13 }
 0x2b2   :  { %v3060_v16 = vpop.f32.mrf.mxu2 }
 0x2b3   :  { %v3061_v14 = vadd.f32 %v5200_v9, %v3060_v16 }
 0x2b5   :  { %3123 = vst [vmem:[#allocation3 + $0x188] sm:$0xff] %v3061_v14 }
 0x2ba   :  { %v3063_v36 = vpop.f32.mrf.mxu2 }
 0x2bb   :  { %v3064_v60 = vadd.f32 %v5200_v9, %v3063_v36 }
 0x2bd   :  { %3124 = vst [vmem:[#allocation3 + $0x190] sm:$0xff] %v3064_v60 }
 0x2c2   :  { %v3066_v43 = vpop.f32.mrf.mxu2 }
 0x2c3   :  { %v3067_v37 = vadd.f32 %v5200_v9, %v3066_v43 }
 0x2c5   :  { %3125 = vst [vmem:[#allocation3 + $0x198] sm:$0xff] %v3067_v37 }
 0x2ca   :  { %v3069_v21 = vpop.f32.mrf.mxu2 }
 0x2cb   :  { %v3070_v51 = vadd.f32 %v5200_v9, %v3069_v21 }
 0x2cd   :  { %3126 = vst [vmem:[#allocation3 + $0x1a0] sm:$0xff] %v3070_v51 }
 0x2d2   :  { %v3072_v49 = vpop.f32.mrf.mxu2 }
 0x2d3   :  { %v3073_v17 = vadd.f32 %v5200_v9, %v3072_v49 }
 0x2d5   :  { %3127 = vst [vmem:[#allocation3 + $0x1a8] sm:$0xff] %v3073_v17 }
 0x2da   :  { %v3075_v15 = vpop.f32.mrf.mxu2 }
 0x2db   :  { %v3076_v7 = vadd.f32 %v5200_v9, %v3075_v15 }
 0x2dd   :  { %3128 = vst [vmem:[#allocation3 + $0x1b0] sm:$0xff] %v3076_v7 }
 0x2e2   :  { %v3078_v6 = vpop.f32.mrf.mxu2 }
 0x2e3   :  { %v3079_v29 = vadd.f32 %v5200_v9, %v3078_v6 }
 0x2e5   :  { %3129 = vst [vmem:[#allocation3 + $0x1b8] sm:$0xff] %v3079_v29 }
 0x2ea   :  { %v3081_v57 = vpop.f32.mrf.mxu2 }
 0x2eb   :  { %v3082_v12 = vadd.f32 %v5200_v9, %v3081_v57  ;;  %v3102_v24 = vpop.f32.mrf.mxu3 }
 0x2ec   :  { %v3103_v39 = vadd.f32 %v5200_v9, %v3102_v24 }
 0x2ed   :  { %3130 = vst [vmem:[#allocation3 + $0x1c0] sm:$0xff] %v3082_v12 }
 0x2ee   :  { %3137 = vst [vmem:[#allocation3 + $0x1f8] sm:$0xff] %v3103_v39 }
 0x2f2   :  { %v3084_v45 = vpop.f32.mrf.mxu2 }
 0x2f3   :  { %v3085_v19 = vadd.f32 %v5200_v9, %v3084_v45 }
 0x2f5   :  { %3131 = vst [vmem:[#allocation3 + $0x1c8] sm:$0xff] %v3085_v19 }
 0x2fa   :  { %v3087_v30 = vpop.f32.mrf.mxu2 }
 0x2fb   :  { %v3088_v56 = vadd.f32 %v5200_v9, %v3087_v30 }
 0x2fd   :  { %3132 = vst [vmem:[#allocation3 + $0x1d0] sm:$0xff] %v3088_v56 }
 0x302   :  { %v3090_v11 = vpop.f32.mrf.mxu2 }
 0x303   :  { %v3091_v22 = vadd.f32 %v5200_v9, %v3090_v11 }
 0x305   :  { %3133 = vst [vmem:[#allocation3 + $0x1d8] sm:$0xff] %v3091_v22 }
 0x30a   :  { %v3093_v55 = vpop.f32.mrf.mxu2 }
 0x30b   :  { %v3094_v4 = vadd.f32 %v5200_v9, %v3093_v55 }
 0x30d   :  { %3134 = vst [vmem:[#allocation3 + $0x1e0] sm:$0xff] %v3094_v4 }
 0x312   :  { %v3096_v38 = vpop.f32.mrf.mxu2 }
 0x313   :  { %v3097_v1 = vadd.f32 %v5200_v9, %v3096_v38 }
 0x315   :  { %3135 = vst [vmem:[#allocation3 + $0x1e8] sm:$0xff] %v3097_v1 }
 0x31a   :  { %v3099_v20 = vpop.f32.mrf.mxu2 }
 0x31b   :  { %v3100_v25 = vadd.f32 %v5200_v9, %v3099_v20 }
 0x31d   :  { %3136 = vst [vmem:[#allocation3 + $0x1f0] sm:$0xff] %v3100_v25 }
 0x31e   :  { %3150 = dma.vmem_to_hbm [thread:$0]  %s3143_s27, 8192, %s3145_s29, [#allocation4], %s3340_s30, %s3340_s30, %s3341_s2  }
 0x31f   :  { %3336 = dma.done.wait [#allocation4], 8192  }
 0x320   :  { %3337 = vsyncadd [#allocation4], 4294959104 }
 0x321   :  { %3155 = vsyncpa [#allocation4], 1 }

</bundles_post_ra>
